<compile_context>
chip_gen: v5e
topology: v5e:2x2
jax: 0.10.0
libtpu: 0.0.40
codegen_flags: <defaults>
</compile_context>

<pallas_src>
import numpy as np
import jax
import jax.numpy as jnp
from jax import lax
from jax.experimental import pallas as pl
from jax.experimental.pallas import tpu as pltpu

OUT_PAD = 128  # lane-dense padded width of the (B, 2) logits block


def _round_up(x, m):
    return ((x + m - 1) // m) * m


# ----------------------------------------------------------------------------
# Pallas kernel
# ----------------------------------------------------------------------------
def make_lstm_kernel(T, B, D, Hp, inv_len):
    """Fused 2-layer bidirectional LSTM + masked mean + linear head.

    Static shapes (all lane/sublane aligned):
      T  : padded (bucketed) sequence length
      B  : batch tile (multiple of 8)
      D  : padded embedding dim (multiple of 128)
      Hp : padded hidden dim (multiple of 128)
    inv_len = 1 / max_length (true, un-bucketed) for the time mean.
    """
    H2, H4, H8 = 2 * Hp, 4 * Hp, 8 * Hp

    def lstm_half(gates, c_prev):
        # gates: (B, 4Hp); torch gate order [i | f | g | o]; all slices lane-aligned.
        i = jax.nn.sigmoid(gates[:, 0:Hp])
        f = jax.nn.sigmoid(gates[:, Hp:2 * Hp])
        g = jnp.tanh(gates[:, 2 * Hp:3 * Hp])
        o = jax.nn.sigmoid(gates[:, 3 * Hp:4 * Hp])
        c_new = f * c_prev + i * g
        h_new = o * jnp.tanh(c_new)
        return h_new, c_new

    def kernel(x_ref, len_ref,
               wih0, whh0, b0, wih1, whh1, b1, wlin, blin,
               out_ref,
               xp_ref, l0_ref, h_ref, c_ref, acc_ref):
        lens = len_ref[...]                               # (B, Hp) int32, hoisted

        # ----- layer 0: hoisted input projection (one big MXU matmul) -----
        x2d = x_ref[...].reshape(T * B, D)
        xp0 = jnp.dot(x2d, wih0[...], preferred_element_type=jnp.float32) + b0[...]
        xp_ref[...] = xp0.reshape(T, B, H8)

        # ----- layer 0: fused bidirectional recurrence -----
        h_ref[...] = jnp.zeros((B, H2), jnp.float32)
        c_ref[...] = jnp.zeros((B, H2), jnp.float32)

        def l0_body(s, carry):
            t_f = s
            t_b = T - 1 - s
            m_f = (t_f < lens).astype(jnp.float32)        # (B, Hp)
            m_b = (t_b < lens).astype(jnp.float32)
            h_prev = h_ref[...]                           # (B, 2Hp)
            c_prev = c_ref[...]
            # one block-diagonal matmul -> gates of BOTH directions
            rec = jnp.dot(h_prev, whh0[...], preferred_element_type=jnp.float32)
            g_f = xp_ref[t_f, :, 0:H4] + rec[:, 0:H4]
            g_b = xp_ref[t_b, :, H4:H8] + rec[:, H4:H8]
            h_f, c_f = lstm_half(g_f, c_prev[:, 0:Hp])
            h_b, c_b = lstm_half(g_b, c_prev[:, Hp:H2])
            # layer-0 outputs (zeroed at padded steps, like pad_packed_sequence)
            l0_ref[t_f, :, 0:Hp] = m_f * h_f
            l0_ref[t_b, :, Hp:H2] = m_b * h_b
            # masked carries (packed-sequence semantics)
            h_ref[:, 0:Hp] = m_f * h_f + (1.0 - m_f) * h_prev[:, 0:Hp]
            h_ref[:, Hp:H2] = m_b * h_b + (1.0 - m_b) * h_prev[:, Hp:H2]
            c_ref[:, 0:Hp] = m_f * c_f + (1.0 - m_f) * c_prev[:, 0:Hp]
            c_ref[:, Hp:H2] = m_b * c_b + (1.0 - m_b) * c_prev[:, Hp:H2]
            return carry

        lax.fori_loop(0, T, l0_body, 0)

        # ----- layer 1: hoisted input projection (reuses xp scratch) -----
        l0v = l0_ref[...].reshape(T * B, H2)
        xp1 = jnp.dot(l0v, wih1[...], preferred_element_type=jnp.float32) + b1[...]
        xp_ref[...] = xp1.reshape(T, B, H8)

        # ----- layer 1: fused bidirectional recurrence + time-mean accumulation -----
        h_ref[...] = jnp.zeros((B, H2), jnp.float32)
        c_ref[...] = jnp.zeros((B, H2), jnp.float32)
        acc_ref[...] = jnp.zeros((B, H2), jnp.float32)

        def l1_body(s, carry):
            t_f = s
            t_b = T - 1 - s
            m_f = (t_f < lens).astype(jnp.float32)
            m_b = (t_b < lens).astype(jnp.float32)
            h_prev = h_ref[...]
            c_prev = c_ref[...]
            rec = jnp.dot(h_prev, whh1[...], preferred_element_type=jnp.float32)
            g_f = xp_ref[t_f, :, 0:H4] + rec[:, 0:H4]
            g_b = xp_ref[t_b, :, H4:H8] + rec[:, H4:H8]
            h_f, c_f = lstm_half(g_f, c_prev[:, 0:Hp])
            h_b, c_b = lstm_half(g_b, c_prev[:, Hp:H2])
            acc_ref[:, 0:Hp] = acc_ref[:, 0:Hp] + m_f * h_f
            acc_ref[:, Hp:H2] = acc_ref[:, Hp:H2] + m_b * h_b
            h_ref[:, 0:Hp] = m_f * h_f + (1.0 - m_f) * h_prev[:, 0:Hp]
            h_ref[:, Hp:H2] = m_b * h_b + (1.0 - m_b) * h_prev[:, Hp:H2]
            c_ref[:, 0:Hp] = m_f * c_f + (1.0 - m_f) * c_prev[:, 0:Hp]
            c_ref[:, Hp:H2] = m_b * c_b + (1.0 - m_b) * c_prev[:, Hp:H2]
            return carry

        lax.fori_loop(0, T, l1_body, 0)

        # mean over the (true) max_length, then final linear (output lane-padded)
        mean = acc_ref[...] * inv_len                                   # (B, 2Hp)
        out_ref[...] = (jnp.dot(mean, wlin[...], preferred_element_type=jnp.float32)
                        + blin[...])

    return kernel


# ----------------------------------------------------------------------------
# Weight preparation: pad / fuse torch-style LSTM weights into MXU-friendly form
# ----------------------------------------------------------------------------
def _prepare_weights(params, d_embed, d_hidden, Dp, Hp):
    H = d_hidden
    w = params["lstm"]   # [wihT, whhT, b] x {l0f, l0b, l1f, l1b}

    def gatepad_cols(wT):
        # (..., 4H) -> (..., 4Hp): pad each of the 4 gates (i,f,g,o) to Hp lanes.
        lead = wT.shape[:-1]
        w4 = wT.reshape(lead + (4, H))
        pads = [(0, 0)] * (w4.ndim - 1) + [(0, Hp - H)]
        return jnp.pad(w4, pads).reshape(lead + (4 * Hp,))

    def rowpad(wm, rows_to):
        pads = [(0, rows_to - wm.shape[0])] + [(0, 0)] * (wm.ndim - 1)
        return jnp.pad(wm, pads)

    def dirsplit_rows(wT):
        # input rows laid out as [fwd H | bwd H] -> [fwd Hp | bwd Hp]
        return jnp.concatenate([rowpad(wT[:H], Hp), rowpad(wT[H:], Hp)], axis=0)

    def blockdiag(whh_f, whh_b):
        z = jnp.zeros((Hp, 4 * Hp), jnp.float32)
        top = jnp.concatenate([rowpad(gatepad_cols(whh_f), Hp), z], axis=1)
        bot = jnp.concatenate([z, rowpad(gatepad_cols(whh_b), Hp)], axis=1)
        return jnp.concatenate([top, bot], axis=0)                       # (2Hp, 8Hp)

    # layer 0
    wih0 = jnp.concatenate([rowpad(gatepad_cols(w[0]), Dp),
                            rowpad(gatepad_cols(w[3]), Dp)], axis=1)     # (Dp, 8Hp)
    whh0 = blockdiag(w[1], w[4])                                         # (2Hp, 8Hp)
    b0 = jnp.concatenate([gatepad_cols(w[2]), gatepad_cols(w[5])], axis=1)   # (1, 8Hp)

    # layer 1 (input dim 2H = [h_fwd | h_bwd])
    wih1 = jnp.concatenate([dirsplit_rows(gatepad_cols(w[6])),
                            dirsplit_rows(gatepad_cols(w[9]))], axis=1)  # (2Hp, 8Hp)
    whh1 = blockdiag(w[7], w[10])
    b1 = jnp.concatenate([gatepad_cols(w[8]), gatepad_cols(w[11])], axis=1)

    # final linear: (2H, 2) -> (2Hp, OUT_PAD)
    wlin = dirsplit_rows(params["wlin_T"])
    wlin = jnp.pad(wlin, [(0, 0), (0, OUT_PAD - wlin.shape[1])])
    blin = jnp.pad(params["blin"], [(0, 0), (0, OUT_PAD - params["blin"].shape[1])])
    return (wih0, whh0, b0, wih1, whh1, b1, wlin, blin)


# ----------------------------------------------------------------------------
# Wrapper (plain-JAX glue + pallas_call)
# ----------------------------------------------------------------------------
def lstm_model_forward(text, mask, length, params, d_embed, d_hidden,
                       *, batch_tile=8, t_multiple=8):
    assert batch_tile % 8 == 0, "batch tile must be sublane-aligned"
    B, S = text.shape
    length_np = np.asarray(length)
    max_length = int(np.max(length_np))             # static, like torch's max(length)
    T = max_length
    Tp = _round_up(T, t_multiple)                   # bucket T -> fewer recompiles
    Hp = _round_up(max(d_hidden, 1), 128)
    Dp = _round_up(max(d_embed, 1), 128)
    tB = batch_tile
    Bp = _round_up(max(B, 1), tB)
    nb = Bp // tB

    # embedding lookup + mask multiply (matches the torch forward), then pad.
    text_sl = text[:, :T]
    x = params["embedding"][text_sl].astype(jnp.float32)                 # (B, T, D)
    x = x * mask[:, :T, None].astype(jnp.float32)
    x = jnp.transpose(x, (1, 0, 2))                                      # (T, B, D)
    x = jnp.pad(x, ((0, Tp - T), (0, Bp - B), (0, Dp - d_embed)))        # (Tp, Bp, Dp)

    # per-sample lengths broadcast over the hidden lanes (lane-dense mask source)
    lens = jnp.pad(jnp.asarray(length_np, jnp.int32), (0, Bp - B))
    lens_b = jnp.broadcast_to(lens[:, None], (Bp, Hp))

    weights = _prepare_weights(params, d_embed, d_hidden, Dp, Hp)
    w_specs = [pl.BlockSpec(w.shape, lambda b: (0, 0)) for w in weights]

    kernel = make_lstm_kernel(Tp, tB, Dp, Hp, inv_len=1.0 / T)

    out = pl.pallas_call(
        kernel,
        out_shape=jax.ShapeDtypeStruct((Bp, OUT_PAD), jnp.float32),
        grid=(nb,),
        in_specs=[
            pl.BlockSpec((Tp, tB, Dp), lambda b: (0, b, 0)),   # x, batch tiled
            pl.BlockSpec((tB, Hp), lambda b: (b, 0)),          # lengths
        ] + w_specs,
        out_specs=pl.BlockSpec((tB, OUT_PAD), lambda b: (b, 0)),
        scratch_shapes=[
            pltpu.VMEM((Tp, tB, 8 * Hp), jnp.float32),   # hoisted input projections
            pltpu.VMEM((Tp, tB, 2 * Hp), jnp.float32),   # layer-0 outputs [h_f | h_b]
            pltpu.VMEM((tB, 2 * Hp), jnp.float32),       # h state
            pltpu.VMEM((tB, 2 * Hp), jnp.float32),       # c state
            pltpu.VMEM((tB, 2 * Hp), jnp.float32),       # time-mean accumulator
        ],
        compiler_params=pltpu.CompilerParams(
            dimension_semantics=("parallel",)),          # batch tiles across TCs (v7x)
    )(x, lens_b, *weights)
    return out[:B, :2]


# ----------------------------------------------------------------------------
# Pure-JAX reference (same math, no Pallas) for a sanity check
# ----------------------------------------------------------------------------
def lstm_model_reference(text, mask, length, params, d_embed, d_hidden):
    H = d_hidden
    B, _ = text.shape
    T = int(np.max(np.asarray(length)))
    x = params["embedding"][text[:, :T]].astype(jnp.float32)
    x = x * mask[:, :T, None].astype(jnp.float32)
    x = jnp.transpose(x, (1, 0, 2))                                      # (T, B, D)
    valid = (jnp.arange(T)[:, None] < jnp.asarray(length)[None, :]).astype(jnp.float32)[:, :, None]

    def cell(xt, h, c, wih_T, whh_T, b):
        g = xt @ wih_T + h @ whh_T + b
        i, f, gg, o = jnp.split(g, 4, axis=-1)
        i, f, gg, o = jax.nn.sigmoid(i), jax.nn.sigmoid(f), jnp.tanh(gg), jax.nn.sigmoid(o)
        c = f * c + i * gg
        h = o * jnp.tanh(c)
        return h, c

    def run_dir(inp, w, reverse):
        wih_T, whh_T, b = w
        h = jnp.zeros((B, H), jnp.float32)
        c = jnp.zeros((B, H), jnp.float32)
        outs = [None] * T
        order = range(T - 1, -1, -1) if reverse else range(T)
        for t in order:
            m = valid[t]
            h_new, c_new = cell(inp[t], h, c, wih_T, whh_T, b)
            outs[t] = m * h_new
            h = m * h_new + (1.0 - m) * h
            c = m * c_new + (1.0 - m) * c
        return jnp.stack(outs, axis=0)                                   # (T, B, H)

    w = params["lstm"]
    l0 = jnp.concatenate([run_dir(x, (w[0], w[1], w[2]), False),
                          run_dir(x, (w[3], w[4], w[5]), True)], axis=-1)
    l1 = jnp.concatenate([run_dir(l0, (w[6], w[7], w[8]), False),
                          run_dir(l0, (w[9], w[10], w[11]), True)], axis=-1)
    mean = jnp.sum(l1, axis=0) / T                                       # (B, 2H)
    return mean @ params["wlin_T"] + params["blin"]


# ----------------------------------------------------------------------------
# Deterministic parameter init (shapes follow LSTM_model.__init__)
# ----------------------------------------------------------------------------
def init_params(key, vocab, d_embed, d_hidden):
    assert d_embed == 2 * d_hidden, "nn.Linear(d_embed, 2) assumes d_embed == 2*d_hidden"
    keys = jax.random.split(key, 32)
    ki = iter(range(32))
    params = {}
    params["embedding"] = jax.random.normal(keys[next(ki)], (vocab, d_embed), jnp.float32)

    k_lstm = 1.0 / np.sqrt(d_hidden)

    def u(kk, shape, scale):
        return jax.random.uniform(kk, shape, jnp.float32, -scale, scale)

    lstm_w = []
    for layer in range(2):                               # num_layers = 2
        d_in = d_embed if layer == 0 else 2 * d_hidden   # bidirectional concat feeds layer 1
        for _direction in range(2):                      # forward, backward
            wih = u(keys[next(ki)], (4 * d_hidden, d_in), k_lstm)
            whh = u(keys[next(ki)], (4 * d_hidden, d_hidden), k_lstm)
            bih = u(keys[next(ki)], (4 * d_hidden,), k_lstm)
            bhh = u(keys[next(ki)], (4 * d_hidden,), k_lstm)
            lstm_w += [wih.T, whh.T, (bih + bhh)[None, :]]
    params["lstm"] = lstm_w

    k_lin = 1.0 / np.sqrt(d_embed)
    wlin = u(keys[next(ki)], (2, d_embed), k_lin)        # nn.Linear(d_embed, 2)
    blin = u(keys[next(ki)], (2,), k_lin)
    params["wlin_T"] = wlin.T                            # (2H, 2)
    params["blin"] = blin[None, :]                       # (1, 2)
    return params


# ----------------------------------------------------------------------------
if __name__ == "__main__":
    # Small shapes consistent with the module: d_embed = 2 * d_hidden (300 = 2*150)
    B, S = 2, 10
    D_EMBED, D_HIDDEN = 32, 16
    VOCAB = 50

    key = jax.random.PRNGKey(0)
    k_text, k_params = jax.random.split(key)

    text = jax.random.randint(k_text, (B, S), 0, VOCAB, dtype=jnp.int32)
    length = np.array([8, 5], dtype=np.int64)
    mask = (np.arange(S)[None, :] < length[:, None]).astype(np.float32)
    mask = jnp.asarray(mask)

    params = init_params(k_params, VOCAB, D_EMBED, D_HIDDEN)

    out = lstm_model_forward(text, mask, length, params, D_EMBED, D_HIDDEN)
    out = jax.block_until_ready(out)

    ref = jax.block_until_ready(
        lstm_model_reference(text, mask, length, params, D_EMBED, D_HIDDEN))

    np.testing.assert_allclose(np.asarray(out), np.asarray(ref), rtol=1e-3, atol=1e-3)
    assert out.shape == (B, 2)
    print("KERNEL_OK")
</pallas_src>

<mosaic_0001>
module attributes {stable_mosaic.version = 11 : i64} {
  func.func @kernel(%arg0: i32, %arg1: memref<8x8x128xf32, #tpu.memory_space<vmem>>, %arg2: memref<8x128xi32, #tpu.memory_space<vmem>>, %arg3: memref<128x1024xf32, #tpu.memory_space<vmem>>, %arg4: memref<256x1024xf32, #tpu.memory_space<vmem>>, %arg5: memref<1x1024xf32, #tpu.memory_space<vmem>>, %arg6: memref<256x1024xf32, #tpu.memory_space<vmem>>, %arg7: memref<256x1024xf32, #tpu.memory_space<vmem>>, %arg8: memref<1x1024xf32, #tpu.memory_space<vmem>>, %arg9: memref<256x128xf32, #tpu.memory_space<vmem>>, %arg10: memref<1x128xf32, #tpu.memory_space<vmem>>, %arg11: memref<8x128xf32, #tpu.memory_space<vmem>>, %arg12: memref<8x8x1024xf32, #tpu.memory_space<vmem>>, %arg13: memref<8x8x256xf32, #tpu.memory_space<vmem>>, %arg14: memref<8x256xf32, #tpu.memory_space<vmem>>, %arg15: memref<8x256xf32, #tpu.memory_space<vmem>>, %arg16: memref<8x256xf32, #tpu.memory_space<vmem>>) attributes {dimension_semantics = [#tpu.dimension_semantics<parallel>], iteration_bounds = array<i64: 1>, scalar_prefetch = 0 : i64, scratch_operands = 5 : i64, tpu.core_type = #tpu.core_type<tc>, window_params = [{transform_indices = @transform_0, window_bounds = array<i64: 8, 8, 128>}, {transform_indices = @transform_1, window_bounds = array<i64: 8, 128>}, {pipeline_mode = #tpu.pipeline_mode<synchronous>, transform_indices = @transform_2, window_bounds = array<i64: 128, 1024>}, {pipeline_mode = #tpu.pipeline_mode<synchronous>, transform_indices = @transform_3, window_bounds = array<i64: 256, 1024>}, {pipeline_mode = #tpu.pipeline_mode<synchronous>, transform_indices = @transform_4, window_bounds = array<i64: 1, 1024>}, {pipeline_mode = #tpu.pipeline_mode<synchronous>, transform_indices = @transform_5, window_bounds = array<i64: 256, 1024>}, {pipeline_mode = #tpu.pipeline_mode<synchronous>, transform_indices = @transform_6, window_bounds = array<i64: 256, 1024>}, {pipeline_mode = #tpu.pipeline_mode<synchronous>, transform_indices = @transform_7, window_bounds = array<i64: 1, 1024>}, {pipeline_mode = #tpu.pipeline_mode<synchronous>, transform_indices = @transform_8, window_bounds = array<i64: 256, 128>}, {pipeline_mode = #tpu.pipeline_mode<synchronous>, transform_indices = @transform_9, window_bounds = array<i64: 1, 128>}, {transform_indices = @transform_10, window_bounds = array<i64: 8, 128>}]} {
    %c0 = arith.constant 0 : index
    %c0_0 = arith.constant 0 : index
    %0 = vector.load %arg2[%c0, %c0_0] : memref<8x128xi32, #tpu.memory_space<vmem>>, vector<8x128xi32>
    %c0_1 = arith.constant 0 : index
    %c0_2 = arith.constant 0 : index
    %c0_3 = arith.constant 0 : index
    %1 = vector.load %arg1[%c0_1, %c0_2, %c0_3] : memref<8x8x128xf32, #tpu.memory_space<vmem>>, vector<8x8x128xf32>
    %2 = vector.shape_cast %1 : vector<8x8x128xf32> to vector<64x128xf32>
    %c0_4 = arith.constant 0 : index
    %c0_5 = arith.constant 0 : index
    %3 = vector.load %arg3[%c0_4, %c0_5] : memref<128x1024xf32, #tpu.memory_space<vmem>>, vector<128x1024xf32>
    %cst = arith.constant dense<0.000000e+00> : vector<64x1024xf32>
    %4 = tpu.matmul %2, %3, %cst {dimension_numbers = #tpu.dot_dimension_numbers<[1], [0], [0], [1], [0, 0, 1, 1], [], []>} : vector<64x128xf32>, vector<128x1024xf32>, vector<64x1024xf32> -> vector<64x1024xf32>
    %c0_6 = arith.constant 0 : index
    %c0_7 = arith.constant 0 : index
    %5 = vector.load %arg5[%c0_6, %c0_7] : memref<1x1024xf32, #tpu.memory_space<vmem>>, vector<1x1024xf32>
    %6 = vector.broadcast %5 : vector<1x1024xf32> to vector<64x1024xf32>
    %7 = arith.addf %4, %6 : vector<64x1024xf32>
    %8 = vector.shape_cast %7 : vector<64x1024xf32> to vector<8x8x1024xf32>
    %c0_8 = arith.constant 0 : index
    %c0_9 = arith.constant 0 : index
    %c0_10 = arith.constant 0 : index
    %9 = vector.load %arg12[%c0_8, %c0_9, %c0_10] : memref<8x8x1024xf32, #tpu.memory_space<vmem>>, vector<8x8x1024xf32>
    tpu.vector_store %arg12[%c0_8, %c0_9, %c0_10], %8 {strides = array<i32>} : memref<8x8x1024xf32, #tpu.memory_space<vmem>>, vector<8x8x1024xf32>,
    %cst_11 = arith.constant 0.000000e+00 : f32
    %10 = vector.broadcast %cst_11 : f32 to vector<8x256xf32>
    %c0_12 = arith.constant 0 : index
    %c0_13 = arith.constant 0 : index
    %11 = vector.load %arg14[%c0_12, %c0_13] : memref<8x256xf32, #tpu.memory_space<vmem>>, vector<8x256xf32>
    tpu.vector_store %arg14[%c0_12, %c0_13], %10 {strides = array<i32>} : memref<8x256xf32, #tpu.memory_space<vmem>>, vector<8x256xf32>,
    %cst_14 = arith.constant 0.000000e+00 : f32
    %12 = vector.broadcast %cst_14 : f32 to vector<8x256xf32>
    %c0_15 = arith.constant 0 : index
    %c0_16 = arith.constant 0 : index
    %13 = vector.load %arg15[%c0_15, %c0_16] : memref<8x256xf32, #tpu.memory_space<vmem>>, vector<8x256xf32>
    tpu.vector_store %arg15[%c0_15, %c0_16], %12 {strides = array<i32>} : memref<8x256xf32, #tpu.memory_space<vmem>>, vector<8x256xf32>,
    %c0_i32 = arith.constant 0 : i32
    %c8_i32 = arith.constant 8 : i32
    %14 = arith.addi %c0_i32, %c8_i32 : i32
    %c1_i32 = arith.constant 1 : i32
    scf.for %arg17 = %c0_i32 to %14 step %c1_i32  : i32 {
      %c7_i32 = arith.constant 7 : i32
      %40 = arith.subi %c7_i32, %arg17 : i32
      %41 = vector.broadcast %arg17 : i32 to vector<8x128xi32>
      %42 = arith.cmpi slt, %41, %0 : vector<8x128xi32>
      %43 = arith.extui %42 : vector<8x128xi1> to vector<8x128xi32>
      %44 = arith.sitofp %43 : vector<8x128xi32> to vector<8x128xf32>
      %45 = vector.broadcast %40 : i32 to vector<8x128xi32>
      %46 = arith.cmpi slt, %45, %0 : vector<8x128xi32>
      %47 = arith.extui %46 : vector<8x128xi1> to vector<8x128xi32>
      %48 = arith.sitofp %47 : vector<8x128xi32> to vector<8x128xf32>
      %c0_52 = arith.constant 0 : index
      %c0_53 = arith.constant 0 : index
      %49 = vector.load %arg14[%c0_52, %c0_53] : memref<8x256xf32, #tpu.memory_space<vmem>>, vector<8x256xf32>
      %c0_54 = arith.constant 0 : index
      %c0_55 = arith.constant 0 : index
      %50 = vector.load %arg15[%c0_54, %c0_55] : memref<8x256xf32, #tpu.memory_space<vmem>>, vector<8x256xf32>
      %c0_56 = arith.constant 0 : index
      %c0_57 = arith.constant 0 : index
      %51 = vector.load %arg4[%c0_56, %c0_57] : memref<256x1024xf32, #tpu.memory_space<vmem>>, vector<256x1024xf32>
      %cst_58 = arith.constant dense<0.000000e+00> : vector<8x1024xf32>
      %52 = tpu.matmul %49, %51, %cst_58 {dimension_numbers = #tpu.dot_dimension_numbers<[1], [0], [0], [1], [0, 0, 1, 1], [], []>} : vector<8x256xf32>, vector<256x1024xf32>, vector<8x1024xf32> -> vector<8x1024xf32>
      %53 = arith.index_cast %arg17 : i32 to index
      %c0_59 = arith.constant 0 : index
      %c0_60 = arith.constant 0 : index
      %54 = vector.load %arg12[%53, %c0_59, %c0_60] : memref<8x8x1024xf32, #tpu.memory_space<vmem>>, vector<1x8x512xf32>
      %55 = vector.shape_cast %54 : vector<1x8x512xf32> to vector<8x512xf32>
      %56 = vector.extract_strided_slice %52 {offsets = [0, 0], sizes = [8, 512], strides = [1, 1]} : vector<8x1024xf32> to vector<8x512xf32>
      %57 = arith.addf %55, %56 : vector<8x512xf32>
      %58 = arith.index_cast %40 : i32 to index
      %c0_61 = arith.constant 0 : index
      %c512 = arith.constant 512 : index
      %59 = vector.load %arg12[%58, %c0_61, %c512] : memref<8x8x1024xf32, #tpu.memory_space<vmem>>, vector<1x8x512xf32>
      %60 = vector.shape_cast %59 : vector<1x8x512xf32> to vector<8x512xf32>
      %61 = vector.extract_strided_slice %52 {offsets = [0, 512], sizes = [8, 512], strides = [1, 1]} : vector<8x1024xf32> to vector<8x512xf32>
      %62 = arith.addf %60, %61 : vector<8x512xf32>
      %63 = vector.extract_strided_slice %50 {offsets = [0, 0], sizes = [8, 128], strides = [1, 1]} : vector<8x256xf32> to vector<8x128xf32>
      %64 = vector.extract_strided_slice %57 {offsets = [0, 0], sizes = [8, 128], strides = [1, 1]} : vector<8x512xf32> to vector<8x128xf32>
      %65 = arith.negf %64 : vector<8x128xf32>
      %66 = math.exp %65 : vector<8x128xf32>
      %cst_62 = arith.constant 1.000000e+00 : f32
      %67 = vector.broadcast %cst_62 : f32 to vector<8x128xf32>
      %68 = arith.addf %67, %66 : vector<8x128xf32>
      %69 = arith.divf %67, %68 : vector<8x128xf32>
      %70 = vector.extract_strided_slice %57 {offsets = [0, 128], sizes = [8, 128], strides = [1, 1]} : vector<8x512xf32> to vector<8x128xf32>
      %71 = arith.negf %70 : vector<8x128xf32>
      %72 = math.exp %71 : vector<8x128xf32>
      %cst_63 = arith.constant 1.000000e+00 : f32
      %73 = vector.broadcast %cst_63 : f32 to vector<8x128xf32>
      %74 = arith.addf %73, %72 : vector<8x128xf32>
      %75 = arith.divf %73, %74 : vector<8x128xf32>
      %76 = vector.extract_strided_slice %57 {offsets = [0, 256], sizes = [8, 128], strides = [1, 1]} : vector<8x512xf32> to vector<8x128xf32>
      %77 = math.tanh %76 : vector<8x128xf32>
      %78 = vector.extract_strided_slice %57 {offsets = [0, 384], sizes = [8, 128], strides = [1, 1]} : vector<8x512xf32> to vector<8x128xf32>
      %79 = arith.negf %78 : vector<8x128xf32>
      %80 = math.exp %79 : vector<8x128xf32>
      %cst_64 = arith.constant 1.000000e+00 : f32
      %81 = vector.broadcast %cst_64 : f32 to vector<8x128xf32>
      %82 = arith.addf %81, %80 : vector<8x128xf32>
      %83 = arith.divf %81, %82 : vector<8x128xf32>
      %84 = arith.mulf %75, %63 : vector<8x128xf32>
      %85 = arith.mulf %69, %77 : vector<8x128xf32>
      %86 = arith.addf %84, %85 : vector<8x128xf32>
      %87 = math.tanh %86 : vector<8x128xf32>
      %88 = arith.mulf %83, %87 : vector<8x128xf32>
      %89 = vector.extract_strided_slice %50 {offsets = [0, 128], sizes = [8, 128], strides = [1, 1]} : vector<8x256xf32> to vector<8x128xf32>
      %90 = vector.extract_strided_slice %62 {offsets = [0, 0], sizes = [8, 128], strides = [1, 1]} : vector<8x512xf32> to vector<8x128xf32>
      %91 = arith.negf %90 : vector<8x128xf32>
      %92 = math.exp %91 : vector<8x128xf32>
      %cst_65 = arith.constant 1.000000e+00 : f32
      %93 = vector.broadcast %cst_65 : f32 to vector<8x128xf32>
      %94 = arith.addf %93, %92 : vector<8x128xf32>
      %95 = arith.divf %93, %94 : vector<8x128xf32>
      %96 = vector.extract_strided_slice %62 {offsets = [0, 128], sizes = [8, 128], strides = [1, 1]} : vector<8x512xf32> to vector<8x128xf32>
      %97 = arith.negf %96 : vector<8x128xf32>
      %98 = math.exp %97 : vector<8x128xf32>
      %cst_66 = arith.constant 1.000000e+00 : f32
      %99 = vector.broadcast %cst_66 : f32 to vector<8x128xf32>
      %100 = arith.addf %99, %98 : vector<8x128xf32>
      %101 = arith.divf %99, %100 : vector<8x128xf32>
      %102 = vector.extract_strided_slice %62 {offsets = [0, 256], sizes = [8, 128], strides = [1, 1]} : vector<8x512xf32> to vector<8x128xf32>
      %103 = math.tanh %102 : vector<8x128xf32>
      %104 = vector.extract_strided_slice %62 {offsets = [0, 384], sizes = [8, 128], strides = [1, 1]} : vector<8x512xf32> to vector<8x128xf32>
      %105 = arith.negf %104 : vector<8x128xf32>
      %106 = math.exp %105 : vector<8x128xf32>
      %cst_67 = arith.constant 1.000000e+00 : f32
      %107 = vector.broadcast %cst_67 : f32 to vector<8x128xf32>
      %108 = arith.addf %107, %106 : vector<8x128xf32>
      %109 = arith.divf %107, %108 : vector<8x128xf32>
      %110 = arith.mulf %101, %89 : vector<8x128xf32>
      %111 = arith.mulf %95, %103 : vector<8x128xf32>
      %112 = arith.addf %110, %111 : vector<8x128xf32>
      %113 = math.tanh %112 : vector<8x128xf32>
      %114 = arith.mulf %109, %113 : vector<8x128xf32>
      %115 = arith.mulf %44, %88 : vector<8x128xf32>
      %116 = arith.index_cast %arg17 : i32 to index
      %c0_68 = arith.constant 0 : index
      %c0_69 = arith.constant 0 : index
      %117 = vector.load %arg13[%116, %c0_68, %c0_69] : memref<8x8x256xf32, #tpu.memory_space<vmem>>, vector<1x8x128xf32>
      %118 = vector.shape_cast %117 : vector<1x8x128xf32> to vector<8x128xf32>
      %119 = vector.shape_cast %115 : vector<8x128xf32> to vector<1x8x128xf32>
      tpu.vector_store %arg13[%116, %c0_68, %c0_69], %119 {strides = array<i32>} : memref<8x8x256xf32, #tpu.memory_space<vmem>>, vector<1x8x128xf32>,
      %120 = arith.mulf %48, %114 : vector<8x128xf32>
      %121 = arith.index_cast %40 : i32 to index
      %c0_70 = arith.constant 0 : index
      %c128 = arith.constant 128 : index
      %122 = vector.load %arg13[%121, %c0_70, %c128] : memref<8x8x256xf32, #tpu.memory_space<vmem>>, vector<1x8x128xf32>
      %123 = vector.shape_cast %122 : vector<1x8x128xf32> to vector<8x128xf32>
      %124 = vector.shape_cast %120 : vector<8x128xf32> to vector<1x8x128xf32>
      tpu.vector_store %arg13[%121, %c0_70, %c128], %124 {strides = array<i32>} : memref<8x8x256xf32, #tpu.memory_space<vmem>>, vector<1x8x128xf32>,
      %125 = arith.mulf %44, %88 : vector<8x128xf32>
      %cst_71 = arith.constant 1.000000e+00 : f32
      %126 = vector.broadcast %cst_71 : f32 to vector<8x128xf32>
      %127 = arith.subf %126, %44 : vector<8x128xf32>
      %128 = vector.extract_strided_slice %49 {offsets = [0, 0], sizes = [8, 128], strides = [1, 1]} : vector<8x256xf32> to vector<8x128xf32>
      %129 = arith.mulf %127, %128 : vector<8x128xf32>
      %130 = arith.addf %125, %129 : vector<8x128xf32>
      %c0_72 = arith.constant 0 : index
      %c0_73 = arith.constant 0 : index
      %131 = vector.load %arg14[%c0_72, %c0_73] : memref<8x256xf32, #tpu.memory_space<vmem>>, vector<8x128xf32>
      tpu.vector_store %arg14[%c0_72, %c0_73], %130 {strides = array<i32>} : memref<8x256xf32, #tpu.memory_space<vmem>>, vector<8x128xf32>,
      %132 = arith.mulf %48, %114 : vector<8x128xf32>
      %cst_74 = arith.constant 1.000000e+00 : f32
      %133 = vector.broadcast %cst_74 : f32 to vector<8x128xf32>
      %134 = arith.subf %133, %48 : vector<8x128xf32>
      %135 = vector.extract_strided_slice %49 {offsets = [0, 128], sizes = [8, 128], strides = [1, 1]} : vector<8x256xf32> to vector<8x128xf32>
      %136 = arith.mulf %134, %135 : vector<8x128xf32>
      %137 = arith.addf %132, %136 : vector<8x128xf32>
      %c0_75 = arith.constant 0 : index
      %c128_76 = arith.constant 128 : index
      %138 = vector.load %arg14[%c0_75, %c128_76] : memref<8x256xf32, #tpu.memory_space<vmem>>, vector<8x128xf32>
      tpu.vector_store %arg14[%c0_75, %c128_76], %137 {strides = array<i32>} : memref<8x256xf32, #tpu.memory_space<vmem>>, vector<8x128xf32>,
      %139 = arith.mulf %44, %86 : vector<8x128xf32>
      %cst_77 = arith.constant 1.000000e+00 : f32
      %140 = vector.broadcast %cst_77 : f32 to vector<8x128xf32>
      %141 = arith.subf %140, %44 : vector<8x128xf32>
      %142 = vector.extract_strided_slice %50 {offsets = [0, 0], sizes = [8, 128], strides = [1, 1]} : vector<8x256xf32> to vector<8x128xf32>
      %143 = arith.mulf %141, %142 : vector<8x128xf32>
      %144 = arith.addf %139, %143 : vector<8x128xf32>
      %c0_78 = arith.constant 0 : index
      %c0_79 = arith.constant 0 : index
      %145 = vector.load %arg15[%c0_78, %c0_79] : memref<8x256xf32, #tpu.memory_space<vmem>>, vector<8x128xf32>
      tpu.vector_store %arg15[%c0_78, %c0_79], %144 {strides = array<i32>} : memref<8x256xf32, #tpu.memory_space<vmem>>, vector<8x128xf32>,
      %146 = arith.mulf %48, %112 : vector<8x128xf32>
      %cst_80 = arith.constant 1.000000e+00 : f32
      %147 = vector.broadcast %cst_80 : f32 to vector<8x128xf32>
      %148 = arith.subf %147, %48 : vector<8x128xf32>
      %149 = vector.extract_strided_slice %50 {offsets = [0, 128], sizes = [8, 128], strides = [1, 1]} : vector<8x256xf32> to vector<8x128xf32>
      %150 = arith.mulf %148, %149 : vector<8x128xf32>
      %151 = arith.addf %146, %150 : vector<8x128xf32>
      %c0_81 = arith.constant 0 : index
      %c128_82 = arith.constant 128 : index
      %152 = vector.load %arg15[%c0_81, %c128_82] : memref<8x256xf32, #tpu.memory_space<vmem>>, vector<8x128xf32>
      tpu.vector_store %arg15[%c0_81, %c128_82], %151 {strides = array<i32>} : memref<8x256xf32, #tpu.memory_space<vmem>>, vector<8x128xf32>,
    }
    %c8_i32_17 = arith.constant 8 : i32
    %c0_18 = arith.constant 0 : index
    %c0_19 = arith.constant 0 : index
    %c0_20 = arith.constant 0 : index
    %15 = vector.load %arg13[%c0_18, %c0_19, %c0_20] : memref<8x8x256xf32, #tpu.memory_space<vmem>>, vector<8x8x256xf32>
    %16 = vector.shape_cast %15 : vector<8x8x256xf32> to vector<64x256xf32>
    %c0_21 = arith.constant 0 : index
    %c0_22 = arith.constant 0 : index
    %17 = vector.load %arg6[%c0_21, %c0_22] : memref<256x1024xf32, #tpu.memory_space<vmem>>, vector<256x1024xf32>
    %cst_23 = arith.constant dense<0.000000e+00> : vector<64x1024xf32>
    %18 = tpu.matmul %16, %17, %cst_23 {dimension_numbers = #tpu.dot_dimension_numbers<[1], [0], [0], [1], [0, 0, 1, 1], [], []>} : vector<64x256xf32>, vector<256x1024xf32>, vector<64x1024xf32> -> vector<64x1024xf32>
    %c0_24 = arith.constant 0 : index
    %c0_25 = arith.constant 0 : index
    %19 = vector.load %arg8[%c0_24, %c0_25] : memref<1x1024xf32, #tpu.memory_space<vmem>>, vector<1x1024xf32>
    %20 = vector.broadcast %19 : vector<1x1024xf32> to vector<64x1024xf32>
    %21 = arith.addf %18, %20 : vector<64x1024xf32>
    %22 = vector.shape_cast %21 : vector<64x1024xf32> to vector<8x8x1024xf32>
    %c0_26 = arith.constant 0 : index
    %c0_27 = arith.constant 0 : index
    %c0_28 = arith.constant 0 : index
    %23 = vector.load %arg12[%c0_26, %c0_27, %c0_28] : memref<8x8x1024xf32, #tpu.memory_space<vmem>>, vector<8x8x1024xf32>
    tpu.vector_store %arg12[%c0_26, %c0_27, %c0_28], %22 {strides = array<i32>} : memref<8x8x1024xf32, #tpu.memory_space<vmem>>, vector<8x8x1024xf32>,
    %cst_29 = arith.constant 0.000000e+00 : f32
    %24 = vector.broadcast %cst_29 : f32 to vector<8x256xf32>
    %c0_30 = arith.constant 0 : index
    %c0_31 = arith.constant 0 : index
    %25 = vector.load %arg14[%c0_30, %c0_31] : memref<8x256xf32, #tpu.memory_space<vmem>>, vector<8x256xf32>
    tpu.vector_store %arg14[%c0_30, %c0_31], %24 {strides = array<i32>} : memref<8x256xf32, #tpu.memory_space<vmem>>, vector<8x256xf32>,
    %cst_32 = arith.constant 0.000000e+00 : f32
    %26 = vector.broadcast %cst_32 : f32 to vector<8x256xf32>
    %c0_33 = arith.constant 0 : index
    %c0_34 = arith.constant 0 : index
    %27 = vector.load %arg15[%c0_33, %c0_34] : memref<8x256xf32, #tpu.memory_space<vmem>>, vector<8x256xf32>
    tpu.vector_store %arg15[%c0_33, %c0_34], %26 {strides = array<i32>} : memref<8x256xf32, #tpu.memory_space<vmem>>, vector<8x256xf32>,
    %cst_35 = arith.constant 0.000000e+00 : f32
    %28 = vector.broadcast %cst_35 : f32 to vector<8x256xf32>
    %c0_36 = arith.constant 0 : index
    %c0_37 = arith.constant 0 : index
    %29 = vector.load %arg16[%c0_36, %c0_37] : memref<8x256xf32, #tpu.memory_space<vmem>>, vector<8x256xf32>
    tpu.vector_store %arg16[%c0_36, %c0_37], %28 {strides = array<i32>} : memref<8x256xf32, #tpu.memory_space<vmem>>, vector<8x256xf32>,
    %c0_i32_38 = arith.constant 0 : i32
    %c8_i32_39 = arith.constant 8 : i32
    %30 = arith.addi %c0_i32_38, %c8_i32_39 : i32
    %c1_i32_40 = arith.constant 1 : i32
    scf.for %arg17 = %c0_i32_38 to %30 step %c1_i32_40  : i32 {
      %c7_i32 = arith.constant 7 : i32
      %40 = arith.subi %c7_i32, %arg17 : i32
      %41 = vector.broadcast %arg17 : i32 to vector<8x128xi32>
      %42 = arith.cmpi slt, %41, %0 : vector<8x128xi32>
      %43 = arith.extui %42 : vector<8x128xi1> to vector<8x128xi32>
      %44 = arith.sitofp %43 : vector<8x128xi32> to vector<8x128xf32>
      %45 = vector.broadcast %40 : i32 to vector<8x128xi32>
      %46 = arith.cmpi slt, %45, %0 : vector<8x128xi32>
      %47 = arith.extui %46 : vector<8x128xi1> to vector<8x128xi32>
      %48 = arith.sitofp %47 : vector<8x128xi32> to vector<8x128xf32>
      %c0_52 = arith.constant 0 : index
      %c0_53 = arith.constant 0 : index
      %49 = vector.load %arg14[%c0_52, %c0_53] : memref<8x256xf32, #tpu.memory_space<vmem>>, vector<8x256xf32>
      %c0_54 = arith.constant 0 : index
      %c0_55 = arith.constant 0 : index
      %50 = vector.load %arg15[%c0_54, %c0_55] : memref<8x256xf32, #tpu.memory_space<vmem>>, vector<8x256xf32>
      %c0_56 = arith.constant 0 : index
      %c0_57 = arith.constant 0 : index
      %51 = vector.load %arg7[%c0_56, %c0_57] : memref<256x1024xf32, #tpu.memory_space<vmem>>, vector<256x1024xf32>
      %cst_58 = arith.constant dense<0.000000e+00> : vector<8x1024xf32>
      %52 = tpu.matmul %49, %51, %cst_58 {dimension_numbers = #tpu.dot_dimension_numbers<[1], [0], [0], [1], [0, 0, 1, 1], [], []>} : vector<8x256xf32>, vector<256x1024xf32>, vector<8x1024xf32> -> vector<8x1024xf32>
      %53 = arith.index_cast %arg17 : i32 to index
      %c0_59 = arith.constant 0 : index
      %c0_60 = arith.constant 0 : index
      %54 = vector.load %arg12[%53, %c0_59, %c0_60] : memref<8x8x1024xf32, #tpu.memory_space<vmem>>, vector<1x8x512xf32>
      %55 = vector.shape_cast %54 : vector<1x8x512xf32> to vector<8x512xf32>
      %56 = vector.extract_strided_slice %52 {offsets = [0, 0], sizes = [8, 512], strides = [1, 1]} : vector<8x1024xf32> to vector<8x512xf32>
      %57 = arith.addf %55, %56 : vector<8x512xf32>
      %58 = arith.index_cast %40 : i32 to index
      %c0_61 = arith.constant 0 : index
      %c512 = arith.constant 512 : index
      %59 = vector.load %arg12[%58, %c0_61, %c512] : memref<8x8x1024xf32, #tpu.memory_space<vmem>>, vector<1x8x512xf32>
      %60 = vector.shape_cast %59 : vector<1x8x512xf32> to vector<8x512xf32>
      %61 = vector.extract_strided_slice %52 {offsets = [0, 512], sizes = [8, 512], strides = [1, 1]} : vector<8x1024xf32> to vector<8x512xf32>
      %62 = arith.addf %60, %61 : vector<8x512xf32>
      %63 = vector.extract_strided_slice %50 {offsets = [0, 0], sizes = [8, 128], strides = [1, 1]} : vector<8x256xf32> to vector<8x128xf32>
      %64 = vector.extract_strided_slice %57 {offsets = [0, 0], sizes = [8, 128], strides = [1, 1]} : vector<8x512xf32> to vector<8x128xf32>
      %65 = arith.negf %64 : vector<8x128xf32>
      %66 = math.exp %65 : vector<8x128xf32>
      %cst_62 = arith.constant 1.000000e+00 : f32
      %67 = vector.broadcast %cst_62 : f32 to vector<8x128xf32>
      %68 = arith.addf %67, %66 : vector<8x128xf32>
      %69 = arith.divf %67, %68 : vector<8x128xf32>
      %70 = vector.extract_strided_slice %57 {offsets = [0, 128], sizes = [8, 128], strides = [1, 1]} : vector<8x512xf32> to vector<8x128xf32>
      %71 = arith.negf %70 : vector<8x128xf32>
      %72 = math.exp %71 : vector<8x128xf32>
      %cst_63 = arith.constant 1.000000e+00 : f32
      %73 = vector.broadcast %cst_63 : f32 to vector<8x128xf32>
      %74 = arith.addf %73, %72 : vector<8x128xf32>
      %75 = arith.divf %73, %74 : vector<8x128xf32>
      %76 = vector.extract_strided_slice %57 {offsets = [0, 256], sizes = [8, 128], strides = [1, 1]} : vector<8x512xf32> to vector<8x128xf32>
      %77 = math.tanh %76 : vector<8x128xf32>
      %78 = vector.extract_strided_slice %57 {offsets = [0, 384], sizes = [8, 128], strides = [1, 1]} : vector<8x512xf32> to vector<8x128xf32>
      %79 = arith.negf %78 : vector<8x128xf32>
      %80 = math.exp %79 : vector<8x128xf32>
      %cst_64 = arith.constant 1.000000e+00 : f32
      %81 = vector.broadcast %cst_64 : f32 to vector<8x128xf32>
      %82 = arith.addf %81, %80 : vector<8x128xf32>
      %83 = arith.divf %81, %82 : vector<8x128xf32>
      %84 = arith.mulf %75, %63 : vector<8x128xf32>
      %85 = arith.mulf %69, %77 : vector<8x128xf32>
      %86 = arith.addf %84, %85 : vector<8x128xf32>
      %87 = math.tanh %86 : vector<8x128xf32>
      %88 = arith.mulf %83, %87 : vector<8x128xf32>
      %89 = vector.extract_strided_slice %50 {offsets = [0, 128], sizes = [8, 128], strides = [1, 1]} : vector<8x256xf32> to vector<8x128xf32>
      %90 = vector.extract_strided_slice %62 {offsets = [0, 0], sizes = [8, 128], strides = [1, 1]} : vector<8x512xf32> to vector<8x128xf32>
      %91 = arith.negf %90 : vector<8x128xf32>
      %92 = math.exp %91 : vector<8x128xf32>
      %cst_65 = arith.constant 1.000000e+00 : f32
      %93 = vector.broadcast %cst_65 : f32 to vector<8x128xf32>
      %94 = arith.addf %93, %92 : vector<8x128xf32>
      %95 = arith.divf %93, %94 : vector<8x128xf32>
      %96 = vector.extract_strided_slice %62 {offsets = [0, 128], sizes = [8, 128], strides = [1, 1]} : vector<8x512xf32> to vector<8x128xf32>
      %97 = arith.negf %96 : vector<8x128xf32>
      %98 = math.exp %97 : vector<8x128xf32>
      %cst_66 = arith.constant 1.000000e+00 : f32
      %99 = vector.broadcast %cst_66 : f32 to vector<8x128xf32>
      %100 = arith.addf %99, %98 : vector<8x128xf32>
      %101 = arith.divf %99, %100 : vector<8x128xf32>
      %102 = vector.extract_strided_slice %62 {offsets = [0, 256], sizes = [8, 128], strides = [1, 1]} : vector<8x512xf32> to vector<8x128xf32>
      %103 = math.tanh %102 : vector<8x128xf32>
      %104 = vector.extract_strided_slice %62 {offsets = [0, 384], sizes = [8, 128], strides = [1, 1]} : vector<8x512xf32> to vector<8x128xf32>
      %105 = arith.negf %104 : vector<8x128xf32>
      %106 = math.exp %105 : vector<8x128xf32>
      %cst_67 = arith.constant 1.000000e+00 : f32
      %107 = vector.broadcast %cst_67 : f32 to vector<8x128xf32>
      %108 = arith.addf %107, %106 : vector<8x128xf32>
      %109 = arith.divf %107, %108 : vector<8x128xf32>
      %110 = arith.mulf %101, %89 : vector<8x128xf32>
      %111 = arith.mulf %95, %103 : vector<8x128xf32>
      %112 = arith.addf %110, %111 : vector<8x128xf32>
      %113 = math.tanh %112 : vector<8x128xf32>
      %114 = arith.mulf %109, %113 : vector<8x128xf32>
      %c0_68 = arith.constant 0 : index
      %c0_69 = arith.constant 0 : index
      %115 = vector.load %arg16[%c0_68, %c0_69] : memref<8x256xf32, #tpu.memory_space<vmem>>, vector<8x128xf32>
      %116 = arith.mulf %44, %88 : vector<8x128xf32>
      %117 = arith.addf %115, %116 : vector<8x128xf32>
      %c0_70 = arith.constant 0 : index
      %c0_71 = arith.constant 0 : index
      %118 = vector.load %arg16[%c0_70, %c0_71] : memref<8x256xf32, #tpu.memory_space<vmem>>, vector<8x128xf32>
      tpu.vector_store %arg16[%c0_70, %c0_71], %117 {strides = array<i32>} : memref<8x256xf32, #tpu.memory_space<vmem>>, vector<8x128xf32>,
      %c0_72 = arith.constant 0 : index
      %c128 = arith.constant 128 : index
      %119 = vector.load %arg16[%c0_72, %c128] : memref<8x256xf32, #tpu.memory_space<vmem>>, vector<8x128xf32>
      %120 = arith.mulf %48, %114 : vector<8x128xf32>
      %121 = arith.addf %119, %120 : vector<8x128xf32>
      %c0_73 = arith.constant 0 : index
      %c128_74 = arith.constant 128 : index
      %122 = vector.load %arg16[%c0_73, %c128_74] : memref<8x256xf32, #tpu.memory_space<vmem>>, vector<8x128xf32>
      tpu.vector_store %arg16[%c0_73, %c128_74], %121 {strides = array<i32>} : memref<8x256xf32, #tpu.memory_space<vmem>>, vector<8x128xf32>,
      %123 = arith.mulf %44, %88 : vector<8x128xf32>
      %cst_75 = arith.constant 1.000000e+00 : f32
      %124 = vector.broadcast %cst_75 : f32 to vector<8x128xf32>
      %125 = arith.subf %124, %44 : vector<8x128xf32>
      %126 = vector.extract_strided_slice %49 {offsets = [0, 0], sizes = [8, 128], strides = [1, 1]} : vector<8x256xf32> to vector<8x128xf32>
      %127 = arith.mulf %125, %126 : vector<8x128xf32>
      %128 = arith.addf %123, %127 : vector<8x128xf32>
      %c0_76 = arith.constant 0 : index
      %c0_77 = arith.constant 0 : index
      %129 = vector.load %arg14[%c0_76, %c0_77] : memref<8x256xf32, #tpu.memory_space<vmem>>, vector<8x128xf32>
      tpu.vector_store %arg14[%c0_76, %c0_77], %128 {strides = array<i32>} : memref<8x256xf32, #tpu.memory_space<vmem>>, vector<8x128xf32>,
      %130 = arith.mulf %48, %114 : vector<8x128xf32>
      %cst_78 = arith.constant 1.000000e+00 : f32
      %131 = vector.broadcast %cst_78 : f32 to vector<8x128xf32>
      %132 = arith.subf %131, %48 : vector<8x128xf32>
      %133 = vector.extract_strided_slice %49 {offsets = [0, 128], sizes = [8, 128], strides = [1, 1]} : vector<8x256xf32> to vector<8x128xf32>
      %134 = arith.mulf %132, %133 : vector<8x128xf32>
      %135 = arith.addf %130, %134 : vector<8x128xf32>
      %c0_79 = arith.constant 0 : index
      %c128_80 = arith.constant 128 : index
      %136 = vector.load %arg14[%c0_79, %c128_80] : memref<8x256xf32, #tpu.memory_space<vmem>>, vector<8x128xf32>
      tpu.vector_store %arg14[%c0_79, %c128_80], %135 {strides = array<i32>} : memref<8x256xf32, #tpu.memory_space<vmem>>, vector<8x128xf32>,
      %137 = arith.mulf %44, %86 : vector<8x128xf32>
      %cst_81 = arith.constant 1.000000e+00 : f32
      %138 = vector.broadcast %cst_81 : f32 to vector<8x128xf32>
      %139 = arith.subf %138, %44 : vector<8x128xf32>
      %140 = vector.extract_strided_slice %50 {offsets = [0, 0], sizes = [8, 128], strides = [1, 1]} : vector<8x256xf32> to vector<8x128xf32>
      %141 = arith.mulf %139, %140 : vector<8x128xf32>
      %142 = arith.addf %137, %141 : vector<8x128xf32>
      %c0_82 = arith.constant 0 : index
      %c0_83 = arith.constant 0 : index
      %143 = vector.load %arg15[%c0_82, %c0_83] : memref<8x256xf32, #tpu.memory_space<vmem>>, vector<8x128xf32>
      tpu.vector_store %arg15[%c0_82, %c0_83], %142 {strides = array<i32>} : memref<8x256xf32, #tpu.memory_space<vmem>>, vector<8x128xf32>,
      %144 = arith.mulf %48, %112 : vector<8x128xf32>
      %cst_84 = arith.constant 1.000000e+00 : f32
      %145 = vector.broadcast %cst_84 : f32 to vector<8x128xf32>
      %146 = arith.subf %145, %48 : vector<8x128xf32>
      %147 = vector.extract_strided_slice %50 {offsets = [0, 128], sizes = [8, 128], strides = [1, 1]} : vector<8x256xf32> to vector<8x128xf32>
      %148 = arith.mulf %146, %147 : vector<8x128xf32>
      %149 = arith.addf %144, %148 : vector<8x128xf32>
      %c0_85 = arith.constant 0 : index
      %c128_86 = arith.constant 128 : index
      %150 = vector.load %arg15[%c0_85, %c128_86] : memref<8x256xf32, #tpu.memory_space<vmem>>, vector<8x128xf32>
      tpu.vector_store %arg15[%c0_85, %c128_86], %149 {strides = array<i32>} : memref<8x256xf32, #tpu.memory_space<vmem>>, vector<8x128xf32>,
    }
    %c8_i32_41 = arith.constant 8 : i32
    %c0_42 = arith.constant 0 : index
    %c0_43 = arith.constant 0 : index
    %31 = vector.load %arg16[%c0_42, %c0_43] : memref<8x256xf32, #tpu.memory_space<vmem>>, vector<8x256xf32>
    %cst_44 = arith.constant 1.250000e-01 : f32
    %32 = vector.broadcast %cst_44 : f32 to vector<8x256xf32>
    %33 = arith.mulf %31, %32 : vector<8x256xf32>
    %c0_45 = arith.constant 0 : index
    %c0_46 = arith.constant 0 : index
    %34 = vector.load %arg9[%c0_45, %c0_46] : memref<256x128xf32, #tpu.memory_space<vmem>>, vector<256x128xf32>
    %cst_47 = arith.constant dense<0.000000e+00> : vector<8x128xf32>
    %35 = tpu.matmul %33, %34, %cst_47 {dimension_numbers = #tpu.dot_dimension_numbers<[1], [0], [0], [1], [0, 0, 1, 1], [], []>} : vector<8x256xf32>, vector<256x128xf32>, vector<8x128xf32> -> vector<8x128xf32>
    %c0_48 = arith.constant 0 : index
    %c0_49 = arith.constant 0 : index
    %36 = vector.load %arg10[%c0_48, %c0_49] : memref<1x128xf32, #tpu.memory_space<vmem>>, vector<1x128xf32>
    %37 = vector.broadcast %36 : vector<1x128xf32> to vector<8x128xf32>
    %38 = arith.addf %35, %37 : vector<8x128xf32>
    %c0_50 = arith.constant 0 : index
    %c0_51 = arith.constant 0 : index
    %39 = vector.load %arg11[%c0_50, %c0_51] : memref<8x128xf32, #tpu.memory_space<vmem>>, vector<8x128xf32>
    tpu.vector_store %arg11[%c0_50, %c0_51], %38 {strides = array<i32>} : memref<8x128xf32, #tpu.memory_space<vmem>>, vector<8x128xf32>,
    return
  }
  func.func @transform_0(%arg0: i32) -> (i32, i32, i32) {
    %c0_i32 = arith.constant 0 : i32
    %c0_i32_0 = arith.constant 0 : i32
    %c0_i32_1 = arith.constant 0 : i32
    return %c0_i32, %arg0, %c0_i32_0 : i32, i32, i32
  }
  func.func @transform_1(%arg0: i32) -> (i32, i32) {
    %c0_i32 = arith.constant 0 : i32
    %c0_i32_0 = arith.constant 0 : i32
    return %arg0, %c0_i32 : i32, i32
  }
  func.func @transform_2(%arg0: i32) -> (i32, i32) {
    %c0_i32 = arith.constant 0 : i32
    %c0_i32_0 = arith.constant 0 : i32
    %c0_i32_1 = arith.constant 0 : i32
    return %c0_i32, %c0_i32_0 : i32, i32
  }
  func.func @transform_3(%arg0: i32) -> (i32, i32) {
    %c0_i32 = arith.constant 0 : i32
    %c0_i32_0 = arith.constant 0 : i32
    %c0_i32_1 = arith.constant 0 : i32
    return %c0_i32, %c0_i32_0 : i32, i32
  }
  func.func @transform_4(%arg0: i32) -> (i32, i32) {
    %c0_i32 = arith.constant 0 : i32
    %c0_i32_0 = arith.constant 0 : i32
    %c0_i32_1 = arith.constant 0 : i32
    return %c0_i32, %c0_i32_0 : i32, i32
  }
  func.func @transform_5(%arg0: i32) -> (i32, i32) {
    %c0_i32 = arith.constant 0 : i32
    %c0_i32_0 = arith.constant 0 : i32
    %c0_i32_1 = arith.constant 0 : i32
    return %c0_i32, %c0_i32_0 : i32, i32
  }
  func.func @transform_6(%arg0: i32) -> (i32, i32) {
    %c0_i32 = arith.constant 0 : i32
    %c0_i32_0 = arith.constant 0 : i32
    %c0_i32_1 = arith.constant 0 : i32
    return %c0_i32, %c0_i32_0 : i32, i32
  }
  func.func @transform_7(%arg0: i32) -> (i32, i32) {
    %c0_i32 = arith.constant 0 : i32
    %c0_i32_0 = arith.constant 0 : i32
    %c0_i32_1 = arith.constant 0 : i32
    return %c0_i32, %c0_i32_0 : i32, i32
  }
  func.func @transform_8(%arg0: i32) -> (i32, i32) {
    %c0_i32 = arith.constant 0 : i32
    %c0_i32_0 = arith.constant 0 : i32
    %c0_i32_1 = arith.constant 0 : i32
    return %c0_i32, %c0_i32_0 : i32, i32
  }
  func.func @transform_9(%arg0: i32) -> (i32, i32) {
    %c0_i32 = arith.constant 0 : i32
    %c0_i32_0 = arith.constant 0 : i32
    %c0_i32_1 = arith.constant 0 : i32
    return %c0_i32, %c0_i32_0 : i32, i32
  }
  func.func @transform_10(%arg0: i32) -> (i32, i32) {
    %c0_i32 = arith.constant 0 : i32
    %c0_i32_0 = arith.constant 0 : i32
    return %arg0, %c0_i32 : i32, i32
  }
}

</mosaic_0001>

<bundles_post_ra>
// kernel: tpu_custom_call.1
= control target key start
LH: loop header
LB: loop body
LE: loop exit
PB: predicated region body
PF: predicated region fallthrough
CT: control target
= control target key end

     0   :  { %15 = vsyncpa [#allocation8], 0  ;;  %s4454_s0 = inlined_call_operand.hbm [shape: f32[8,8,128], index: 0, kind: input, shape index: {}]   ;;  %s4455_s1 = inlined_call_operand.hbm [shape: s32[8,128], index: 1, kind: input, shape index: {}]   ;;  %s4456_s2 = inlined_call_operand.hbm [shape: f32[128,1024], index: 2, kind: input, shape index: {}]   ;;  %s4457_s3 = inlined_call_operand.hbm [shape: f32[256,1024], index: 3, kind: input, shape index: {}]   ;;  %s4458_s4 = inlined_call_operand.hbm [shape: f32[1,1024], index: 4, kind: input, shape index: {}]   ;;  %s4459_s5 = inlined_call_operand.hbm [shape: f32[256,1024], index: 5, kind: input, shape index: {}]   ;;  %s4460_s6 = inlined_call_operand.hbm [shape: f32[256,1024], index: 6, kind: input, shape index: {}]   ;;  %s4461_s7 = inlined_call_operand.hbm [shape: f32[1,1024], index: 7, kind: input, shape index: {}]   ;;  %s4462_s8 = inlined_call_operand.hbm [shape: f32[256,128], index: 8, kind: input, shape index: {}]   ;;  %s4463_s9 = inlined_call_operand.vmem [shape: f32[1,128], index: 9, kind: input, shape index: {}]   ;;  %s4464_s10 = inlined_call_operand.hbm [shape: f32[8,128], index: 10, kind: output, shape index: {}]  }
   0x1   :  { %16 = vsyncpa [#allocation11], 0 }
   0x2   :  { %17 = vsyncpa [#allocation14], 0 }
   0x3   :  { %18 = vsyncpa [#allocation17], 0 }
   0x4   :  { %19 = vsyncpa [#allocation20], 0  ;;  %s39_s15 = sshll.u32 %s4455_s1, 4  ;;  %s40_s15 = int_to_ptr.hbm [resolvable:$true] %s39_s15 }
   0x5   :  { %20 = vsyncpa [#allocation9], 0  ;;  %s3811_s16 = smov [#allocation10]   ;;  %s62_s20 = sshll.u32 %s4457_s3, 4  ;;  %s63_s20 = int_to_ptr.hbm [resolvable:$true] %s62_s20 }
   0x6   :  { %s41_s17 = sshll.u32 %s3811_s16, 4  ;;  %s3812_s21 = smov [#allocation13]   ;;  %s42_s17 = int_to_ptr.vmem [resolvable:$true] %s41_s17 }
   0x7   :  { %44 = dma.hbm_to_vmem [thread:$0]  %s40_s15, 128, %s42_s17, [#allocation11]  }
   0x8   :  { %s64_s22 = sshll.u32 %s3812_s21, 4  ;;  %s86_s25 = sshll.u32 %s4459_s5, 4  ;;  %s65_s22 = int_to_ptr.vmem [resolvable:$true] %s64_s22  ;;  %s87_s25 = int_to_ptr.hbm [resolvable:$true] %s86_s25 }
   0x9   :  { %s3813_s1 = smov 1024   ;;  %s3814_s26 = smov 64  }
   0xa   :  { %70 = dma.hbm_to_vmem [thread:$0]  %s63_s20, 32768, %s65_s22, [#allocation14], %s3813_s1, %s3813_s1, %s3814_s26  }
   0xb   :  { %s113_s29 = sshll.u32 %s4461_s7, 4  ;;  %s3815_s3 = smov [#allocation16]   ;;  %s114_s29 = int_to_ptr.hbm [resolvable:$true] %s113_s29 }
   0xc   :  { %s88_s30 = sshll.u32 %s3815_s3, 4  ;;  %s3816_s5 = smov [#allocation19]   ;;  %s89_s30 = int_to_ptr.vmem [resolvable:$true] %s88_s30 }
   0xd   :  { %94 = dma.hbm_to_vmem [thread:$0]  %s87_s25, 32768, %s89_s30, [#allocation17], %s3813_s1, %s3813_s1, %s3814_s26  }
   0xe   :  { %s115_s11 = sshll.u32 %s3816_s5, 4  ;;  %s25_s14 = sshll.u32 %s4454_s0, 4  ;;  %s116_s11 = int_to_ptr.vmem [resolvable:$true] %s115_s11  ;;  %s26_s14 = int_to_ptr.hbm [resolvable:$true] %s25_s14 }
   0xf   :  { %118 = dma.hbm_to_vmem [thread:$0]  %s114_s29, 128, %s116_s11, [#allocation20]  }
  0x10   :  { %s3817_s15 = smov [#allocation7]   ;;  %s49_s18 = sshll.u32 %s4456_s2, 4  ;;  %s50_s18 = int_to_ptr.hbm [resolvable:$true] %s49_s18 }
  0x11   :  { %s27_s16 = sshll.u32 %s3817_s15, 4  ;;  %s3818_s19 = smov 128   ;;  %s28_s16 = int_to_ptr.vmem [resolvable:$true] %s27_s16 }
  0x12   :  { %s3819_s20 = smov 8   ;;  %s3820_s21 = smov [#allocation12]  }
  0x13   :  { %33 = dma.hbm_to_vmem [thread:$0]  %s26_s14, 1024, %s28_s16, [#allocation8], %s3818_s19, %s3818_s19, %s3819_s20  }
  0x14   :  { %s51_s22 = sshll.u32 %s3820_s21, 4  ;;  %s76_s0 = sshll.u32 %s4458_s4, 4  ;;  %s52_s22 = int_to_ptr.vmem [resolvable:$true] %s51_s22  ;;  %s77_s0 = int_to_ptr.hbm [resolvable:$true] %s76_s0 }
  0x15   :  { %57 = dma.hbm_to_vmem [thread:$0]  %s50_s18, 16384, %s52_s22, [#allocation11], %s3813_s1, %s3813_s1, %s3814_s26  }
  0x16   :  { %s99_s2 = sshll.u32 %s4460_s6, 4  ;;  %s3821_s28 = smov [#allocation15]   ;;  %s100_s2 = int_to_ptr.hbm [resolvable:$true] %s99_s2 }
  0x17   :  { %s78_s29 = sshll.u32 %s3821_s28, 4  ;;  %s3822_s3 = smov [#allocation18]   ;;  %s79_s29 = int_to_ptr.vmem [resolvable:$true] %s78_s29 }
  0x18   :  { %81 = dma.hbm_to_vmem [thread:$0]  %s77_s0, 128, %s79_s29, [#allocation14]  }
  0x19   :  { %s101_s30 = sshll.u32 %s3822_s3, 4  ;;  %s123_s4 = sshll.u32 %s4462_s8, 4  ;;  %s102_s30 = int_to_ptr.vmem [resolvable:$true] %s101_s30  ;;  %s124_s4 = int_to_ptr.hbm [resolvable:$true] %s123_s4 }
  0x1a   :  { %107 = dma.hbm_to_vmem [thread:$0]  %s100_s2, 32768, %s102_s30, [#allocation17], %s3813_s1, %s3813_s1, %s3814_s26  }
  0x1b   :  { %s3823_s12 = smov [#allocation21]  }
  0x1c   :  { %s125_s13 = sshll.u32 %s3823_s12, 4  ;;  %s126_s13 = int_to_ptr.vmem [resolvable:$true] %s125_s13 }
  0x1d   :  { %131 = dma.hbm_to_vmem [thread:$0]  %s124_s4, 4096, %s126_s13, [#allocation20], %s3818_s19, %s3818_s19, %s3819_s20  }
  0x1e   :  { %3791 = dma.done.wait [#allocation8], 1024  }
  0x1f   :  { %3792 = vsyncadd [#allocation8], 4294966272 }
  0x20   :  { %3793 = dma.done.wait [#allocation11], 16512  }
  0x21   :  { %3794 = vsyncadd [#allocation11], 4294950784 }
  0x22   :  { %3795 = dma.done.wait [#allocation14], 32896  }
  0x23   :  { %3796 = vsyncadd [#allocation14], 4294934400 }
  0x24   :  { %3797 = dma.done.wait [#allocation17], 65536  }
  0x25   :  { %3798 = vsyncadd [#allocation17], 4294901760 }
  0x26   :  { %3799 = dma.done.wait [#allocation20], 4224  }
  0x27   :  { %3800 = vsyncadd [#allocation20], 4294963072  ;;  %v3824_v0 = vmov 0.0   ;;  %v3926_v1 = vld [vmem:[#allocation10] sm:$0xff]  ;;  %v301_v2 = vld [vmem:[#allocation12 + $0x3d0] sm:$0xff]  ;;  %s4068_s6 = smov 0  }
  0x28   :  { %717 = vst [vmem:[#allocation4] sm:$0xff] %v3824_v0  ;;  %v302_v3 = vld [vmem:[#allocation12 + $0x3d8] sm:$0xff]  ;;  %407 = vmatpush.msra.mxu2 %v301_v2  ;;  %v293_v4 = vld [vmem:[#allocation12 + $0x390] sm:$0xff]  ;;  %v299_v8 = vld [vmem:[#allocation12 + $0x3c0] sm:$0xff] }
  0x29   :  { %718 = vst [vmem:[#allocation4 + $0x8] sm:$0xff] %v3824_v0  ;;  %448 = vmatpush.msra.mxu3 %v302_v3  ;;  %v294_v5 = vld [vmem:[#allocation12 + $0x398] sm:$0xff]  ;;  %v285_v6 = vld [vmem:[#allocation12 + $0x350] sm:$0xff]  ;;  %v300_v9 = vld [vmem:[#allocation12 + $0x3c8] sm:$0xff]  ;;  %325 = vmatpush.msra.mxu0 %v299_v8 }
  0x2a   :  { %719 = vst [vmem:[#allocation5 + $0x8] sm:$0xff] %v3824_v0  ;;  %v286_v7 = vld [vmem:[#allocation12 + $0x358] sm:$0xff]  ;;  %408 = vmatpush.msra.mxu2 %v293_v4  ;;  %v291_v10 = vld [vmem:[#allocation12 + $0x380] sm:$0xff]  ;;  %366 = vmatpush.msra.mxu1 %v300_v9  ;;  %v277_v11 = vld [vmem:[#allocation12 + $0x310] sm:$0xff] }
  0x2b   :  { %720 = vst [vmem:[#allocation5] sm:$0xff] %v3824_v0  ;;  %449 = vmatpush.msra.mxu3 %v294_v5  ;;  %v278_v12 = vld [vmem:[#allocation12 + $0x318] sm:$0xff]  ;;  %v292_v13 = vld [vmem:[#allocation12 + $0x388] sm:$0xff]  ;;  %v283_v14 = vld [vmem:[#allocation12 + $0x340] sm:$0xff]  ;;  %326 = vmatpush.msra.mxu0 %v291_v10 }
  0x2c   :  { %409 = vmatpush.msra.mxu2 %v285_v6  ;;  %v284_v15 = vld [vmem:[#allocation12 + $0x348] sm:$0xff]  ;;  %367 = vmatpush.msra.mxu1 %v292_v13  ;;  %v269_v16 = vld [vmem:[#allocation12 + $0x2d0] sm:$0xff]  ;;  %v270_v17 = vld [vmem:[#allocation12 + $0x2d8] sm:$0xff] }
  0x2d   :  { %450 = vmatpush.msra.mxu3 %v286_v7  ;;  %v275_v18 = vld [vmem:[#allocation12 + $0x300] sm:$0xff]  ;;  %v276_v19 = vld [vmem:[#allocation12 + $0x308] sm:$0xff]  ;;  %327 = vmatpush.msra.mxu0 %v283_v14  ;;  %v261_v20 = vld [vmem:[#allocation12 + $0x290] sm:$0xff] }
  0x2e   :  { %410 = vmatpush.msra.mxu2 %v277_v11  ;;  %368 = vmatpush.msra.mxu1 %v284_v15  ;;  %v262_v21 = vld [vmem:[#allocation12 + $0x298] sm:$0xff]  ;;  %v267_v22 = vld [vmem:[#allocation12 + $0x2c0] sm:$0xff]  ;;  %v268_v23 = vld [vmem:[#allocation12 + $0x2c8] sm:$0xff] }
  0x2f   :  { %451 = vmatpush.msra.mxu3 %v278_v12  ;;  %328 = vmatpush.msra.mxu0 %v275_v18  ;;  %v253_v24 = vld [vmem:[#allocation12 + $0x250] sm:$0xff]  ;;  %v254_v25 = vld [vmem:[#allocation12 + $0x258] sm:$0xff]  ;;  %v259_v26 = vld [vmem:[#allocation12 + $0x280] sm:$0xff] }
  0x30   :  { %411 = vmatpush.msra.mxu2 %v269_v16  ;;  %369 = vmatpush.msra.mxu1 %v276_v19  ;;  %v260_v27 = vld [vmem:[#allocation12 + $0x288] sm:$0xff]  ;;  %v245_v28 = vld [vmem:[#allocation12 + $0x210] sm:$0xff]  ;;  %v246_v29 = vld [vmem:[#allocation12 + $0x218] sm:$0xff] }
  0x31   :  { %452 = vmatpush.msra.mxu3 %v270_v17  ;;  %329 = vmatpush.msra.mxu0 %v267_v22  ;;  %v251_v30 = vld [vmem:[#allocation12 + $0x240] sm:$0xff]  ;;  %v252_v31 = vld [vmem:[#allocation12 + $0x248] sm:$0xff]  ;;  %v237_v32 = vld [vmem:[#allocation12 + $0x1d0] sm:$0xff] }
  0x32   :  { %412 = vmatpush.msra.mxu2 %v261_v20  ;;  %370 = vmatpush.msra.mxu1 %v268_v23  ;;  %v238_v33 = vld [vmem:[#allocation12 + $0x1d8] sm:$0xff]  ;;  %v243_v34 = vld [vmem:[#allocation12 + $0x200] sm:$0xff]  ;;  %v244_v35 = vld [vmem:[#allocation12 + $0x208] sm:$0xff] }
  0x33   :  { %453 = vmatpush.msra.mxu3 %v262_v21  ;;  %330 = vmatpush.msra.mxu0 %v259_v26  ;;  %v229_v36 = vld [vmem:[#allocation12 + $0x190] sm:$0xff]  ;;  %v230_v37 = vld [vmem:[#allocation12 + $0x198] sm:$0xff]  ;;  %v235_v38 = vld [vmem:[#allocation12 + $0x1c0] sm:$0xff] }
  0x34   :  { %413 = vmatpush.msra.mxu2 %v253_v24  ;;  %371 = vmatpush.msra.mxu1 %v260_v27  ;;  %v236_v39 = vld [vmem:[#allocation12 + $0x1c8] sm:$0xff]  ;;  %v221_v40 = vld [vmem:[#allocation12 + $0x150] sm:$0xff]  ;;  %v222_v41 = vld [vmem:[#allocation12 + $0x158] sm:$0xff] }
  0x35   :  { %454 = vmatpush.msra.mxu3 %v254_v25  ;;  %331 = vmatpush.msra.mxu0 %v251_v30  ;;  %v227_v42 = vld [vmem:[#allocation12 + $0x180] sm:$0xff]  ;;  %v228_v43 = vld [vmem:[#allocation12 + $0x188] sm:$0xff]  ;;  %v213_v44 = vld [vmem:[#allocation12 + $0x110] sm:$0xff] }
  0x36   :  { %414 = vmatpush.msra.mxu2 %v245_v28  ;;  %372 = vmatpush.msra.mxu1 %v252_v31  ;;  %v214_v45 = vld [vmem:[#allocation12 + $0x118] sm:$0xff]  ;;  %v219_v46 = vld [vmem:[#allocation12 + $0x140] sm:$0xff]  ;;  %v220_v47 = vld [vmem:[#allocation12 + $0x148] sm:$0xff] }
  0x37   :  { %455 = vmatpush.msra.mxu3 %v246_v29  ;;  %332 = vmatpush.msra.mxu0 %v243_v34  ;;  %v205_v48 = vld [vmem:[#allocation12 + $0xd0] sm:$0xff]  ;;  %v206_v49 = vld [vmem:[#allocation12 + $0xd8] sm:$0xff]  ;;  %v211_v50 = vld [vmem:[#allocation12 + $0x100] sm:$0xff] }
  0x38   :  { %415 = vmatpush.msra.mxu2 %v237_v32  ;;  %373 = vmatpush.msra.mxu1 %v244_v35  ;;  %v212_v51 = vld [vmem:[#allocation12 + $0x108] sm:$0xff]  ;;  %v197_v52 = vld [vmem:[#allocation12 + $0x90] sm:$0xff]  ;;  %v198_v53 = vld [vmem:[#allocation12 + $0x98] sm:$0xff] }
  0x39   :  { %456 = vmatpush.msra.mxu3 %v238_v33  ;;  %333 = vmatpush.msra.mxu0 %v235_v38  ;;  %v203_v54 = vld [vmem:[#allocation12 + $0xc0] sm:$0xff]  ;;  %v204_v55 = vld [vmem:[#allocation12 + $0xc8] sm:$0xff]  ;;  %v189_v56 = vld [vmem:[#allocation12 + $0x50] sm:$0xff] }
  0x3a   :  { %416 = vmatpush.msra.mxu2 %v229_v36  ;;  %374 = vmatpush.msra.mxu1 %v236_v39  ;;  %v190_v57 = vld [vmem:[#allocation12 + $0x58] sm:$0xff]  ;;  %v195_v58 = vld [vmem:[#allocation12 + $0x80] sm:$0xff]  ;;  %v196_v59 = vld [vmem:[#allocation12 + $0x88] sm:$0xff] }
  0x3b   :  { %457 = vmatpush.msra.mxu3 %v230_v37  ;;  %334 = vmatpush.msra.mxu0 %v227_v42  ;;  %v181_v60 = vld [vmem:[#allocation12 + $0x10] sm:$0xff]  ;;  %v182_v61 = vld [vmem:[#allocation12 + $0x18] sm:$0xff]  ;;  %v187_v3 = vld [vmem:[#allocation12 + $0x40] sm:$0xff] }
  0x3c   :  { %417 = vmatpush.msra.mxu2 %v221_v40  ;;  %375 = vmatpush.msra.mxu1 %v228_v43  ;;  %v3928_v62 = vld [vmem:[#allocation7] sm:$0xff]  ;;  %v305_v63 = vld [vmem:[#allocation12 + $0x3f0] sm:$0xff]  ;;  %v188_v4 = vld [vmem:[#allocation12 + $0x48] sm:$0xff] }
  0x3d   :  { %458 = vmatpush.msra.mxu3 %v222_v41  ;;  %335 = vmatpush.msra.mxu0 %v219_v46  ;;  %v306_v2 = vld [vmem:[#allocation12 + $0x3f8] sm:$0xff]  ;;  %v297_v5 = vld [vmem:[#allocation12 + $0x3b0] sm:$0xff]  ;;  %v179_v7 = vld [vmem:[#allocation12] sm:$0xff] }
  0x3e   :  { %418 = vmatpush.msra.mxu2 %v213_v44  ;;  %376 = vmatpush.msra.mxu1 %v220_v47  ;;  %v298_v6 = vld [vmem:[#allocation12 + $0x3b8] sm:$0xff]  ;;  %v180_v8 = vld [vmem:[#allocation12 + $0x8] sm:$0xff]  ;;  %v303_v9 = vld [vmem:[#allocation12 + $0x3e0] sm:$0xff] }
  0x3f   :  { %459 = vmatpush.msra.mxu3 %v214_v45  ;;  %336 = vmatpush.msra.mxu0 %v211_v50  ;;  %v304_v10 = vld [vmem:[#allocation12 + $0x3e8] sm:$0xff]  ;;  %v289_v11 = vld [vmem:[#allocation12 + $0x370] sm:$0xff]  ;;  %v290_v12 = vld [vmem:[#allocation12 + $0x378] sm:$0xff] }
  0x40   :  { %419 = vmatpush.msra.mxu2 %v205_v48  ;;  %377 = vmatpush.msra.mxu1 %v212_v51  ;;  %v3934_v13 = vld [vmem:[#allocation7 + $0x8] sm:$0xff]  ;;  %v296_v15 = vld [vmem:[#allocation12 + $0x3a8] sm:$0xff]  ;;  %v281_v16 = vld [vmem:[#allocation12 + $0x330] sm:$0xff] }
  0x41   :  { %460 = vmatpush.msra.mxu3 %v206_v49  ;;  %337 = vmatpush.msra.mxu0 %v203_v54  ;;  %v295_v14 = vld [vmem:[#allocation12 + $0x3a0] sm:$0xff]  ;;  %v282_v17 = vld [vmem:[#allocation12 + $0x338] sm:$0xff]  ;;  %v288_v19 = vld [vmem:[#allocation12 + $0x368] sm:$0xff] }
  0x42   :  { %420 = vmatpush.msra.mxu2 %v197_v52  ;;  %378 = vmatpush.msra.mxu1 %v204_v55  ;;  %v287_v18 = vld [vmem:[#allocation12 + $0x360] sm:$0xff]  ;;  %v273_v20 = vld [vmem:[#allocation12 + $0x2f0] sm:$0xff]  ;;  %v274_v21 = vld [vmem:[#allocation12 + $0x2f8] sm:$0xff] }
  0x43   :  { %461 = vmatpush.msra.mxu3 %v198_v53  ;;  %338 = vmatpush.msra.mxu0 %v195_v58  ;;  %v279_v22 = vld [vmem:[#allocation12 + $0x320] sm:$0xff]  ;;  %v280_v23 = vld [vmem:[#allocation12 + $0x328] sm:$0xff]  ;;  %v265_v24 = vld [vmem:[#allocation12 + $0x2b0] sm:$0xff] }
  0x44   :  { %421 = vmatpush.msra.mxu2 %v189_v56  ;;  %379 = vmatpush.msra.mxu1 %v196_v59  ;;  %v266_v25 = vld [vmem:[#allocation12 + $0x2b8] sm:$0xff]  ;;  %v3940_v26 = vld [vmem:[#allocation7 + $0x10] sm:$0xff]  ;;  %v271_v27 = vld [vmem:[#allocation12 + $0x2e0] sm:$0xff] }
  0x45   :  { %462 = vmatpush.msra.mxu3 %v190_v57  ;;  %339 = vmatpush.msra.mxu0 %v187_v3  ;;  %v272_v28 = vld [vmem:[#allocation12 + $0x2e8] sm:$0xff]  ;;  %v257_v29 = vld [vmem:[#allocation12 + $0x270] sm:$0xff]  ;;  %v258_v30 = vld [vmem:[#allocation12 + $0x278] sm:$0xff] }
  0x46   :  { %422 = vmatpush.msra.mxu2 %v181_v60  ;;  %380 = vmatpush.msra.mxu1 %v188_v4  ;;  %v263_v31 = vld [vmem:[#allocation12 + $0x2a0] sm:$0xff]  ;;  %v264_v32 = vld [vmem:[#allocation12 + $0x2a8] sm:$0xff]  ;;  %v249_v33 = vld [vmem:[#allocation12 + $0x230] sm:$0xff] }
  0x47   :  { %463 = vmatpush.msra.mxu3 %v182_v61  ;;  %423 = vmatmul.f32.vlgmr.msra.gmra.mxu2 %v3928_v62  ;;  %v250_v34 = vld [vmem:[#allocation12 + $0x238] sm:$0xff]  ;;  %v255_v35 = vld [vmem:[#allocation12 + $0x260] sm:$0xff]  ;;  %v256_v36 = vld [vmem:[#allocation12 + $0x268] sm:$0xff] }
  0x48   :  { %464 = vmatmul.f32.vlgmr.msra.gmra.mxu3 %v3928_v62  ;;  %571 = vmatpush.msrb.mxu2 %v305_v63  ;;  %v241_v37 = vld [vmem:[#allocation12 + $0x1f0] sm:$0xff]  ;;  %v242_v38 = vld [vmem:[#allocation12 + $0x1f8] sm:$0xff]  ;;  %v247_v40 = vld [vmem:[#allocation12 + $0x220] sm:$0xff] }
  0x49   :  { %612 = vmatpush.msrb.mxu3 %v306_v2  ;;  %340 = vmatpush.msra.mxu0 %v179_v7  ;;  %v3946_v39 = vld [vmem:[#allocation7 + $0x18] sm:$0xff]  ;;  %v248_v41 = vld [vmem:[#allocation12 + $0x228] sm:$0xff]  ;;  %v234_v43 = vld [vmem:[#allocation12 + $0x1b8] sm:$0xff] }
  0x4a   :  { %572 = vmatpush.msrb.mxu2 %v297_v5  ;;  %381 = vmatpush.msra.mxu1 %v180_v8  ;;  %v233_v42 = vld [vmem:[#allocation12 + $0x1b0] sm:$0xff]  ;;  %v239_v44 = vld [vmem:[#allocation12 + $0x1e0] sm:$0xff]  ;;  %v240_v45 = vld [vmem:[#allocation12 + $0x1e8] sm:$0xff] }
  0x4b   :  { %613 = vmatpush.msrb.mxu3 %v298_v6  ;;  %341 = vmatmul.f32.vlgmr.msra.gmra.mxu0 %v3928_v62  ;;  %v225_v46 = vld [vmem:[#allocation12 + $0x170] sm:$0xff]  ;;  %v226_v47 = vld [vmem:[#allocation12 + $0x178] sm:$0xff]  ;;  %v231_v48 = vld [vmem:[#allocation12 + $0x1a0] sm:$0xff] }
  0x4c   :  { %382 = vmatmul.f32.vlgmr.msra.gmra.mxu1 %v3928_v62  ;;  %489 = vmatpush.msrb.mxu0 %v303_v9  ;;  %v232_v49 = vld [vmem:[#allocation12 + $0x1a8] sm:$0xff]  ;;  %v217_v50 = vld [vmem:[#allocation12 + $0x130] sm:$0xff]  ;;  %v218_v51 = vld [vmem:[#allocation12 + $0x138] sm:$0xff] }
  0x4d   :  { %530 = vmatpush.msrb.mxu1 %v304_v10  ;;  %573 = vmatpush.msrb.mxu2 %v289_v11  ;;  %v3952_v52 = vld [vmem:[#allocation7 + $0x20] sm:$0xff]  ;;  %v223_v53 = vld [vmem:[#allocation12 + $0x160] sm:$0xff]  ;;  %v224_v54 = vld [vmem:[#allocation12 + $0x168] sm:$0xff] }
  0x4e   :  { %614 = vmatpush.msrb.mxu3 %v290_v12  ;;  %490 = vmatpush.msrb.mxu0 %v295_v14  ;;  %v209_v55 = vld [vmem:[#allocation12 + $0xf0] sm:$0xff]  ;;  %v210_v56 = vld [vmem:[#allocation12 + $0xf8] sm:$0xff]  ;;  %v215_v57 = vld [vmem:[#allocation12 + $0x120] sm:$0xff] }
  0x4f   :  { %426 = vmatmul.f32.gmra.mxu2 %v3934_v13  ;;  %531 = vmatpush.msrb.mxu1 %v296_v15  ;;  %v216_v58 = vld [vmem:[#allocation12 + $0x128] sm:$0xff]  ;;  %v201_v59 = vld [vmem:[#allocation12 + $0xb0] sm:$0xff]  ;;  %v202_v60 = vld [vmem:[#allocation12 + $0xb8] sm:$0xff] }
  0x50   :  { %467 = vmatmul.f32.gmra.mxu3 %v3934_v13  ;;  %574 = vmatpush.msrb.mxu2 %v281_v16  ;;  %v207_v61 = vld [vmem:[#allocation12 + $0xe0] sm:$0xff]  ;;  %v208_v63 = vld [vmem:[#allocation12 + $0xe8] sm:$0xff]  ;;  %v193_v2 = vld [vmem:[#allocation12 + $0x70] sm:$0xff] }
  0x51   :  { %615 = vmatpush.msrb.mxu3 %v282_v17  ;;  %491 = vmatpush.msrb.mxu0 %v287_v18  ;;  %v194_v3 = vld [vmem:[#allocation12 + $0x78] sm:$0xff]  ;;  %v176_v4 = vld [vmem:[#allocation7 + $0x28] sm:$0xff]  ;;  %v200_v6 = vld [vmem:[#allocation12 + $0xa8] sm:$0xff] }
  0x52   :  { %532 = vmatpush.msrb.mxu1 %v288_v19  ;;  %575 = vmatpush.msrb.mxu2 %v273_v20  ;;  %v199_v5 = vld [vmem:[#allocation12 + $0xa0] sm:$0xff]  ;;  %v185_v7 = vld [vmem:[#allocation12 + $0x30] sm:$0xff]  ;;  %v186_v8 = vld [vmem:[#allocation12 + $0x38] sm:$0xff] }
  0x53   :  { %616 = vmatpush.msrb.mxu3 %v274_v21  ;;  %344 = vmatmul.f32.gmra.mxu0 %v3934_v13  ;;  %v191_v9 = vld [vmem:[#allocation12 + $0x60] sm:$0xff]  ;;  %v192_v10 = vld [vmem:[#allocation12 + $0x68] sm:$0xff]  ;;  %v178_v15 = vld [vmem:[#allocation7 + $0x38] sm:$0xff] }
  0x54   :  { %385 = vmatmul.f32.gmra.mxu1 %v3934_v13  ;;  %492 = vmatpush.msrb.mxu0 %v279_v22  ;;  %v183_v11 = vld [vmem:[#allocation12 + $0x20] sm:$0xff]  ;;  %v184_v12 = vld [vmem:[#allocation12 + $0x28] sm:$0xff] }
  0x55   :  { %533 = vmatpush.msrb.mxu1 %v280_v23  ;;  %576 = vmatpush.msrb.mxu2 %v265_v24  ;;  %v177_v14 = vld [vmem:[#allocation7 + $0x30] sm:$0xff] }
  0x56   :  { %617 = vmatpush.msrb.mxu3 %v266_v25  ;;  %493 = vmatpush.msrb.mxu0 %v271_v27 }
  0x57   :  { %429 = vmatmul.f32.gmra.mxu2 %v3940_v26  ;;  %534 = vmatpush.msrb.mxu1 %v272_v28 }
  0x58   :  { %470 = vmatmul.f32.gmra.mxu3 %v3940_v26  ;;  %577 = vmatpush.msrb.mxu2 %v257_v29 }
  0x59   :  { %618 = vmatpush.msrb.mxu3 %v258_v30  ;;  %494 = vmatpush.msrb.mxu0 %v263_v31 }
  0x5a   :  { %535 = vmatpush.msrb.mxu1 %v264_v32  ;;  %578 = vmatpush.msrb.mxu2 %v249_v33 }
  0x5b   :  { %619 = vmatpush.msrb.mxu3 %v250_v34  ;;  %347 = vmatmul.f32.gmra.mxu0 %v3940_v26 }
  0x5c   :  { %388 = vmatmul.f32.gmra.mxu1 %v3940_v26  ;;  %495 = vmatpush.msrb.mxu0 %v255_v35 }
  0x5d   :  { %536 = vmatpush.msrb.mxu1 %v256_v36  ;;  %579 = vmatpush.msrb.mxu2 %v241_v37 }
  0x5e   :  { %620 = vmatpush.msrb.mxu3 %v242_v38  ;;  %496 = vmatpush.msrb.mxu0 %v247_v40 }
  0x5f   :  { %432 = vmatmul.f32.gmra.mxu2 %v3946_v39  ;;  %537 = vmatpush.msrb.mxu1 %v248_v41 }
  0x60   :  { %473 = vmatmul.f32.gmra.mxu3 %v3946_v39  ;;  %580 = vmatpush.msrb.mxu2 %v233_v42 }
  0x61   :  { %621 = vmatpush.msrb.mxu3 %v234_v43  ;;  %497 = vmatpush.msrb.mxu0 %v239_v44 }
  0x62   :  { %538 = vmatpush.msrb.mxu1 %v240_v45  ;;  %581 = vmatpush.msrb.mxu2 %v225_v46 }
  0x63   :  { %622 = vmatpush.msrb.mxu3 %v226_v47  ;;  %350 = vmatmul.f32.gmra.mxu0 %v3946_v39 }
  0x64   :  { %391 = vmatmul.f32.gmra.mxu1 %v3946_v39  ;;  %498 = vmatpush.msrb.mxu0 %v231_v48 }
  0x65   :  { %539 = vmatpush.msrb.mxu1 %v232_v49  ;;  %582 = vmatpush.msrb.mxu2 %v217_v50 }
  0x66   :  { %623 = vmatpush.msrb.mxu3 %v218_v51  ;;  %499 = vmatpush.msrb.mxu0 %v223_v53 }
  0x67   :  { %435 = vmatmul.f32.gmra.mxu2 %v3952_v52  ;;  %540 = vmatpush.msrb.mxu1 %v224_v54 }
  0x68   :  { %476 = vmatmul.f32.gmra.mxu3 %v3952_v52  ;;  %583 = vmatpush.msrb.mxu2 %v209_v55 }
  0x69   :  { %624 = vmatpush.msrb.mxu3 %v210_v56  ;;  %500 = vmatpush.msrb.mxu0 %v215_v57 }
  0x6a   :  { %541 = vmatpush.msrb.mxu1 %v216_v58  ;;  %584 = vmatpush.msrb.mxu2 %v201_v59 }
  0x6b   :  { %625 = vmatpush.msrb.mxu3 %v202_v60  ;;  %353 = vmatmul.f32.gmra.mxu0 %v3952_v52 }
  0x6c   :  { %394 = vmatmul.f32.gmra.mxu1 %v3952_v52  ;;  %501 = vmatpush.msrb.mxu0 %v207_v61 }
  0x6d   :  { %542 = vmatpush.msrb.mxu1 %v208_v63  ;;  %585 = vmatpush.msrb.mxu2 %v193_v2 }
  0x6e   :  { %626 = vmatpush.msrb.mxu3 %v194_v3  ;;  %502 = vmatpush.msrb.mxu0 %v199_v5 }
  0x6f   :  { %438 = vmatmul.f32.gmra.mxu2 %v176_v4  ;;  %543 = vmatpush.msrb.mxu1 %v200_v6 }
  0x70   :  { %479 = vmatmul.f32.gmra.mxu3 %v176_v4  ;;  %586 = vmatpush.msrb.mxu2 %v185_v7 }
  0x71   :  { %627 = vmatpush.msrb.mxu3 %v186_v8  ;;  %503 = vmatpush.msrb.mxu0 %v191_v9 }
  0x72   :  { %544 = vmatpush.msrb.mxu1 %v192_v10 }
  0x73   :  { %356 = vmatmul.f32.gmra.mxu0 %v176_v4 }
  0x74   :  { %397 = vmatmul.f32.gmra.mxu1 %v176_v4  ;;  %504 = vmatpush.msrb.mxu0 %v183_v11 }
  0x75   :  { %545 = vmatpush.msrb.mxu1 %v184_v12 }
  0x77   :  { %441 = vmatmul.f32.gmra.mxu2 %v177_v14 }
  0x78   :  { %482 = vmatmul.f32.gmra.mxu3 %v177_v14 }
  0x7b   :  { %359 = vmatmul.f32.gmra.mxu0 %v177_v14 }
  0x7c   :  { %400 = vmatmul.f32.gmra.mxu1 %v177_v14 }
  0x7f   :  { %444 = vmatmul.f32.gmra.mxu2 %v178_v15 }
  0x80   :  { %485 = vmatmul.f32.gmra.mxu3 %v178_v15 }
  0x83   :  { %362 = vmatmul.f32.gmra.mxu0 %v178_v15 }
  0x84   :  { %403 = vmatmul.f32.gmra.mxu1 %v178_v15 }
  0x87   :  { %587 = vmatmul.f32.vlgmr.msrb.gmra.mxu2 %v3928_v62 }
  0x88   :  { %628 = vmatmul.f32.vlgmr.msrb.gmra.mxu3 %v3928_v62 }
  0x8b   :  { %505 = vmatmul.f32.vlgmr.msrb.gmra.mxu0 %v3928_v62 }
  0x8c   :  { %546 = vmatmul.f32.vlgmr.msrb.gmra.mxu1 %v3928_v62  ;;  %v3978_v62 = vld [vmem:[#allocation15] sm:$0xff] }
  0x8d   :  { %v3984_v16 = vperm.slane %v3978_v62, 1  ;;  %v3987_v17 = vperm.slane %v3978_v62, 2  ;;  %v3990_v18 = vperm.slane %v3978_v62, 3 }
  0x8f   :  { %590 = vmatmul.f32.gmra.mxu2 %v3934_v13 }
  0x90   :  { %631 = vmatmul.f32.gmra.mxu3 %v3934_v13 }
  0x93   :  { %508 = vmatmul.f32.gmra.mxu0 %v3934_v13 }
  0x94   :  { %549 = vmatmul.f32.gmra.mxu1 %v3934_v13  ;;  %v3981_v13 = vperm.slane %v3978_v62, 0 }
  0x97   :  { %593 = vmatmul.f32.gmra.mxu2 %v3940_v26 }
  0x98   :  { %634 = vmatmul.f32.gmra.mxu3 %v3940_v26 }
  0x9b   :  { %511 = vmatmul.f32.gmra.mxu0 %v3940_v26 }
  0x9c   :  { %552 = vmatmul.f32.gmra.mxu1 %v3940_v26 }
  0x9f   :  { %596 = vmatmul.f32.gmra.mxu2 %v3946_v39 }
  0xa0   :  { %637 = vmatmul.f32.gmra.mxu3 %v3946_v39 }
  0xa3   :  { %514 = vmatmul.f32.gmra.mxu0 %v3946_v39 }
  0xa4   :  { %555 = vmatmul.f32.gmra.mxu1 %v3946_v39 }
  0xa7   :  { %599 = vmatmul.f32.gmra.mxu2 %v3952_v52 }
  0xa8   :  { %640 = vmatmul.f32.gmra.mxu3 %v3952_v52 }
  0xab   :  { %517 = vmatmul.f32.gmra.mxu0 %v3952_v52 }
  0xac   :  { %558 = vmatmul.f32.gmra.mxu1 %v3952_v52 }
  0xaf   :  { %602 = vmatmul.f32.gmra.mxu2 %v176_v4 }
  0xb0   :  { %643 = vmatmul.f32.gmra.mxu3 %v176_v4 }
  0xb3   :  { %520 = vmatmul.f32.gmra.mxu0 %v176_v4 }
  0xb4   :  { %561 = vmatmul.f32.gmra.mxu1 %v176_v4 }
  0xb7   :  { %605 = vmatmul.f32.gmra.mxu2 %v177_v14 }
  0xb8   :  { %646 = vmatmul.f32.gmra.mxu3 %v177_v14 }
  0xbb   :  { %523 = vmatmul.f32.gmra.mxu0 %v177_v14 }
  0xbc   :  { %564 = vmatmul.f32.gmra.mxu1 %v177_v14 }
  0xbf   :  { %608 = vmatmul.f32.gmra.mxu2 %v178_v15 }
  0xc0   :  { %649 = vmatmul.f32.gmra.mxu3 %v178_v15 }
  0xc3   :  { %526 = vmatmul.f32.gmra.mxu0 %v178_v15 }
  0xc4   :  { %567 = vmatmul.f32.gmra.mxu1 %v178_v15 }
  0xc8   :  { %v342_v19 = vpop.f32.mrf.mxu0 }
  0xc9   :  { %v383_v20 = vpop.f32.mrf.mxu1  ;;  %v343_v21 = vadd.f32 %v342_v19, %v3981_v13 }
  0xca   :  { %v384_v22 = vadd.f32 %v383_v20, %v3984_v16  ;;  %v424_v23 = vpop.f32.mrf.mxu2 }
  0xcb   :  { %v465_v24 = vpop.f32.mrf.mxu3  ;;  %v425_v25 = vadd.f32 %v424_v23, %v3987_v17  ;;  %653 = vst [vmem:[#allocation2] sm:$0xff] %v343_v21 }
  0xcc   :  { %v466_v26 = vadd.f32 %v465_v24, %v3990_v18  ;;  %654 = vst [vmem:[#allocation2 + $0x8] sm:$0xff] %v384_v22 }
  0xcd   :  { %655 = vst [vmem:[#allocation2 + $0x10] sm:$0xff] %v425_v25 }
  0xce   :  { %656 = vst [vmem:[#allocation2 + $0x18] sm:$0xff] %v466_v26  ;;  %v4025_v26 = vperm.slane %v3978_v62, 4 }
  0xd0   :  { %v345_v27 = vpop.f32.mrf.mxu0 }
  0xd1   :  { %v386_v28 = vpop.f32.mrf.mxu1  ;;  %v346_v29 = vadd.f32 %v345_v27, %v3981_v13  ;;  %v4028_v27 = vperm.slane %v3978_v62, 5 }
  0xd2   :  { %v387_v30 = vadd.f32 %v386_v28, %v3984_v16  ;;  %v427_v31 = vpop.f32.mrf.mxu2 }
  0xd3   :  { %v468_v32 = vpop.f32.mrf.mxu3  ;;  %v428_v33 = vadd.f32 %v427_v31, %v3987_v17  ;;  %661 = vst [vmem:[#allocation2 + $0x40] sm:$0xff] %v346_v29 }
  0xd4   :  { %v469_v34 = vadd.f32 %v468_v32, %v3990_v18  ;;  %662 = vst [vmem:[#allocation2 + $0x48] sm:$0xff] %v387_v30 }
  0xd5   :  { %663 = vst [vmem:[#allocation2 + $0x50] sm:$0xff] %v428_v33 }
  0xd6   :  { %664 = vst [vmem:[#allocation2 + $0x58] sm:$0xff] %v469_v34 }
  0xd8   :  { %v348_v35 = vpop.f32.mrf.mxu0 }
  0xd9   :  { %v389_v36 = vpop.f32.mrf.mxu1  ;;  %v349_v37 = vadd.f32 %v348_v35, %v3981_v13 }
  0xda   :  { %v390_v38 = vadd.f32 %v389_v36, %v3984_v16  ;;  %v430_v39 = vpop.f32.mrf.mxu2 }
  0xdb   :  { %v471_v40 = vpop.f32.mrf.mxu3  ;;  %v431_v41 = vadd.f32 %v430_v39, %v3987_v17  ;;  %669 = vst [vmem:[#allocation2 + $0x80] sm:$0xff] %v349_v37 }
  0xdc   :  { %v472_v42 = vadd.f32 %v471_v40, %v3990_v18  ;;  %670 = vst [vmem:[#allocation2 + $0x88] sm:$0xff] %v390_v38 }
  0xdd   :  { %671 = vst [vmem:[#allocation2 + $0x90] sm:$0xff] %v431_v41 }
  0xde   :  { %672 = vst [vmem:[#allocation2 + $0x98] sm:$0xff] %v472_v42 }
  0xe0   :  { %v351_v43 = vpop.f32.mrf.mxu0 }
  0xe1   :  { %v392_v44 = vpop.f32.mrf.mxu1  ;;  %v352_v45 = vadd.f32 %v351_v43, %v3981_v13 }
  0xe2   :  { %v393_v46 = vadd.f32 %v392_v44, %v3984_v16  ;;  %v433_v47 = vpop.f32.mrf.mxu2 }
  0xe3   :  { %v474_v48 = vpop.f32.mrf.mxu3  ;;  %v434_v49 = vadd.f32 %v433_v47, %v3987_v17  ;;  %677 = vst [vmem:[#allocation2 + $0xc0] sm:$0xff] %v352_v45 }
  0xe4   :  { %v475_v50 = vadd.f32 %v474_v48, %v3990_v18  ;;  %678 = vst [vmem:[#allocation2 + $0xc8] sm:$0xff] %v393_v46 }
  0xe5   :  { %679 = vst [vmem:[#allocation2 + $0xd0] sm:$0xff] %v434_v49 }
  0xe6   :  { %680 = vst [vmem:[#allocation2 + $0xd8] sm:$0xff] %v475_v50 }
  0xe8   :  { %v354_v51 = vpop.f32.mrf.mxu0 }
  0xe9   :  { %v395_v52 = vpop.f32.mrf.mxu1  ;;  %v355_v53 = vadd.f32 %v354_v51, %v3981_v13 }
  0xea   :  { %v396_v54 = vadd.f32 %v395_v52, %v3984_v16  ;;  %v436_v55 = vpop.f32.mrf.mxu2 }
  0xeb   :  { %v477_v56 = vpop.f32.mrf.mxu3  ;;  %v437_v57 = vadd.f32 %v436_v55, %v3987_v17  ;;  %685 = vst [vmem:[#allocation2 + $0x100] sm:$0xff] %v355_v53 }
  0xec   :  { %v478_v58 = vadd.f32 %v477_v56, %v3990_v18  ;;  %686 = vst [vmem:[#allocation2 + $0x108] sm:$0xff] %v396_v54 }
  0xed   :  { %687 = vst [vmem:[#allocation2 + $0x110] sm:$0xff] %v437_v57 }
  0xee   :  { %688 = vst [vmem:[#allocation2 + $0x118] sm:$0xff] %v478_v58 }
  0xf0   :  { %v357_v59 = vpop.f32.mrf.mxu0 }
  0xf1   :  { %v398_v60 = vpop.f32.mrf.mxu1  ;;  %v358_v61 = vadd.f32 %v357_v59, %v3981_v13 }
  0xf2   :  { %v399_v63 = vadd.f32 %v398_v60, %v3984_v16  ;;  %v439_v2 = vpop.f32.mrf.mxu2 }
  0xf3   :  { %v480_v3 = vpop.f32.mrf.mxu3  ;;  %v440_v4 = vadd.f32 %v439_v2, %v3987_v17  ;;  %693 = vst [vmem:[#allocation2 + $0x140] sm:$0xff] %v358_v61 }
  0xf4   :  { %v481_v5 = vadd.f32 %v480_v3, %v3990_v18  ;;  %694 = vst [vmem:[#allocation2 + $0x148] sm:$0xff] %v399_v63 }
  0xf5   :  { %695 = vst [vmem:[#allocation2 + $0x150] sm:$0xff] %v440_v4 }
  0xf6   :  { %696 = vst [vmem:[#allocation2 + $0x158] sm:$0xff] %v481_v5 }
  0xf8   :  { %v360_v6 = vpop.f32.mrf.mxu0 }
  0xf9   :  { %v401_v7 = vpop.f32.mrf.mxu1  ;;  %v361_v8 = vadd.f32 %v360_v6, %v3981_v13 }
  0xfa   :  { %v402_v9 = vadd.f32 %v401_v7, %v3984_v16  ;;  %v442_v10 = vpop.f32.mrf.mxu2 }
  0xfb   :  { %v483_v11 = vpop.f32.mrf.mxu3  ;;  %v443_v12 = vadd.f32 %v442_v10, %v3987_v17  ;;  %701 = vst [vmem:[#allocation2 + $0x180] sm:$0xff] %v361_v8 }
  0xfc   :  { %v484_v14 = vadd.f32 %v483_v11, %v3990_v18  ;;  %702 = vst [vmem:[#allocation2 + $0x188] sm:$0xff] %v402_v9 }
  0xfd   :  { %703 = vst [vmem:[#allocation2 + $0x190] sm:$0xff] %v443_v12 }
  0xfe   :  { %704 = vst [vmem:[#allocation2 + $0x198] sm:$0xff] %v484_v14 }
 0x100   :  { %v363_v15 = vpop.f32.mrf.mxu0 }
 0x101   :  { %v404_v19 = vpop.f32.mrf.mxu1  ;;  %v364_v20 = vadd.f32 %v363_v15, %v3981_v13  ;;  %v4031_v13 = vperm.slane %v3978_v62, 6 }
 0x102   :  { %v405_v21 = vadd.f32 %v404_v19, %v3984_v16  ;;  %v445_v22 = vpop.f32.mrf.mxu2  ;;  %v4034_v16 = vperm.slane %v3978_v62, 7 }
 0x103   :  { %v486_v23 = vpop.f32.mrf.mxu3  ;;  %v446_v24 = vadd.f32 %v445_v22, %v3987_v17  ;;  %709 = vst [vmem:[#allocation2 + $0x1c0] sm:$0xff] %v364_v20 }
 0x104   :  { %v487_v25 = vadd.f32 %v486_v23, %v3990_v18  ;;  %710 = vst [vmem:[#allocation2 + $0x1c8] sm:$0xff] %v405_v21 }
 0x105   :  { %711 = vst [vmem:[#allocation2 + $0x1d0] sm:$0xff] %v446_v24 }
 0x106   :  { %712 = vst [vmem:[#allocation2 + $0x1d8] sm:$0xff] %v487_v25 }
 0x108   :  { %v506_v28 = vpop.f32.mrf.mxu0 }
 0x109   :  { %v547_v17 = vpop.f32.mrf.mxu1  ;;  %v507_v18 = vadd.f32 %v506_v28, %v4025_v26 }
 0x10a   :  { %v548_v29 = vadd.f32 %v547_v17, %v4028_v27  ;;  %v588_v30 = vpop.f32.mrf.mxu2 }
 0x10b   :  { %v629_v31 = vpop.f32.mrf.mxu3  ;;  %v589_v32 = vadd.f32 %v588_v30, %v4031_v13  ;;  %657 = vst [vmem:[#allocation2 + $0x20] sm:$0xff] %v507_v18 }
 0x10c   :  { %v630_v33 = vadd.f32 %v629_v31, %v4034_v16  ;;  %658 = vst [vmem:[#allocation2 + $0x28] sm:$0xff] %v548_v29 }
 0x10d   :  { %659 = vst [vmem:[#allocation2 + $0x30] sm:$0xff] %v589_v32 }
 0x10e   :  { %660 = vst [vmem:[#allocation2 + $0x38] sm:$0xff] %v630_v33 }
 0x110   :  { %v509_v34 = vpop.f32.mrf.mxu0 }
 0x111   :  { %v550_v35 = vpop.f32.mrf.mxu1  ;;  %v510_v62 = vadd.f32 %v509_v34, %v4025_v26 }
 0x112   :  { %v551_v36 = vadd.f32 %v550_v35, %v4028_v27  ;;  %v591_v37 = vpop.f32.mrf.mxu2 }
 0x113   :  { %v632_v38 = vpop.f32.mrf.mxu3  ;;  %v592_v39 = vadd.f32 %v591_v37, %v4031_v13  ;;  %665 = vst [vmem:[#allocation2 + $0x60] sm:$0xff] %v510_v62 }
 0x114   :  { %v633_v40 = vadd.f32 %v632_v38, %v4034_v16  ;;  %666 = vst [vmem:[#allocation2 + $0x68] sm:$0xff] %v551_v36 }
 0x115   :  { %667 = vst [vmem:[#allocation2 + $0x70] sm:$0xff] %v592_v39 }
 0x116   :  { %668 = vst [vmem:[#allocation2 + $0x78] sm:$0xff] %v633_v40 }
 0x118   :  { %v512_v41 = vpop.f32.mrf.mxu0 }
 0x119   :  { %v553_v42 = vpop.f32.mrf.mxu1  ;;  %v513_v43 = vadd.f32 %v512_v41, %v4025_v26 }
 0x11a   :  { %v554_v44 = vadd.f32 %v553_v42, %v4028_v27  ;;  %v594_v45 = vpop.f32.mrf.mxu2 }
 0x11b   :  { %v635_v46 = vpop.f32.mrf.mxu3  ;;  %v595_v47 = vadd.f32 %v594_v45, %v4031_v13  ;;  %673 = vst [vmem:[#allocation2 + $0xa0] sm:$0xff] %v513_v43 }
 0x11c   :  { %v636_v48 = vadd.f32 %v635_v46, %v4034_v16  ;;  %674 = vst [vmem:[#allocation2 + $0xa8] sm:$0xff] %v554_v44 }
 0x11d   :  { %675 = vst [vmem:[#allocation2 + $0xb0] sm:$0xff] %v595_v47 }
 0x11e   :  { %676 = vst [vmem:[#allocation2 + $0xb8] sm:$0xff] %v636_v48 }
 0x120   :  { %v515_v49 = vpop.f32.mrf.mxu0 }
 0x121   :  { %v556_v50 = vpop.f32.mrf.mxu1  ;;  %v516_v51 = vadd.f32 %v515_v49, %v4025_v26 }
 0x122   :  { %v557_v52 = vadd.f32 %v556_v50, %v4028_v27  ;;  %v597_v53 = vpop.f32.mrf.mxu2 }
 0x123   :  { %v638_v54 = vpop.f32.mrf.mxu3  ;;  %v598_v55 = vadd.f32 %v597_v53, %v4031_v13  ;;  %681 = vst [vmem:[#allocation2 + $0xe0] sm:$0xff] %v516_v51 }
 0x124   :  { %v639_v56 = vadd.f32 %v638_v54, %v4034_v16  ;;  %682 = vst [vmem:[#allocation2 + $0xe8] sm:$0xff] %v557_v52 }
 0x125   :  { %683 = vst [vmem:[#allocation2 + $0xf0] sm:$0xff] %v598_v55 }
 0x126   :  { %684 = vst [vmem:[#allocation2 + $0xf8] sm:$0xff] %v639_v56 }
 0x128   :  { %v518_v57 = vpop.f32.mrf.mxu0 }
 0x129   :  { %v559_v58 = vpop.f32.mrf.mxu1  ;;  %v519_v59 = vadd.f32 %v518_v57, %v4025_v26 }
 0x12a   :  { %v560_v60 = vadd.f32 %v559_v58, %v4028_v27  ;;  %v600_v61 = vpop.f32.mrf.mxu2 }
 0x12b   :  { %v641_v63 = vpop.f32.mrf.mxu3  ;;  %v601_v2 = vadd.f32 %v600_v61, %v4031_v13  ;;  %689 = vst [vmem:[#allocation2 + $0x120] sm:$0xff] %v519_v59 }
 0x12c   :  { %v642_v3 = vadd.f32 %v641_v63, %v4034_v16  ;;  %690 = vst [vmem:[#allocation2 + $0x128] sm:$0xff] %v560_v60 }
 0x12d   :  { %691 = vst [vmem:[#allocation2 + $0x130] sm:$0xff] %v601_v2 }
 0x12e   :  { %692 = vst [vmem:[#allocation2 + $0x138] sm:$0xff] %v642_v3 }
 0x130   :  { %v521_v4 = vpop.f32.mrf.mxu0 }
 0x131   :  { %v562_v5 = vpop.f32.mrf.mxu1  ;;  %v522_v6 = vadd.f32 %v521_v4, %v4025_v26 }
 0x132   :  { %v563_v7 = vadd.f32 %v562_v5, %v4028_v27  ;;  %v603_v8 = vpop.f32.mrf.mxu2 }
 0x133   :  { %v644_v9 = vpop.f32.mrf.mxu3  ;;  %v604_v10 = vadd.f32 %v603_v8, %v4031_v13  ;;  %697 = vst [vmem:[#allocation2 + $0x160] sm:$0xff] %v522_v6 }
 0x134   :  { %v645_v11 = vadd.f32 %v644_v9, %v4034_v16  ;;  %698 = vst [vmem:[#allocation2 + $0x168] sm:$0xff] %v563_v7 }
 0x135   :  { %699 = vst [vmem:[#allocation2 + $0x170] sm:$0xff] %v604_v10 }
 0x136   :  { %700 = vst [vmem:[#allocation2 + $0x178] sm:$0xff] %v645_v11 }
 0x138   :  { %v524_v12 = vpop.f32.mrf.mxu0 }
 0x139   :  { %v565_v14 = vpop.f32.mrf.mxu1  ;;  %v525_v15 = vadd.f32 %v524_v12, %v4025_v26 }
 0x13a   :  { %v566_v19 = vadd.f32 %v565_v14, %v4028_v27  ;;  %v606_v20 = vpop.f32.mrf.mxu2 }
 0x13b   :  { %v647_v21 = vpop.f32.mrf.mxu3  ;;  %v607_v22 = vadd.f32 %v606_v20, %v4031_v13  ;;  %705 = vst [vmem:[#allocation2 + $0x1a0] sm:$0xff] %v525_v15 }
 0x13c   :  { %v648_v23 = vadd.f32 %v647_v21, %v4034_v16  ;;  %706 = vst [vmem:[#allocation2 + $0x1a8] sm:$0xff] %v566_v19 }
 0x13d   :  { %707 = vst [vmem:[#allocation2 + $0x1b0] sm:$0xff] %v607_v22 }
 0x13e   :  { %708 = vst [vmem:[#allocation2 + $0x1b8] sm:$0xff] %v648_v23 }
 0x140   :  { %v527_v24 = vpop.f32.mrf.mxu0 }
 0x141   :  { %v568_v25 = vpop.f32.mrf.mxu1  ;;  %v528_v28 = vadd.f32 %v527_v24, %v4025_v26 }
 0x142   :  { %v569_v17 = vadd.f32 %v568_v25, %v4028_v27  ;;  %v609_v18 = vpop.f32.mrf.mxu2 }
 0x143   :  { %v650_v29 = vpop.f32.mrf.mxu3  ;;  %v610_v30 = vadd.f32 %v609_v18, %v4031_v13  ;;  %713 = vst [vmem:[#allocation2 + $0x1e0] sm:$0xff] %v528_v28 }
 0x144   :  { %v651_v31 = vadd.f32 %v650_v29, %v4034_v16  ;;  %714 = vst [vmem:[#allocation2 + $0x1e8] sm:$0xff] %v569_v17 }
 0x145   :  { %715 = vst [vmem:[#allocation2 + $0x1f0] sm:$0xff] %v610_v30 }
 0x146   :  { %716 = vst [vmem:[#allocation2 + $0x1f8] sm:$0xff] %v651_v31 }
 0x147 LB: > { %v861_v26 = vld [vmem:[#allocation13 + $0x3c8] sm:$0xff]  ;;  %v860_v13 = vld [vmem:[#allocation13 + $0x3c0] sm:$0xff]  ;;  %s3425_s8 = sshll.u32 %s3805_s6, 6  ;;  %s3427_s26 = sshll.u32 %s3805_s6, 4  ;;  %s3805_s6 = sphi %s4068_s6, %s726_s6  }
 0x148   : > { %v989_v32 = vld [vmem:[#allocation13 + $0x7c8] sm:$0xff]  ;;  %1036 = vmatpush.msra.mxu2 %v861_v26  ;;  %v988_v34 = vld [vmem:[#allocation13 + $0x7c0] sm:$0xff]  ;;  %996 = vmatpush.msra.mxu0 %v860_v13  ;;  %v863_v26 = vld [vmem:[#allocation13 + $0x3d8] sm:$0xff]  ;;  %s4094_s1 = scalar_lea.vmem [#allocation2], %s3425_s8  ;;  %s4118_s14 = ssub.s32 7, %s3805_s6 }
 0x149   : > { %v853_v27 = vld [vmem:[#allocation13 + $0x388] sm:$0xff]  ;;  %1056 = vmatpush.msra.mxu3 %v989_v32  ;;  %1016 = vmatpush.msra.mxu1 %v988_v34  ;;  %v852_v62 = vld [vmem:[#allocation13 + $0x380] sm:$0xff]  ;;  %v991_v32 = vld [vmem:[#allocation13 + $0x7d8] sm:$0xff]  ;;  %s3426_s15 = sshll.u32 %s4118_s14, 6  ;;  %s1467_s16 = scalar_lea.vmem [#allocation3], %s3427_s26 }
 0x14a   : > { %v981_v33 = vld [vmem:[#allocation13 + $0x788] sm:$0xff]  ;;  %1037 = vmatpush.msra.mxu2 %v853_v27  ;;  %v980_v36 = vld [vmem:[#allocation13 + $0x780] sm:$0xff]  ;;  %997 = vmatpush.msra.mxu0 %v852_v62  ;;  %v855_v13 = vld [vmem:[#allocation13 + $0x398] sm:$0xff]  ;;  %s4122_s7 = scalar_lea.vmem [#allocation2], %s3426_s15  ;;  %s3428_s17 = sshll.u32 %s4118_s14, 4 }
 0x14b   : > { %v845_v16 = vld [vmem:[#allocation13 + $0x348] sm:$0xff]  ;;  %1057 = vmatpush.msra.mxu3 %v981_v33  ;;  %1017 = vmatpush.msra.mxu1 %v980_v36  ;;  %v844_v39 = vld [vmem:[#allocation13 + $0x340] sm:$0xff]  ;;  %v983_v34 = vld [vmem:[#allocation13 + $0x798] sm:$0xff]  ;;  %s1472_s18 = scalar_lea.vmem [#allocation3], %s3428_s17 }
 0x14c   : > { %v973_v35 = vld [vmem:[#allocation13 + $0x748] sm:$0xff]  ;;  %v972_v40 = vld [vmem:[#allocation13 + $0x740] sm:$0xff]  ;;  %1038 = vmatpush.msra.mxu2 %v845_v16  ;;  %998 = vmatpush.msra.mxu0 %v844_v39  ;;  %v862_v16 = vld [vmem:[#allocation13 + $0x3d0] sm:$0xff] }
 0x14d   : > { %v837_v37 = vld [vmem:[#allocation13 + $0x308] sm:$0xff]  ;;  %1058 = vmatpush.msra.mxu3 %v973_v35  ;;  %v836_v41 = vld [vmem:[#allocation13 + $0x300] sm:$0xff]  ;;  %1018 = vmatpush.msra.mxu1 %v972_v40  ;;  %v990_v35 = vld [vmem:[#allocation13 + $0x7d0] sm:$0xff] }
 0x14e   : > { %v965_v38 = vld [vmem:[#allocation13 + $0x708] sm:$0xff]  ;;  %v964_v42 = vld [vmem:[#allocation13 + $0x700] sm:$0xff]  ;;  %1039 = vmatpush.msra.mxu2 %v837_v37  ;;  %999 = vmatpush.msra.mxu0 %v836_v41  ;;  %v847_v62 = vld [vmem:[#allocation13 + $0x358] sm:$0xff] }
 0x14f   : > { %v829_v43 = vld [vmem:[#allocation13 + $0x2c8] sm:$0xff]  ;;  %1059 = vmatpush.msra.mxu3 %v965_v38  ;;  %v828_v45 = vld [vmem:[#allocation13 + $0x2c0] sm:$0xff]  ;;  %1019 = vmatpush.msra.mxu1 %v964_v42  ;;  %v975_v36 = vld [vmem:[#allocation13 + $0x758] sm:$0xff] }
 0x150   : > { %v957_v44 = vld [vmem:[#allocation13 + $0x6c8] sm:$0xff]  ;;  %v956_v46 = vld [vmem:[#allocation13 + $0x6c0] sm:$0xff]  ;;  %1040 = vmatpush.msra.mxu2 %v829_v43  ;;  %1000 = vmatpush.msra.mxu0 %v828_v45  ;;  %v854_v37 = vld [vmem:[#allocation13 + $0x390] sm:$0xff] }
 0x151   : > { %v821_v47 = vld [vmem:[#allocation13 + $0x288] sm:$0xff]  ;;  %1060 = vmatpush.msra.mxu3 %v957_v44  ;;  %v820_v49 = vld [vmem:[#allocation13 + $0x280] sm:$0xff]  ;;  %1020 = vmatpush.msra.mxu1 %v956_v46  ;;  %v982_v38 = vld [vmem:[#allocation13 + $0x790] sm:$0xff] }
 0x152   : > { %v949_v48 = vld [vmem:[#allocation13 + $0x688] sm:$0xff]  ;;  %v948_v50 = vld [vmem:[#allocation13 + $0x680] sm:$0xff]  ;;  %1041 = vmatpush.msra.mxu2 %v821_v47  ;;  %1001 = vmatpush.msra.mxu0 %v820_v49  ;;  %v839_v39 = vld [vmem:[#allocation13 + $0x318] sm:$0xff] }
 0x153   : > { %v813_v51 = vld [vmem:[#allocation13 + $0x248] sm:$0xff]  ;;  %1061 = vmatpush.msra.mxu3 %v949_v48  ;;  %v812_v53 = vld [vmem:[#allocation13 + $0x240] sm:$0xff]  ;;  %1021 = vmatpush.msra.mxu1 %v948_v50  ;;  %v967_v40 = vld [vmem:[#allocation13 + $0x718] sm:$0xff] }
 0x154   : > { %v941_v52 = vld [vmem:[#allocation13 + $0x648] sm:$0xff]  ;;  %v940_v54 = vld [vmem:[#allocation13 + $0x640] sm:$0xff]  ;;  %1042 = vmatpush.msra.mxu2 %v813_v51  ;;  %1002 = vmatpush.msra.mxu0 %v812_v53  ;;  %v846_v41 = vld [vmem:[#allocation13 + $0x350] sm:$0xff] }
 0x155   : > { %v805_v55 = vld [vmem:[#allocation13 + $0x208] sm:$0xff]  ;;  %1062 = vmatpush.msra.mxu3 %v941_v52  ;;  %v804_v57 = vld [vmem:[#allocation13 + $0x200] sm:$0xff]  ;;  %1022 = vmatpush.msra.mxu1 %v940_v54  ;;  %v974_v42 = vld [vmem:[#allocation13 + $0x750] sm:$0xff] }
 0x156   : > { %v933_v56 = vld [vmem:[#allocation13 + $0x608] sm:$0xff]  ;;  %v932_v58 = vld [vmem:[#allocation13 + $0x600] sm:$0xff]  ;;  %1043 = vmatpush.msra.mxu2 %v805_v55  ;;  %1003 = vmatpush.msra.mxu0 %v804_v57  ;;  %v831_v43 = vld [vmem:[#allocation13 + $0x2d8] sm:$0xff] }
 0x157   : > { %v797_v59 = vld [vmem:[#allocation13 + $0x1c8] sm:$0xff]  ;;  %1063 = vmatpush.msra.mxu3 %v933_v56  ;;  %v796_v61 = vld [vmem:[#allocation13 + $0x1c0] sm:$0xff]  ;;  %1023 = vmatpush.msra.mxu1 %v932_v58  ;;  %v959_v44 = vld [vmem:[#allocation13 + $0x6d8] sm:$0xff] }
 0x158   : > { %v925_v60 = vld [vmem:[#allocation13 + $0x5c8] sm:$0xff]  ;;  %v924_v63 = vld [vmem:[#allocation13 + $0x5c0] sm:$0xff]  ;;  %1044 = vmatpush.msra.mxu2 %v797_v59  ;;  %1004 = vmatpush.msra.mxu0 %v796_v61  ;;  %v838_v45 = vld [vmem:[#allocation13 + $0x310] sm:$0xff] }
 0x159   : > { %v789_v2 = vld [vmem:[#allocation13 + $0x188] sm:$0xff]  ;;  %1064 = vmatpush.msra.mxu3 %v925_v60  ;;  %v788_v4 = vld [vmem:[#allocation13 + $0x180] sm:$0xff]  ;;  %1024 = vmatpush.msra.mxu1 %v924_v63  ;;  %v966_v46 = vld [vmem:[#allocation13 + $0x710] sm:$0xff] }
 0x15a   : > { %v917_v3 = vld [vmem:[#allocation13 + $0x588] sm:$0xff]  ;;  %v916_v5 = vld [vmem:[#allocation13 + $0x580] sm:$0xff]  ;;  %1045 = vmatpush.msra.mxu2 %v789_v2  ;;  %1005 = vmatpush.msra.mxu0 %v788_v4  ;;  %v823_v47 = vld [vmem:[#allocation13 + $0x298] sm:$0xff] }
 0x15b   : > { %v781_v6 = vld [vmem:[#allocation13 + $0x148] sm:$0xff]  ;;  %1065 = vmatpush.msra.mxu3 %v917_v3  ;;  %v780_v8 = vld [vmem:[#allocation13 + $0x140] sm:$0xff]  ;;  %1025 = vmatpush.msra.mxu1 %v916_v5  ;;  %v951_v48 = vld [vmem:[#allocation13 + $0x698] sm:$0xff] }
 0x15c   : > { %v909_v7 = vld [vmem:[#allocation13 + $0x548] sm:$0xff]  ;;  %v908_v9 = vld [vmem:[#allocation13 + $0x540] sm:$0xff]  ;;  %1046 = vmatpush.msra.mxu2 %v781_v6  ;;  %1006 = vmatpush.msra.mxu0 %v780_v8  ;;  %v830_v49 = vld [vmem:[#allocation13 + $0x2d0] sm:$0xff] }
 0x15d   : > { %v773_v10 = vld [vmem:[#allocation13 + $0x108] sm:$0xff]  ;;  %1066 = vmatpush.msra.mxu3 %v909_v7  ;;  %v772_v12 = vld [vmem:[#allocation13 + $0x100] sm:$0xff]  ;;  %1026 = vmatpush.msra.mxu1 %v908_v9  ;;  %v958_v50 = vld [vmem:[#allocation13 + $0x6d0] sm:$0xff] }
 0x15e   : > { %v901_v11 = vld [vmem:[#allocation13 + $0x508] sm:$0xff]  ;;  %v900_v14 = vld [vmem:[#allocation13 + $0x500] sm:$0xff]  ;;  %1047 = vmatpush.msra.mxu2 %v773_v10  ;;  %1007 = vmatpush.msra.mxu0 %v772_v12  ;;  %v815_v51 = vld [vmem:[#allocation13 + $0x258] sm:$0xff] }
 0x15f   : > { %v765_v15 = vld [vmem:[#allocation13 + $0xc8] sm:$0xff]  ;;  %1067 = vmatpush.msra.mxu3 %v901_v11  ;;  %v764_v20 = vld [vmem:[#allocation13 + $0xc0] sm:$0xff]  ;;  %1027 = vmatpush.msra.mxu1 %v900_v14  ;;  %v943_v52 = vld [vmem:[#allocation13 + $0x658] sm:$0xff] }
 0x160   : > { %v893_v19 = vld [vmem:[#allocation13 + $0x4c8] sm:$0xff]  ;;  %v892_v21 = vld [vmem:[#allocation13 + $0x4c0] sm:$0xff]  ;;  %1048 = vmatpush.msra.mxu2 %v765_v15  ;;  %1008 = vmatpush.msra.mxu0 %v764_v20  ;;  %v822_v53 = vld [vmem:[#allocation13 + $0x290] sm:$0xff] }
 0x161   : > { %v757_v22 = vld [vmem:[#allocation13 + $0x88] sm:$0xff]  ;;  %1068 = vmatpush.msra.mxu3 %v893_v19  ;;  %v756_v24 = vld [vmem:[#allocation13 + $0x80] sm:$0xff]  ;;  %1028 = vmatpush.msra.mxu1 %v892_v21  ;;  %v950_v54 = vld [vmem:[#allocation13 + $0x690] sm:$0xff] }
 0x162   : > { %v885_v23 = vld [vmem:[#allocation13 + $0x488] sm:$0xff]  ;;  %v884_v25 = vld [vmem:[#allocation13 + $0x480] sm:$0xff]  ;;  %1049 = vmatpush.msra.mxu2 %v757_v22  ;;  %1009 = vmatpush.msra.mxu0 %v756_v24  ;;  %v807_v55 = vld [vmem:[#allocation13 + $0x218] sm:$0xff] }
 0x163   : > { %v749_v28 = vld [vmem:[#allocation13 + $0x48] sm:$0xff]  ;;  %1069 = vmatpush.msra.mxu3 %v885_v23  ;;  %v748_v18 = vld [vmem:[#allocation13 + $0x40] sm:$0xff]  ;;  %1029 = vmatpush.msra.mxu1 %v884_v25  ;;  %v935_v56 = vld [vmem:[#allocation13 + $0x618] sm:$0xff] }
 0x164   : > { %v877_v17 = vld [vmem:[#allocation13 + $0x448] sm:$0xff]  ;;  %v876_v29 = vld [vmem:[#allocation13 + $0x440] sm:$0xff]  ;;  %1050 = vmatpush.msra.mxu2 %v749_v28  ;;  %1010 = vmatpush.msra.mxu0 %v748_v18  ;;  %v814_v57 = vld [vmem:[#allocation13 + $0x250] sm:$0xff] }
 0x165   : > { %v741_v30 = vld [vmem:[#allocation13 + $0x8] sm:$0xff]  ;;  %1070 = vmatpush.msra.mxu3 %v877_v17  ;;  %1030 = vmatpush.msra.mxu1 %v876_v29  ;;  %v740_v27 = vld [vmem:[#allocation13] sm:$0xff]  ;;  %v942_v58 = vld [vmem:[#allocation13 + $0x650] sm:$0xff] }
 0x166   : > { %v869_v31 = vld [vmem:[#allocation13 + $0x408] sm:$0xff]  ;;  %v868_v33 = vld [vmem:[#allocation13 + $0x400] sm:$0xff]  ;;  %1051 = vmatpush.msra.mxu2 %v741_v30  ;;  %1011 = vmatpush.msra.mxu0 %v740_v27  ;;  %v799_v59 = vld [vmem:[#allocation13 + $0x1d8] sm:$0xff] }
 0x167   : > { %1071 = vmatpush.msra.mxu3 %v869_v31  ;;  %1031 = vmatpush.msra.mxu1 %v868_v33  ;;  %v927_v60 = vld [vmem:[#allocation13 + $0x5d8] sm:$0xff]  ;;  %v806_v61 = vld [vmem:[#allocation13 + $0x210] sm:$0xff]  ;;  %v4073_v2 = vld [vmem:[#allocation4] sm:$0xff] }
 0x168   : > { %1116 = vmatpush.msrb.mxu2 %v863_v26  ;;  %1076 = vmatpush.msrb.mxu0 %v862_v16  ;;  %v934_v63 = vld [vmem:[#allocation13 + $0x610] sm:$0xff]  ;;  %v791_v4 = vld [vmem:[#allocation13 + $0x198] sm:$0xff] }
 0x169   : > { %1136 = vmatpush.msrb.mxu3 %v991_v32  ;;  %1096 = vmatpush.msrb.mxu1 %v990_v35  ;;  %v4075_v3 = vld [vmem:[#allocation4 + $0x8] sm:$0xff]  ;;  %v919_v5 = vld [vmem:[#allocation13 + $0x598] sm:$0xff] }
 0x16a   : > { %1117 = vmatpush.msrb.mxu2 %v855_v13  ;;  %1077 = vmatpush.msrb.mxu0 %v854_v37  ;;  %v798_v6 = vld [vmem:[#allocation13 + $0x1d0] sm:$0xff]  ;;  %v783_v8 = vld [vmem:[#allocation13 + $0x158] sm:$0xff]  ;;  %v865_v13 = vld [vmem:[#allocation13 + $0x3e8] sm:$0xff] }
 0x16b   : > { %1137 = vmatpush.msrb.mxu3 %v983_v34  ;;  %1097 = vmatpush.msrb.mxu1 %v982_v38  ;;  %v926_v7 = vld [vmem:[#allocation13 + $0x5d0] sm:$0xff]  ;;  %v911_v9 = vld [vmem:[#allocation13 + $0x558] sm:$0xff]  ;;  %v993_v34 = vld [vmem:[#allocation13 + $0x7e8] sm:$0xff] }
 0x16c   : > { %1118 = vmatpush.msrb.mxu2 %v847_v62  ;;  %1078 = vmatpush.msrb.mxu0 %v846_v41  ;;  %v790_v10 = vld [vmem:[#allocation13 + $0x190] sm:$0xff]  ;;  %v775_v12 = vld [vmem:[#allocation13 + $0x118] sm:$0xff]  ;;  %v857_v62 = vld [vmem:[#allocation13 + $0x3a8] sm:$0xff] }
 0x16d   : > { %1138 = vmatpush.msrb.mxu3 %v975_v36  ;;  %1098 = vmatpush.msrb.mxu1 %v974_v42  ;;  %v918_v11 = vld [vmem:[#allocation13 + $0x590] sm:$0xff]  ;;  %v903_v14 = vld [vmem:[#allocation13 + $0x518] sm:$0xff]  ;;  %v985_v36 = vld [vmem:[#allocation13 + $0x7a8] sm:$0xff] }
 0x16e   : > { %1119 = vmatpush.msrb.mxu2 %v839_v39  ;;  %1079 = vmatpush.msrb.mxu0 %v838_v45  ;;  %v782_v15 = vld [vmem:[#allocation13 + $0x150] sm:$0xff]  ;;  %v767_v20 = vld [vmem:[#allocation13 + $0xd8] sm:$0xff]  ;;  %v864_v37 = vld [vmem:[#allocation13 + $0x3e0] sm:$0xff] }
 0x16f   : > { %1139 = vmatpush.msrb.mxu3 %v967_v40  ;;  %1099 = vmatpush.msrb.mxu1 %v966_v46  ;;  %v910_v19 = vld [vmem:[#allocation13 + $0x550] sm:$0xff]  ;;  %v895_v21 = vld [vmem:[#allocation13 + $0x4d8] sm:$0xff]  ;;  %v992_v38 = vld [vmem:[#allocation13 + $0x7e0] sm:$0xff] }
 0x170   : > { %1120 = vmatpush.msrb.mxu2 %v831_v43  ;;  %1080 = vmatpush.msrb.mxu0 %v830_v49  ;;  %v774_v22 = vld [vmem:[#allocation13 + $0x110] sm:$0xff]  ;;  %v759_v24 = vld [vmem:[#allocation13 + $0x98] sm:$0xff]  ;;  %v849_v39 = vld [vmem:[#allocation13 + $0x368] sm:$0xff] }
 0x171   : > { %1140 = vmatpush.msrb.mxu3 %v959_v44  ;;  %1100 = vmatpush.msrb.mxu1 %v958_v50  ;;  %v902_v23 = vld [vmem:[#allocation13 + $0x510] sm:$0xff]  ;;  %v887_v25 = vld [vmem:[#allocation13 + $0x498] sm:$0xff]  ;;  %v977_v40 = vld [vmem:[#allocation13 + $0x768] sm:$0xff] }
 0x172   : > { %1121 = vmatpush.msrb.mxu2 %v823_v47  ;;  %1081 = vmatpush.msrb.mxu0 %v822_v53  ;;  %v766_v28 = vld [vmem:[#allocation13 + $0xd0] sm:$0xff]  ;;  %v751_v18 = vld [vmem:[#allocation13 + $0x58] sm:$0xff]  ;;  %v856_v41 = vld [vmem:[#allocation13 + $0x3a0] sm:$0xff] }
 0x173   : > { %1141 = vmatpush.msrb.mxu3 %v951_v48  ;;  %1101 = vmatpush.msrb.mxu1 %v950_v54  ;;  %v894_v17 = vld [vmem:[#allocation13 + $0x4d0] sm:$0xff]  ;;  %v879_v29 = vld [vmem:[#allocation13 + $0x458] sm:$0xff]  ;;  %v984_v42 = vld [vmem:[#allocation13 + $0x7a0] sm:$0xff] }
 0x174   : > { %1122 = vmatpush.msrb.mxu2 %v815_v51  ;;  %1082 = vmatpush.msrb.mxu0 %v814_v57  ;;  %v758_v30 = vld [vmem:[#allocation13 + $0x90] sm:$0xff]  ;;  %v743_v26 = vld [vmem:[#allocation13 + $0x18] sm:$0xff]  ;;  %v841_v43 = vld [vmem:[#allocation13 + $0x328] sm:$0xff] }
 0x175   : > { %1142 = vmatpush.msrb.mxu3 %v943_v52  ;;  %1102 = vmatpush.msrb.mxu1 %v942_v58  ;;  %v886_v31 = vld [vmem:[#allocation13 + $0x490] sm:$0xff]  ;;  %v871_v32 = vld [vmem:[#allocation13 + $0x418] sm:$0xff]  ;;  %v969_v44 = vld [vmem:[#allocation13 + $0x728] sm:$0xff] }
 0x176   : > { %1123 = vmatpush.msrb.mxu2 %v807_v55  ;;  %1083 = vmatpush.msrb.mxu0 %v806_v61  ;;  %v750_v27 = vld [vmem:[#allocation13 + $0x50] sm:$0xff]  ;;  %v848_v45 = vld [vmem:[#allocation13 + $0x360] sm:$0xff]  ;;  %v833_v47 = vld [vmem:[#allocation13 + $0x2e8] sm:$0xff] }
 0x177   : > { %1143 = vmatpush.msrb.mxu3 %v935_v56  ;;  %1103 = vmatpush.msrb.mxu1 %v934_v63  ;;  %v878_v33 = vld [vmem:[#allocation13 + $0x450] sm:$0xff]  ;;  %v976_v46 = vld [vmem:[#allocation13 + $0x760] sm:$0xff]  ;;  %v961_v48 = vld [vmem:[#allocation13 + $0x6e8] sm:$0xff] }
 0x178   : > { %1124 = vmatpush.msrb.mxu2 %v799_v59  ;;  %1072 = vmatmul.f32.vlgmr.msra.gmra.mxu3 %v4075_v3  ;;  %v742_v16 = vld [vmem:[#allocation13 + $0x10] sm:$0xff]  ;;  %v840_v49 = vld [vmem:[#allocation13 + $0x320] sm:$0xff]  ;;  %v825_v51 = vld [vmem:[#allocation13 + $0x2a8] sm:$0xff] }
 0x179   : > { %1144 = vmatpush.msrb.mxu3 %v927_v60  ;;  %1052 = vmatmul.f32.vlgmr.msra.gmra.mxu2 %v4073_v2  ;;  %v870_v35 = vld [vmem:[#allocation13 + $0x410] sm:$0xff]  ;;  %v968_v50 = vld [vmem:[#allocation13 + $0x720] sm:$0xff]  ;;  %v953_v52 = vld [vmem:[#allocation13 + $0x6a8] sm:$0xff] }
 0x17a   : > { %1125 = vmatpush.msrb.mxu2 %v791_v4  ;;  %1084 = vmatpush.msrb.mxu0 %v798_v6  ;;  %v832_v53 = vld [vmem:[#allocation13 + $0x2e0] sm:$0xff]  ;;  %v817_v55 = vld [vmem:[#allocation13 + $0x268] sm:$0xff] }
 0x17b   : > { %1145 = vmatpush.msrb.mxu3 %v919_v5  ;;  %1104 = vmatpush.msrb.mxu1 %v926_v7  ;;  %v960_v54 = vld [vmem:[#allocation13 + $0x6e0] sm:$0xff]  ;;  %v945_v56 = vld [vmem:[#allocation13 + $0x668] sm:$0xff] }
 0x17c   : > { %1126 = vmatpush.msrb.mxu2 %v783_v8  ;;  %1085 = vmatpush.msrb.mxu0 %v790_v10  ;;  %v824_v57 = vld [vmem:[#allocation13 + $0x2a0] sm:$0xff]  ;;  %v809_v59 = vld [vmem:[#allocation13 + $0x228] sm:$0xff] }
 0x17d   : > { %1146 = vmatpush.msrb.mxu3 %v911_v9  ;;  %1105 = vmatpush.msrb.mxu1 %v918_v11  ;;  %v952_v58 = vld [vmem:[#allocation13 + $0x6a0] sm:$0xff]  ;;  %v937_v60 = vld [vmem:[#allocation13 + $0x628] sm:$0xff] }
 0x17e   : > { %1127 = vmatpush.msrb.mxu2 %v775_v12  ;;  %1086 = vmatpush.msrb.mxu0 %v782_v15  ;;  %v816_v61 = vld [vmem:[#allocation13 + $0x260] sm:$0xff]  ;;  %v801_v4 = vld [vmem:[#allocation13 + $0x1e8] sm:$0xff] }
 0x17f   : > { %1147 = vmatpush.msrb.mxu3 %v903_v14  ;;  %1106 = vmatpush.msrb.mxu1 %v910_v19  ;;  %v944_v63 = vld [vmem:[#allocation13 + $0x660] sm:$0xff]  ;;  %v929_v5 = vld [vmem:[#allocation13 + $0x5e8] sm:$0xff] }
 0x180   : > { %1012 = vmatmul.f32.vlgmr.msra.gmra.mxu0 %v4073_v2  ;;  %1032 = vmatmul.f32.vlgmr.msra.gmra.mxu1 %v4075_v3  ;;  %v808_v6 = vld [vmem:[#allocation13 + $0x220] sm:$0xff]  ;;  %v793_v8 = vld [vmem:[#allocation13 + $0x1a8] sm:$0xff] }
 0x181   : > { %1128 = vmatpush.msrb.mxu2 %v767_v20  ;;  %1148 = vmatpush.msrb.mxu3 %v895_v21  ;;  %v936_v7 = vld [vmem:[#allocation13 + $0x620] sm:$0xff]  ;;  %v921_v9 = vld [vmem:[#allocation13 + $0x5a8] sm:$0xff] }
 0x182   : > { %1087 = vmatpush.msrb.mxu0 %v774_v22  ;;  %1107 = vmatpush.msrb.mxu1 %v902_v23  ;;  %v800_v10 = vld [vmem:[#allocation13 + $0x1e0] sm:$0xff]  ;;  %v785_v12 = vld [vmem:[#allocation13 + $0x168] sm:$0xff] }
 0x183   : > { %1129 = vmatpush.msrb.mxu2 %v759_v24  ;;  %1149 = vmatpush.msrb.mxu3 %v887_v25  ;;  %v928_v11 = vld [vmem:[#allocation13 + $0x5e0] sm:$0xff]  ;;  %v913_v14 = vld [vmem:[#allocation13 + $0x568] sm:$0xff] }
 0x184   : > { %1088 = vmatpush.msrb.mxu0 %v766_v28  ;;  %1108 = vmatpush.msrb.mxu1 %v894_v17  ;;  %v792_v15 = vld [vmem:[#allocation13 + $0x1a0] sm:$0xff]  ;;  %v777_v20 = vld [vmem:[#allocation13 + $0x128] sm:$0xff] }
 0x185   : > { %1130 = vmatpush.msrb.mxu2 %v751_v18  ;;  %1150 = vmatpush.msrb.mxu3 %v879_v29  ;;  %v920_v19 = vld [vmem:[#allocation13 + $0x5a0] sm:$0xff]  ;;  %v905_v21 = vld [vmem:[#allocation13 + $0x528] sm:$0xff] }
 0x186   : > { %1089 = vmatpush.msrb.mxu0 %v758_v30  ;;  %1109 = vmatpush.msrb.mxu1 %v886_v31  ;;  %v784_v22 = vld [vmem:[#allocation13 + $0x160] sm:$0xff]  ;;  %v769_v24 = vld [vmem:[#allocation13 + $0xe8] sm:$0xff] }
 0x187   : > { %1131 = vmatpush.msrb.mxu2 %v743_v26  ;;  %1151 = vmatpush.msrb.mxu3 %v871_v32  ;;  %v912_v23 = vld [vmem:[#allocation13 + $0x560] sm:$0xff]  ;;  %v897_v25 = vld [vmem:[#allocation13 + $0x4e8] sm:$0xff] }
 0x188   : > { %1090 = vmatpush.msrb.mxu0 %v750_v27  ;;  %1110 = vmatpush.msrb.mxu1 %v878_v33  ;;  %v776_v28 = vld [vmem:[#allocation13 + $0x120] sm:$0xff]  ;;  %v761_v18 = vld [vmem:[#allocation13 + $0xa8] sm:$0xff] }
 0x189   : > { %1132 = vmatmul.f32.vlgmr.msrb.gmra.mxu2 %v4073_v2  ;;  %1152 = vmatmul.f32.vlgmr.msrb.gmra.mxu3 %v4075_v3  ;;  %v904_v17 = vld [vmem:[#allocation13 + $0x520] sm:$0xff]  ;;  %v889_v29 = vld [vmem:[#allocation13 + $0x4a8] sm:$0xff] }
 0x18a   : > { %1196 = vmatpush.msra.mxu2 %v865_v13  ;;  %1216 = vmatpush.msra.mxu3 %v993_v34  ;;  %v768_v30 = vld [vmem:[#allocation13 + $0xe0] sm:$0xff]  ;;  %v753_v26 = vld [vmem:[#allocation13 + $0x68] sm:$0xff] }
 0x18b   : > { %1091 = vmatpush.msrb.mxu0 %v742_v16  ;;  %1111 = vmatpush.msrb.mxu1 %v870_v35  ;;  %v896_v31 = vld [vmem:[#allocation13 + $0x4e0] sm:$0xff]  ;;  %v881_v32 = vld [vmem:[#allocation13 + $0x468] sm:$0xff] }
 0x18c   : > { %1197 = vmatpush.msra.mxu2 %v857_v62  ;;  %1217 = vmatpush.msra.mxu3 %v985_v36  ;;  %v760_v27 = vld [vmem:[#allocation13 + $0xa0] sm:$0xff]  ;;  %v745_v13 = vld [vmem:[#allocation13 + $0x28] sm:$0xff]  ;;  %v867_v62 = vld [vmem:[#allocation13 + $0x3f8] sm:$0xff] }
 0x18d   : > { %1156 = vmatpush.msra.mxu0 %v864_v37  ;;  %1176 = vmatpush.msra.mxu1 %v992_v38  ;;  %v888_v33 = vld [vmem:[#allocation13 + $0x4a0] sm:$0xff]  ;;  %v873_v34 = vld [vmem:[#allocation13 + $0x428] sm:$0xff]  ;;  %v995_v36 = vld [vmem:[#allocation13 + $0x7f8] sm:$0xff] }
 0x18e   : > { %1198 = vmatpush.msra.mxu2 %v849_v39  ;;  %1218 = vmatpush.msra.mxu3 %v977_v40  ;;  %v752_v16 = vld [vmem:[#allocation13 + $0x60] sm:$0xff]  ;;  %v859_v39 = vld [vmem:[#allocation13 + $0x3b8] sm:$0xff] }
 0x18f   : > { %1157 = vmatpush.msra.mxu0 %v856_v41  ;;  %1177 = vmatpush.msra.mxu1 %v984_v42  ;;  %v880_v35 = vld [vmem:[#allocation13 + $0x460] sm:$0xff]  ;;  %v987_v40 = vld [vmem:[#allocation13 + $0x7b8] sm:$0xff]  ;;  %v866_v41 = vld [vmem:[#allocation13 + $0x3f0] sm:$0xff] }
 0x190   : > { %1199 = vmatpush.msra.mxu2 %v841_v43  ;;  %1219 = vmatpush.msra.mxu3 %v969_v44  ;;  %v744_v37 = vld [vmem:[#allocation13 + $0x20] sm:$0xff]  ;;  %v994_v42 = vld [vmem:[#allocation13 + $0x7f0] sm:$0xff]  ;;  %v851_v43 = vld [vmem:[#allocation13 + $0x378] sm:$0xff] }
 0x191   : > { %1158 = vmatpush.msra.mxu0 %v848_v45  ;;  %1178 = vmatpush.msra.mxu1 %v976_v46  ;;  %v872_v38 = vld [vmem:[#allocation13 + $0x420] sm:$0xff]  ;;  %v979_v44 = vld [vmem:[#allocation13 + $0x778] sm:$0xff]  ;;  %v858_v45 = vld [vmem:[#allocation13 + $0x3b0] sm:$0xff] }
 0x192   : > { %1200 = vmatpush.msra.mxu2 %v833_v47  ;;  %1220 = vmatpush.msra.mxu3 %v961_v48  ;;  %v986_v46 = vld [vmem:[#allocation13 + $0x7b0] sm:$0xff]  ;;  %v843_v47 = vld [vmem:[#allocation13 + $0x338] sm:$0xff] }
 0x193   : > { %1159 = vmatpush.msra.mxu0 %v840_v49  ;;  %1179 = vmatpush.msra.mxu1 %v968_v50  ;;  %v971_v48 = vld [vmem:[#allocation13 + $0x738] sm:$0xff]  ;;  %v850_v49 = vld [vmem:[#allocation13 + $0x370] sm:$0xff] }
 0x194   : > { %1201 = vmatpush.msra.mxu2 %v825_v51  ;;  %1221 = vmatpush.msra.mxu3 %v953_v52  ;;  %v978_v50 = vld [vmem:[#allocation13 + $0x770] sm:$0xff]  ;;  %v835_v51 = vld [vmem:[#allocation13 + $0x2f8] sm:$0xff] }
 0x195   : > { %1160 = vmatpush.msra.mxu0 %v832_v53  ;;  %1180 = vmatpush.msra.mxu1 %v960_v54  ;;  %v963_v52 = vld [vmem:[#allocation13 + $0x6f8] sm:$0xff]  ;;  %v842_v53 = vld [vmem:[#allocation13 + $0x330] sm:$0xff] }
 0x196   : > { %1202 = vmatpush.msra.mxu2 %v817_v55  ;;  %1222 = vmatpush.msra.mxu3 %v945_v56  ;;  %v970_v54 = vld [vmem:[#allocation13 + $0x730] sm:$0xff]  ;;  %v827_v55 = vld [vmem:[#allocation13 + $0x2b8] sm:$0xff] }
 0x197   : > { %1161 = vmatpush.msra.mxu0 %v824_v57  ;;  %1181 = vmatpush.msra.mxu1 %v952_v58  ;;  %v955_v56 = vld [vmem:[#allocation13 + $0x6b8] sm:$0xff]  ;;  %v834_v57 = vld [vmem:[#allocation13 + $0x2f0] sm:$0xff] }
 0x198   : > { %1092 = vmatmul.f32.vlgmr.msrb.gmra.mxu0 %v4073_v2  ;;  %1112 = vmatmul.f32.vlgmr.msrb.gmra.mxu1 %v4075_v3  ;;  %v962_v58 = vld [vmem:[#allocation13 + $0x6f0] sm:$0xff] }
 0x199   : > { %1203 = vmatpush.msra.mxu2 %v809_v59  ;;  %1223 = vmatpush.msra.mxu3 %v937_v60  ;;  %v819_v59 = vld [vmem:[#allocation13 + $0x278] sm:$0xff] }
 0x19a   : > { %1162 = vmatpush.msra.mxu0 %v816_v61  ;;  %1182 = vmatpush.msra.mxu1 %v944_v63  ;;  %v947_v60 = vld [vmem:[#allocation13 + $0x678] sm:$0xff]  ;;  %v826_v61 = vld [vmem:[#allocation13 + $0x2b0] sm:$0xff] }
 0x19b   : > { %1204 = vmatpush.msra.mxu2 %v801_v4  ;;  %1224 = vmatpush.msra.mxu3 %v929_v5  ;;  %v954_v63 = vld [vmem:[#allocation13 + $0x6b0] sm:$0xff]  ;;  %v811_v4 = vld [vmem:[#allocation13 + $0x238] sm:$0xff] }
 0x19c   : > { %1163 = vmatpush.msra.mxu0 %v808_v6  ;;  %1183 = vmatpush.msra.mxu1 %v936_v7  ;;  %v939_v5 = vld [vmem:[#allocation13 + $0x638] sm:$0xff]  ;;  %v818_v6 = vld [vmem:[#allocation13 + $0x270] sm:$0xff] }
 0x19d   : > { %1205 = vmatpush.msra.mxu2 %v793_v8  ;;  %1225 = vmatpush.msra.mxu3 %v921_v9  ;;  %v946_v7 = vld [vmem:[#allocation13 + $0x670] sm:$0xff]  ;;  %v803_v8 = vld [vmem:[#allocation13 + $0x1f8] sm:$0xff] }
 0x19e   : > { %1164 = vmatpush.msra.mxu0 %v800_v10  ;;  %1184 = vmatpush.msra.mxu1 %v928_v11  ;;  %v931_v9 = vld [vmem:[#allocation13 + $0x5f8] sm:$0xff]  ;;  %v810_v10 = vld [vmem:[#allocation13 + $0x230] sm:$0xff] }
 0x19f   : > { %1206 = vmatpush.msra.mxu2 %v785_v12  ;;  %1226 = vmatpush.msra.mxu3 %v913_v14  ;;  %v938_v11 = vld [vmem:[#allocation13 + $0x630] sm:$0xff]  ;;  %v795_v12 = vld [vmem:[#allocation13 + $0x1b8] sm:$0xff] }
 0x1a0   : > { %1165 = vmatpush.msra.mxu0 %v792_v15  ;;  %1185 = vmatpush.msra.mxu1 %v920_v19  ;;  %v923_v14 = vld [vmem:[#allocation13 + $0x5b8] sm:$0xff]  ;;  %v802_v15 = vld [vmem:[#allocation13 + $0x1f0] sm:$0xff] }
 0x1a1   : > { %1207 = vmatpush.msra.mxu2 %v777_v20  ;;  %1227 = vmatpush.msra.mxu3 %v905_v21  ;;  %v930_v19 = vld [vmem:[#allocation13 + $0x5f0] sm:$0xff]  ;;  %v787_v20 = vld [vmem:[#allocation13 + $0x178] sm:$0xff] }
 0x1a2   : > { %1166 = vmatpush.msra.mxu0 %v784_v22  ;;  %1186 = vmatpush.msra.mxu1 %v912_v23  ;;  %v915_v21 = vld [vmem:[#allocation13 + $0x578] sm:$0xff]  ;;  %v794_v22 = vld [vmem:[#allocation13 + $0x1b0] sm:$0xff] }
 0x1a3   : > { %1208 = vmatpush.msra.mxu2 %v769_v24  ;;  %1228 = vmatpush.msra.mxu3 %v897_v25  ;;  %v922_v23 = vld [vmem:[#allocation13 + $0x5b0] sm:$0xff]  ;;  %v779_v24 = vld [vmem:[#allocation13 + $0x138] sm:$0xff] }
 0x1a4   : > { %1167 = vmatpush.msra.mxu0 %v776_v28  ;;  %1187 = vmatpush.msra.mxu1 %v904_v17  ;;  %v907_v25 = vld [vmem:[#allocation13 + $0x538] sm:$0xff]  ;;  %v786_v28 = vld [vmem:[#allocation13 + $0x170] sm:$0xff] }
 0x1a5   : > { %1209 = vmatpush.msra.mxu2 %v761_v18  ;;  %1229 = vmatpush.msra.mxu3 %v889_v29  ;;  %v914_v17 = vld [vmem:[#allocation13 + $0x570] sm:$0xff]  ;;  %v771_v18 = vld [vmem:[#allocation13 + $0xf8] sm:$0xff] }
 0x1a6   : > { %1168 = vmatpush.msra.mxu0 %v768_v30  ;;  %1188 = vmatpush.msra.mxu1 %v896_v31  ;;  %v899_v29 = vld [vmem:[#allocation13 + $0x4f8] sm:$0xff]  ;;  %v778_v30 = vld [vmem:[#allocation13 + $0x130] sm:$0xff] }
 0x1a7   : > { %1210 = vmatpush.msra.mxu2 %v753_v26  ;;  %1230 = vmatpush.msra.mxu3 %v881_v32  ;;  %v906_v31 = vld [vmem:[#allocation13 + $0x530] sm:$0xff]  ;;  %v763_v26 = vld [vmem:[#allocation13 + $0xb8] sm:$0xff] }
 0x1a8   : > { %1169 = vmatpush.msra.mxu0 %v760_v27  ;;  %1189 = vmatpush.msra.mxu1 %v888_v33  ;;  %v891_v32 = vld [vmem:[#allocation13 + $0x4b8] sm:$0xff]  ;;  %v770_v27 = vld [vmem:[#allocation13 + $0xf0] sm:$0xff] }
 0x1a9   : > { %1211 = vmatpush.msra.mxu2 %v745_v13  ;;  %1231 = vmatpush.msra.mxu3 %v873_v34  ;;  %v898_v33 = vld [vmem:[#allocation13 + $0x4f0] sm:$0xff]  ;;  %v755_v13 = vld [vmem:[#allocation13 + $0x78] sm:$0xff] }
 0x1aa   : > { %1170 = vmatpush.msra.mxu0 %v752_v16  ;;  %1190 = vmatpush.msra.mxu1 %v880_v35  ;;  %v883_v34 = vld [vmem:[#allocation13 + $0x478] sm:$0xff]  ;;  %v762_v16 = vld [vmem:[#allocation13 + $0xb0] sm:$0xff] }
 0x1ab   : > { %1276 = vmatpush.msrb.mxu2 %v867_v62  ;;  %1296 = vmatpush.msrb.mxu3 %v995_v36  ;;  %v890_v35 = vld [vmem:[#allocation13 + $0x4b0] sm:$0xff]  ;;  %v747_v62 = vld [vmem:[#allocation13 + $0x38] sm:$0xff] }
 0x1ac   : > { %1171 = vmatpush.msra.mxu0 %v744_v37  ;;  %1191 = vmatpush.msra.mxu1 %v872_v38  ;;  %v875_v36 = vld [vmem:[#allocation13 + $0x438] sm:$0xff]  ;;  %v754_v37 = vld [vmem:[#allocation13 + $0x70] sm:$0xff] }
 0x1ad   : > { %1277 = vmatpush.msrb.mxu2 %v859_v39  ;;  %1297 = vmatpush.msrb.mxu3 %v987_v40  ;;  %v882_v38 = vld [vmem:[#allocation13 + $0x470] sm:$0xff] }
 0x1ae   : > { %1236 = vmatpush.msrb.mxu0 %v866_v41  ;;  %1256 = vmatpush.msrb.mxu1 %v994_v42  ;;  %v746_v39 = vld [vmem:[#allocation13 + $0x30] sm:$0xff] }
 0x1af   : > { %1278 = vmatpush.msrb.mxu2 %v851_v43  ;;  %1298 = vmatpush.msrb.mxu3 %v979_v44  ;;  %v874_v40 = vld [vmem:[#allocation13 + $0x430] sm:$0xff] }
 0x1b0   : > { %1237 = vmatpush.msrb.mxu0 %v858_v45  ;;  %1257 = vmatpush.msrb.mxu1 %v986_v46  ;;  %v1320_v43 = vld [vmem:[%s4094_s1 + $0x8] sm:$0xff]  ;;  %v1319_v46 = vld [vmem:[%s4094_s1] sm:$0xff] }
 0x1b1   : > { %1279 = vmatpush.msrb.mxu2 %v843_v47  ;;  %1299 = vmatpush.msrb.mxu3 %v971_v48 }
 0x1b2   : > { %1212 = vmatmul.f32.vlgmr.msra.gmra.mxu2 %v4073_v2  ;;  %1232 = vmatmul.f32.vlgmr.msra.gmra.mxu3 %v4075_v3 }
 0x1b3   : > { %1238 = vmatpush.msrb.mxu0 %v850_v49  ;;  %1258 = vmatpush.msrb.mxu1 %v978_v50 }
 0x1b4   : > { %1280 = vmatpush.msrb.mxu2 %v835_v51  ;;  %1300 = vmatpush.msrb.mxu3 %v963_v52 }
 0x1b5   : > { %1239 = vmatpush.msrb.mxu0 %v842_v53  ;;  %1259 = vmatpush.msrb.mxu1 %v970_v54 }
 0x1b6   : > { %1281 = vmatpush.msrb.mxu2 %v827_v55  ;;  %1301 = vmatpush.msrb.mxu3 %v955_v56 }
 0x1b7   : > { %1240 = vmatpush.msrb.mxu0 %v834_v57  ;;  %1260 = vmatpush.msrb.mxu1 %v962_v58  ;;  %v1322_v58 = vld [vmem:[%s4094_s1 + $0x18] sm:$0xff] }
 0x1b8   : > { %1282 = vmatpush.msrb.mxu2 %v819_v59  ;;  %1302 = vmatpush.msrb.mxu3 %v947_v60 }
 0x1b9   : > { %1172 = vmatmul.f32.vlgmr.msra.gmra.mxu0 %v4073_v2  ;;  %1192 = vmatmul.f32.vlgmr.msra.gmra.mxu1 %v4075_v3 }
 0x1ba   : > { %1241 = vmatpush.msrb.mxu0 %v826_v61  ;;  %1261 = vmatpush.msrb.mxu1 %v954_v63 }
 0x1bb   : > { %1283 = vmatpush.msrb.mxu2 %v811_v4  ;;  %1303 = vmatpush.msrb.mxu3 %v939_v5 }
 0x1bc   : > { %1242 = vmatpush.msrb.mxu0 %v818_v6  ;;  %1262 = vmatpush.msrb.mxu1 %v946_v7  ;;  %v728_v6 = vstv %s3805_s6  ;;  %s726_s6 = sadd.s32 1, %s3805_s6  }
 0x1bd   : > { %1284 = vmatpush.msrb.mxu2 %v803_v8  ;;  %1304 = vmatpush.msrb.mxu3 %v931_v9  ;;  %vm4102_vm4 = vcmp.lt.s32.totalorder %v728_v6, %v3926_v1  ;;  %p723_p0 = scmp.ge.s32.totalorder %s726_s6, 8  }
 0x1be   : > { %1243 = vmatpush.msrb.mxu0 %v810_v10  ;;  %1263 = vmatpush.msrb.mxu1 %v938_v11  ;;  %2504 = vst [vmem:[#allocation6 + $0x8] sm:$0xff] (%p723_p0), %v3824_v0  ;;  %s4375_s19 = smov (%p723_p0), 0  }
 0x1bf   : > { %1285 = vmatpush.msrb.mxu2 %v795_v12  ;;  %1305 = vmatpush.msrb.mxu3 %v923_v14  ;;  %v1321_v12 = vld [vmem:[%s4094_s1 + $0x10] sm:$0xff]  ;;  %2505 = vst [vmem:[#allocation6] sm:$0xff] (%p723_p0), %v3824_v0 }
 0x1c0   : > { %1244 = vmatpush.msrb.mxu0 %v802_v15  ;;  %1264 = vmatpush.msrb.mxu1 %v930_v19 }
 0x1c1   : > { %1286 = vmatpush.msrb.mxu2 %v787_v20  ;;  %1306 = vmatpush.msrb.mxu3 %v915_v21 }
 0x1c2   : > { %1245 = vmatpush.msrb.mxu0 %v794_v22  ;;  %1265 = vmatpush.msrb.mxu1 %v922_v23  ;;  %v1332_v23 = vld [vmem:[%s4122_s7 + $0x30] sm:$0xff] }
 0x1c3   : > { %1287 = vmatpush.msrb.mxu2 %v779_v24  ;;  %1307 = vmatpush.msrb.mxu3 %v907_v25 }
 0x1c4   : > { %1246 = vmatpush.msrb.mxu0 %v786_v28  ;;  %1266 = vmatpush.msrb.mxu1 %v914_v17 }
 0x1c5   : > { %1288 = vmatpush.msrb.mxu2 %v771_v18  ;;  %1308 = vmatpush.msrb.mxu3 %v899_v29 }
 0x1c6   : > { %1247 = vmatpush.msrb.mxu0 %v778_v30  ;;  %1267 = vmatpush.msrb.mxu1 %v906_v31 }
 0x1c7   : > { %1289 = vmatpush.msrb.mxu2 %v763_v26  ;;  %1309 = vmatpush.msrb.mxu3 %v891_v32 }
 0x1c8   : > { %1248 = vmatpush.msrb.mxu0 %v770_v27  ;;  %1268 = vmatpush.msrb.mxu1 %v898_v33  ;;  %v3825_v27 = vmov 0.0  }
 0x1c9   : > { %1290 = vmatpush.msrb.mxu2 %v755_v13  ;;  %1310 = vmatpush.msrb.mxu3 %v883_v34  ;;  %v3397_v33 = vsel %vm4102_vm4, 1.0, %v3825_v27  ;;  %v738_v13 = vld [vmem:[#allocation5 + $0x8] sm:$0xff] }
 0x1ca   : > { %1249 = vmatpush.msrb.mxu0 %v762_v16  ;;  %1269 = vmatpush.msrb.mxu1 %v890_v35 }
 0x1cb   : > { %1291 = vmatpush.msrb.mxu2 %v747_v62  ;;  %1311 = vmatpush.msrb.mxu3 %v875_v36  ;;  %v1474_v36 = vsub.f32 1.0, %v3397_v33 }
 0x1cc   : > { %1250 = vmatpush.msrb.mxu0 %v754_v37  ;;  %1270 = vmatpush.msrb.mxu1 %v882_v38 }
 0x1cd   : > { %1292 = vmatmul.f32.vlgmr.msrb.gmra.mxu2 %v4073_v2  ;;  %1312 = vmatmul.f32.vlgmr.msrb.gmra.mxu3 %v4075_v3 }
 0x1ce   : > { %1251 = vmatpush.msrb.mxu0 %v746_v39  ;;  %1271 = vmatpush.msrb.mxu1 %v874_v40 }
 0x1cf   : > { %1252 = vmatmul.f32.vlgmr.msrb.gmra.mxu0 %v4073_v2  ;;  %1272 = vmatmul.f32.vlgmr.msrb.gmra.mxu1 %v4075_v3 }
 0x1fb   : > { %v1073_v42 = vpop.f32.mrf.mxu3 }
 0x1fc   : > { %v1053_v41 = vpop.f32.mrf.mxu2 }
 0x1fd   : > { %v1013_v44 = vpop.f32.mrf.mxu0  ;;  %v1033_v45 = vpop.f32.mrf.mxu1  ;;  %v1074_v47 = vadd.f32 %v1073_v42, %v1053_v41  ;;  %v1483_v42 = vmul.f32 %v1474_v36, %v738_v13 }
 0x1fe   : > { %v1034_v48 = vadd.f32 %v1033_v45, %v1013_v44 }
 0x1ff   : > { %v1324_v49 = vadd.f32 %v1320_v43, %v1074_v47 }
 0x200   : > { %v1323_v50 = vadd.f32 %v1319_v46, %v1034_v48 }
 0x201   : > { %v3404_v51 = vmul.f32 -1.442695, %v1324_v49 }
 0x202   : > { %v3403_v52 = vmul.f32 -1.442695, %v1323_v50 }
 0x203   : > { %3464 = vpow2.f32 %v3404_v51 }
 0x204   : > { %3466 = vpow2.f32 %v3403_v52 }
 0x209   : > { %v3465_v3 = vpop.eup %3464 }
 0x20a   : > { %v3467_v53 = vpop.eup %3466  ;;  %v1360_v54 = vadd.f32 1.0, %v3465_v3 }
 0x20b   : > { %v1341_v55 = vadd.f32 1.0, %v3467_v53 }
 0x20c   : > { %3468 = vrcp.f32 %v1360_v54  ;;  %v1133_v56 = vpop.f32.mrf.mxu2  ;;  %v1153_v57 = vpop.f32.mrf.mxu3  ;;  %vm1366_vm0 = vweird.f32 %v1360_v54  ;;  %v1372_v9 = vand.u32 2147483648, %v1360_v54  ;;  %v1370_v14 = vand.u32 2147483647, %v1360_v54 }
 0x20d   : > { %3470 = vrcp.f32 %v1341_v55  ;;  %v1154_v59 = vadd.f32 %v1153_v57, %v1133_v56  ;;  %v1353_v20 = vand.u32 2147483648, %v1341_v55  ;;  %vm1347_vm2 = vweird.f32 %v1341_v55 }
 0x20e   : > { %v1351_v22 = vand.u32 2147483647, %v1341_v55  ;;  %v1373_v18 = vor.u32 1.1754944e-38, %v1372_v9  ;;  %vm1371_vm6 = vcmp.eq.f32.partialorder %v1370_v14, 8.507059e+37 }
 0x20f   : > { %v1326_v60 = vadd.f32 %v1322_v58, %v1154_v59  ;;  %v1354_v26 = vor.u32 1.1754944e-38, %v1353_v20  ;;  %v1331_v59 = vld [vmem:[%s4122_s7 + $0x28] sm:$0xff] }
 0x210   : > { %vm1352_vm8 = vcmp.eq.f32.partialorder %v1351_v22, 8.507059e+37 }
 0x211   : > { %v3405_v61 = vmul.f32 -1.442695, %v1326_v60 }
 0x212   : > { %v3469_v63 = vpop.eup %3468 }
 0x213   : > { %v3471_v4 = vpop.eup %3470  ;;  %v1362_v5 = vmul.f32 %v3469_v63, %v1360_v54  ;;  %3472 = vpow2.f32 %v3405_v61  ;;  %vm1367_vm1 = vweird.f32 %v3469_v63  ;;  %v1475_v54 = vmul.f32 %v1474_v36, %v4073_v2 }
 0x214   : > { %v1343_v7 = vmul.f32 %v3471_v4, %v1341_v55  ;;  %vm1348_vm3 = vweird.f32 %v3471_v4  ;;  %vm4107_vm5 = vmor %vm1366_vm0, %vm1367_vm1 }
 0x215   : > { %v1363_v8 = vsub.f32 1.0, %v1362_v5  ;;  %v1093_v10 = vpop.f32.mrf.mxu0  ;;  %v1113_v11 = vpop.f32.mrf.mxu1  ;;  %vm1349_vm7 = vmor %vm1347_vm2, %vm1348_vm3 }
 0x216   : > { %v1344_v15 = vsub.f32 1.0, %v1343_v7  ;;  %v1114_v19 = vadd.f32 %v1113_v11, %v1093_v10 }
 0x217   : > { %v1364_v21 = vmul.f32 %v3469_v63, %v1363_v8 }
 0x218   : > { %v1325_v25 = vadd.f32 %v1321_v12, %v1114_v19  ;;  %v1345_v28 = vmul.f32 %v3471_v4, %v1344_v15  ;;  %v732_v19 = vstv %s4118_s14 }
 0x219   : > { %v3473_v17 = vpop.eup %3472  ;;  %v1365_v29 = vadd.f32 %v3469_v63, %v1364_v21  ;;  %vm733_vm1 = vcmp.lt.s32.totalorder %v732_v19, %v3926_v1  ;;  %v1747_v19 = vld [vmem:[#allocation16 + $0x788] sm:$0xff] (%p723_p0) }
 0x21a   : > { %v1380_v30 = vadd.f32 1.0, %v3473_v17  ;;  %v1346_v31 = vadd.f32 %v3471_v4, %v1345_v28  ;;  %3474 = vtanh.f32 %v1325_v25 }
 0x21b   : > { %v1369_v32 = vsel %vm4107_vm5, %v3469_v63, %v1365_v29  ;;  %v1330_v63 = vld [vmem:[%s4122_s7 + $0x20] sm:$0xff] }
 0x21c   : > { %3476 = vrcp.f32 %v1380_v30  ;;  %v1350_v34 = vsel %vm1349_vm7, %v3471_v4, %v1346_v31  ;;  %v1374_v16 = vsel %vm1371_vm6, %v1373_v18, %v1369_v32  ;;  %vm1386_vm9 = vweird.f32 %v1380_v30 }
 0x21d   : > { %v1355_v35 = vsel %vm1352_vm8, %v1354_v26, %v1350_v34  ;;  %v1396_v62 = vmul.f32 %v1374_v16, %v738_v13  ;;  %v1392_v43 = vand.u32 2147483648, %v1380_v30  ;;  %v1390_v45 = vand.u32 2147483647, %v1380_v30  ;;  %v1333_v34 = vld [vmem:[%s4122_s7 + $0x38] sm:$0xff]  ;;  %v1586_v16 = vld [vmem:[#allocation16 + $0x280] sm:$0xff] (%p723_p0) }
 0x21f   : > { %v1393_v49 = vor.u32 1.1754944e-38, %v1392_v43  ;;  %vm1391_vm12 = vcmp.eq.f32.partialorder %v1390_v45, 8.507059e+37 }
 0x220   : > { %v3475_v37 = vpop.eup %3474 }
 0x221   : > { %v1397_v38 = vmul.f32 %v3475_v37, %v1355_v35 }
 0x222   : > { %v3477_v39 = vpop.eup %3476 }
 0x223   : > { %v1382_v40 = vmul.f32 %v3477_v39, %v1380_v30  ;;  %v1398_v41 = vadd.f32 %v1397_v38, %v1396_v62  ;;  %vm1387_vm10 = vweird.f32 %v3477_v39 }
 0x224   : > { %vm1388_vm11 = vmor %vm1386_vm9, %vm1387_vm10 }
 0x225   : > { %v1383_v44 = vsub.f32 1.0, %v1382_v40  ;;  %v1482_v46 = vmul.f32 %v3397_v33, %v1398_v41  ;;  %3478 = vtanh.f32 %v1398_v41  ;;  %v739_v40 = vld [vmem:[#allocation5] sm:$0xff] }
 0x227   : > { %v1384_v47 = vmul.f32 %v3477_v39, %v1383_v44  ;;  %v1484_v48 = vadd.f32 %v1483_v42, %v1482_v46 }
 0x229   : > { %v1385_v50 = vadd.f32 %v3477_v39, %v1384_v47  ;;  %1485 = vst [vmem:[#allocation5 + $0x8] sm:$0xff] %v1484_v48 }
 0x22a   :  { %2502 = vst [vmem:[#allocation5 + $0x8] sm:$0xff] (%p723_p0), %v3824_v0 }
 0x22b   : > { %v1389_v51 = vsel %vm1388_vm11, %v3477_v39, %v1385_v50  ;;  %v3479_v52 = vpop.eup %3478  ;;  %v3398_v39 = vsel %vm733_vm1, 1.0, %v3825_v27 }
 0x22c   : > { %v1394_v3 = vsel %vm1391_vm12, %v1393_v49, %v1389_v51  ;;  %v1478_v47 = vsub.f32 1.0, %v3398_v39 }
 0x22d   : > { %v1400_v53 = vmul.f32 %v3479_v52, %v1394_v3 }
 0x22e   : > { %v1487_v3 = vmul.f32 %v1478_v47, %v739_v40 }
 0x22f   : > { %v1464_v55 = vmul.f32 %v3397_v33, %v1400_v53 }
 0x231   : > { %1468 = vst [vmem:[%s1467_s16] sm:$0xff] %v1464_v55  ;;  %v1476_v56 = vadd.f32 %v1475_v54, %v1464_v55 }
 0x233   : > { %1477 = vst [vmem:[#allocation4] sm:$0xff] %v1476_v56 }
 0x234   :  { %2500 = vst [vmem:[#allocation4] sm:$0xff] (%p723_p0), %v3824_v0 }
 0x235   : > { %v1213_v57 = vpop.f32.mrf.mxu2  ;;  %v1233_v58 = vpop.f32.mrf.mxu3 }
 0x236   : > { %v1173_v60 = vpop.f32.mrf.mxu0  ;;  %v1193_v61 = vpop.f32.mrf.mxu1  ;;  %v1234_v4 = vadd.f32 %v1233_v58, %v1213_v57 }
 0x237   : > { %v1194_v5 = vadd.f32 %v1193_v61, %v1173_v60 }
 0x238   : > { %v1335_v2 = vadd.f32 %v1331_v59, %v1234_v4 }
 0x239   : > { %v1334_v6 = vadd.f32 %v1330_v63, %v1194_v5 }
 0x23a   : > { %v3407_v7 = vmul.f32 -1.442695, %v1335_v2 }
 0x23b   : > { %v3406_v8 = vmul.f32 -1.442695, %v1334_v6 }
 0x23c   : > { %3480 = vpow2.f32 %v3407_v7  ;;  %v3496_v7 = vld [vmem:[#allocation4 + $0x8] sm:$0xff] }
 0x23d   : > { %3482 = vpow2.f32 %v3406_v8  ;;  %v1479_v8 = vmul.f32 %v3496_v7, %v1478_v47  ;;  %v1683_v47 = vld [vmem:[#allocation16 + $0x588] sm:$0xff] (%p723_p0)  ;;  %v1650_v7 = vld [vmem:[#allocation16 + $0x480] sm:$0xff] (%p723_p0) }
 0x242   : > { %v3481_v9 = vpop.eup %3480 }
 0x243   : > { %v3483_v10 = vpop.eup %3482  ;;  %v1423_v11 = vadd.f32 1.0, %v3481_v9 }
 0x244   : > { %v1404_v12 = vadd.f32 1.0, %v3483_v10 }
 0x245   : > { %3484 = vrcp.f32 %v1423_v11  ;;  %vm1429_vm13 = vweird.f32 %v1423_v11  ;;  %v1435_v25 = vand.u32 2147483648, %v1423_v11  ;;  %v1433_v17 = vand.u32 2147483647, %v1423_v11 }
 0x246   : > { %3486 = vrcp.f32 %v1404_v12  ;;  %vm1410_vm15 = vweird.f32 %v1404_v12  ;;  %v1416_v29 = vand.u32 2147483648, %v1404_v12  ;;  %v1414_v26 = vand.u32 2147483647, %v1404_v12 }
 0x247   : > { %v1436_v35 = vor.u32 1.1754944e-38, %v1435_v25  ;;  %vm1434_vm4 = vcmp.eq.f32.partialorder %v1433_v17, 8.507059e+37  ;;  %v1754_v25 = vld [vmem:[#allocation16 + $0x7c0] sm:$0xff] (%p723_p0) }
 0x248   : > { %v1417_v37 = vor.u32 1.1754944e-38, %v1416_v29  ;;  %vm1415_vm5 = vcmp.eq.f32.partialorder %v1414_v26, 8.507059e+37  ;;  %1821 = vmatpush.msra.mxu1 (%p723_p0), %v1754_v25  ;;  %v1610_v17 = vld [vmem:[#allocation16 + $0x340] sm:$0xff] (%p723_p0)  ;;  %v1723_v26 = vld [vmem:[#allocation16 + $0x6c8] sm:$0xff] (%p723_p0)  ;;  %v1620_v25 = vld [vmem:[#allocation16 + $0x390] sm:$0xff] (%p723_p0) }
 0x249   :  { %v1602_v29 = vld [vmem:[#allocation16 + $0x300] sm:$0xff] (%p723_p0) }
 0x24b   : > { %v3485_v14 = vpop.eup %3484 }
 0x24c   : > { %v3487_v15 = vpop.eup %3486  ;;  %v1425_v20 = vmul.f32 %v3485_v14, %v1423_v11  ;;  %v1253_v21 = vpop.f32.mrf.mxu0  ;;  %vm1430_vm14 = vweird.f32 %v3485_v14 }
 0x24d   : > { %v1273_v22 = vpop.f32.mrf.mxu1  ;;  %v1406_v24 = vmul.f32 %v3487_v15, %v1404_v12  ;;  %vm1411_vm0 = vweird.f32 %v3487_v15  ;;  %vm4131_vm2 = vmor %vm1429_vm13, %vm1430_vm14  ;;  %v1627_v12 = vld [vmem:[#allocation16 + $0x3c8] sm:$0xff] (%p723_p0) }
 0x24e   : > { %v1274_v28 = vadd.f32 %v1273_v22, %v1253_v21  ;;  %v1426_v18 = vsub.f32 1.0, %v1425_v20  ;;  %vm1412_vm3 = vmor %vm1410_vm15, %vm1411_vm0  ;;  %1862 = vmatpush.msra.mxu2 (%p723_p0), %v1627_v12  ;;  %v1626_v20 = vld [vmem:[#allocation16 + $0x3c0] sm:$0xff] (%p723_p0)  ;;  %v1611_v21 = vld [vmem:[#allocation16 + $0x348] sm:$0xff] (%p723_p0) }
 0x24f   : > { %v1407_v30 = vsub.f32 1.0, %v1406_v24  ;;  %1780 = vmatpush.msra.mxu0 (%p723_p0), %v1626_v20  ;;  %v1739_v22 = vld [vmem:[#allocation16 + $0x748] sm:$0xff] (%p723_p0)  ;;  %v1629_v12 = vld [vmem:[#allocation16 + $0x3d8] sm:$0xff] (%p723_p0) }
 0x250   : > { %v1336_v31 = vadd.f32 %v1332_v23, %v1274_v28  ;;  %v1427_v32 = vmul.f32 %v3485_v14, %v1426_v18  ;;  %v1293_v33 = vpop.f32.mrf.mxu2  ;;  %v1313_v13 = vpop.f32.mrf.mxu3  ;;  %v1618_v23 = vld [vmem:[#allocation16 + $0x380] sm:$0xff] (%p723_p0)  ;;  %v1603_v24 = vld [vmem:[#allocation16 + $0x308] sm:$0xff] (%p723_p0)  ;;  %v1621_v20 = vld [vmem:[#allocation16 + $0x398] sm:$0xff] (%p723_p0) }
 0x251   : > { %v1408_v62 = vmul.f32 %v3487_v15, %v1407_v30  ;;  %v1314_v36 = vadd.f32 %v1313_v13, %v1293_v33  ;;  %1781 = vmatpush.msra.mxu0 (%p723_p0), %v1618_v23  ;;  %v1731_v28 = vld [vmem:[#allocation16 + $0x708] sm:$0xff] (%p723_p0)  ;;  %v1746_v18 = vld [vmem:[#allocation16 + $0x780] sm:$0xff] (%p723_p0) }
 0x252   : > { %3488 = vtanh.f32 %v1336_v31  ;;  %v1428_v38 = vadd.f32 %v3485_v14, %v1427_v32  ;;  %v1738_v30 = vld [vmem:[#allocation16 + $0x740] sm:$0xff] (%p723_p0)  ;;  %v1595_v31 = vld [vmem:[#allocation16 + $0x2c8] sm:$0xff] (%p723_p0)  ;;  %1822 = vmatpush.msra.mxu1 (%p723_p0), %v1746_v18 }
 0x253   : > { %v1409_v41 = vadd.f32 %v3487_v15, %v1408_v62  ;;  %v1337_v42 = vadd.f32 %v1333_v34, %v1314_v36  ;;  %1782 = vmatpush.msra.mxu0 (%p723_p0), %v1610_v17  ;;  %v1594_v32 = vld [vmem:[#allocation16 + $0x2c0] sm:$0xff] (%p723_p0)  ;;  %v1587_v13 = vld [vmem:[#allocation16 + $0x288] sm:$0xff] (%p723_p0)  ;;  %v1741_v17 = vld [vmem:[#allocation16 + $0x758] sm:$0xff] (%p723_p0) }
 0x254   : > { %v1432_v43 = vsel %vm4131_vm2, %v3485_v14, %v1428_v38  ;;  %v1619_v14 = vld [vmem:[#allocation16 + $0x388] sm:$0xff] (%p723_p0)  ;;  %v1730_v33 = vld [vmem:[#allocation16 + $0x700] sm:$0xff] (%p723_p0)  ;;  %1823 = vmatpush.msra.mxu1 (%p723_p0), %v1738_v30  ;;  %v1748_v30 = vld [vmem:[#allocation16 + $0x790] sm:$0xff] (%p723_p0) }
 0x255   : > { %v1413_v44 = vsel %vm1412_vm3, %v3487_v15, %v1409_v41  ;;  %v1437_v45 = vsel %vm1434_vm4, %v1436_v35, %v1432_v43  ;;  %v3408_v46 = vmul.f32 -1.442695, %v1337_v42  ;;  %v1755_v15 = vld [vmem:[#allocation16 + $0x7c8] sm:$0xff] (%p723_p0)  ;;  %1863 = vmatpush.msra.mxu2 (%p723_p0), %v1619_v14  ;;  %1783 = vmatpush.msra.mxu0 (%p723_p0), %v1602_v29  ;;  %v1722_v35 = vld [vmem:[#allocation16 + $0x6c0] sm:$0xff] (%p723_p0)  ;;  %v1757_v14 = vld [vmem:[#allocation16 + $0x7d8] sm:$0xff] (%p723_p0) }
 0x256   : > { %v1418_v48 = vsel %vm1415_vm5, %v1417_v37, %v1413_v44  ;;  %v1459_v49 = vmul.f32 %v1437_v45, %v739_v40  ;;  %1903 = vmatpush.msra.mxu3 (%p723_p0), %v1755_v15  ;;  %v1715_v34 = vld [vmem:[#allocation16 + $0x688] sm:$0xff] (%p723_p0)  ;;  %1824 = vmatpush.msra.mxu1 (%p723_p0), %v1730_v33  ;;  %v1578_v36 = vld [vmem:[#allocation16 + $0x240] sm:$0xff] (%p723_p0)  ;;  %v1740_v33 = vld [vmem:[#allocation16 + $0x750] sm:$0xff] (%p723_p0) }
 0x257   : > { %3490 = vpow2.f32 %v3408_v46  ;;  %1864 = vmatpush.msra.mxu2 (%p723_p0), %v1611_v21  ;;  %v1579_v62 = vld [vmem:[#allocation16 + $0x248] sm:$0xff] (%p723_p0)  ;;  %1784 = vmatpush.msra.mxu0 (%p723_p0), %v1594_v32  ;;  %v1714_v37 = vld [vmem:[#allocation16 + $0x680] sm:$0xff] (%p723_p0)  ;;  %v1628_v21 = vld [vmem:[#allocation16 + $0x3d0] sm:$0xff] (%p723_p0) }
 0x258   : > { %v3489_v50 = vpop.eup %3488  ;;  %1904 = vmatpush.msra.mxu3 (%p723_p0), %v1747_v19  ;;  %v1571_v38 = vld [vmem:[#allocation16 + $0x208] sm:$0xff] (%p723_p0)  ;;  %1825 = vmatpush.msra.mxu1 (%p723_p0), %v1722_v35  ;;  %v1570_v40 = vld [vmem:[#allocation16 + $0x200] sm:$0xff] (%p723_p0)  ;;  %v1733_v32 = vld [vmem:[#allocation16 + $0x718] sm:$0xff] (%p723_p0) }
 0x259   : > { %v1460_v51 = vmul.f32 %v3489_v50, %v1418_v48  ;;  %1865 = vmatpush.msra.mxu2 (%p723_p0), %v1603_v24  ;;  %1785 = vmatpush.msra.mxu0 (%p723_p0), %v1586_v16  ;;  %v1706_v41 = vld [vmem:[#allocation16 + $0x640] sm:$0xff] (%p723_p0)  ;;  %v1563_v42 = vld [vmem:[#allocation16 + $0x1c8] sm:$0xff] (%p723_p0)  ;;  %v1613_v24 = vld [vmem:[#allocation16 + $0x358] sm:$0xff] (%p723_p0) }
 0x25a   :  { %1905 = vmatpush.msra.mxu3 (%p723_p0), %v1739_v22  ;;  %1826 = vmatpush.msra.mxu1 (%p723_p0), %v1714_v37  ;;  %v1691_v43 = vld [vmem:[#allocation16 + $0x5c8] sm:$0xff] (%p723_p0)  ;;  %v1562_v44 = vld [vmem:[#allocation16 + $0x1c0] sm:$0xff] (%p723_p0)  ;;  %v1749_v22 = vld [vmem:[#allocation16 + $0x798] sm:$0xff] (%p723_p0) }
 0x25b   : > { %v1461_v52 = vadd.f32 %v1460_v51, %v1459_v49  ;;  %1866 = vmatpush.msra.mxu2 (%p723_p0), %v1595_v31  ;;  %1786 = vmatpush.msra.mxu0 (%p723_p0), %v1578_v36  ;;  %v1698_v45 = vld [vmem:[#allocation16 + $0x600] sm:$0xff] (%p723_p0)  ;;  %v1555_v46 = vld [vmem:[#allocation16 + $0x188] sm:$0xff] (%p723_p0)  ;;  %v1605_v31 = vld [vmem:[#allocation16 + $0x318] sm:$0xff] (%p723_p0) }
 0x25c   :  { %1906 = vmatpush.msra.mxu3 (%p723_p0), %v1731_v28  ;;  %1827 = vmatpush.msra.mxu1 (%p723_p0), %v1706_v41  ;;  %v1554_v48 = vld [vmem:[#allocation16 + $0x180] sm:$0xff] (%p723_p0)  ;;  %v1547_v50 = vld [vmem:[#allocation16 + $0x148] sm:$0xff] (%p723_p0)  ;;  %v1756_v28 = vld [vmem:[#allocation16 + $0x7d0] sm:$0xff] (%p723_p0) }
 0x25d   : > { %v1486_v53 = vmul.f32 %v3398_v39, %v1461_v52  ;;  %v3491_v27 = vpop.eup %3490  ;;  %1867 = vmatpush.msra.mxu2 (%p723_p0), %v1587_v13  ;;  %1787 = vmatpush.msra.mxu0 (%p723_p0), %v1570_v40  ;;  %v1690_v49 = vld [vmem:[#allocation16 + $0x5c0] sm:$0xff] (%p723_p0)  ;;  %v1675_v51 = vld [vmem:[#allocation16 + $0x548] sm:$0xff] (%p723_p0)  ;;  %v1597_v13 = vld [vmem:[#allocation16 + $0x2d8] sm:$0xff] (%p723_p0) }
 0x25e   : > { %v1443_v55 = vadd.f32 1.0, %v3491_v27  ;;  %1907 = vmatpush.msra.mxu3 (%p723_p0), %v1723_v26  ;;  %1828 = vmatpush.msra.mxu1 (%p723_p0), %v1698_v45  ;;  %v1667_v27 = vld [vmem:[#allocation16 + $0x508] sm:$0xff] (%p723_p0)  ;;  %v1506_v15 = vld [vmem:[#allocation16] sm:$0xff] (%p723_p0)  ;;  %v1612_v26 = vld [vmem:[#allocation16 + $0x350] sm:$0xff] (%p723_p0) }
 0x25f   : > { %v1488_v54 = vadd.f32 %v1487_v3, %v1486_v53  ;;  %1868 = vmatpush.msra.mxu2 (%p723_p0), %v1579_v62  ;;  %1788 = vmatpush.msra.mxu0 (%p723_p0), %v1562_v44  ;;  %v1682_v3 = vld [vmem:[#allocation16 + $0x580] sm:$0xff] (%p723_p0)  ;;  %v1539_v53 = vld [vmem:[#allocation16 + $0x108] sm:$0xff] (%p723_p0)  ;;  %v1725_v16 = vld [vmem:[#allocation16 + $0x6d8] sm:$0xff] (%p723_p0) }
 0x260   : > { %3492 = vrcp.f32 %v1443_v55  ;;  %v1455_v59 = vand.u32 2147483648, %v1443_v55  ;;  %v1453_v61 = vand.u32 2147483647, %v1443_v55  ;;  %vm1449_vm7 = vweird.f32 %v1443_v55  ;;  %1908 = vmatpush.msra.mxu3 (%p723_p0), %v1715_v34  ;;  %1829 = vmatpush.msra.mxu1 (%p723_p0), %v1690_v49  ;;  %v1642_v19 = vld [vmem:[#allocation16 + $0x440] sm:$0xff] (%p723_p0)  ;;  %v1604_v34 = vld [vmem:[#allocation16 + $0x310] sm:$0xff] (%p723_p0)  ;;  %v1589_v62 = vld [vmem:[#allocation16 + $0x298] sm:$0xff] (%p723_p0) }
 0x261   : > { %1489 = vst [vmem:[#allocation5] sm:$0xff] %v1488_v54  ;;  %3494 = vtanh.f32 %v1461_v52  ;;  %1869 = vmatpush.msra.mxu2 (%p723_p0), %v1571_v38  ;;  %v1546_v52 = vld [vmem:[#allocation16 + $0x140] sm:$0xff] (%p723_p0)  ;;  %1789 = vmatpush.msra.mxu0 (%p723_p0), %v1554_v48  ;;  %v1732_v35 = vld [vmem:[#allocation16 + $0x710] sm:$0xff] (%p723_p0)  ;;  %v1717_v36 = vld [vmem:[#allocation16 + $0x698] sm:$0xff] (%p723_p0) }
 0x262   : > { %v1456_v4 = vor.u32 1.1754944e-38, %v1455_v59  ;;  %vm1454_vm9 = vcmp.eq.f32.partialorder %v1453_v61, 8.507059e+37  ;;  %2503 = vst [vmem:[#allocation5] sm:$0xff] (%p723_p0), %v3824_v0  ;;  %v1538_v54 = vld [vmem:[#allocation16 + $0x100] sm:$0xff] (%p723_p0)  ;;  %1830 = vmatpush.msra.mxu1 (%p723_p0), %v1682_v3  ;;  %v1651_v61 = vld [vmem:[#allocation16 + $0x488] sm:$0xff] (%p723_p0)  ;;  %v1581_v40 = vld [vmem:[#allocation16 + $0x258] sm:$0xff] (%p723_p0) }
 0x263   :  { %1870 = vmatpush.msra.mxu2 (%p723_p0), %v1563_v42  ;;  %1790 = vmatpush.msra.mxu0 (%p723_p0), %v1546_v52  ;;  %v1666_v59 = vld [vmem:[#allocation16 + $0x500] sm:$0xff] (%p723_p0)  ;;  %v1588_v41 = vld [vmem:[#allocation16 + $0x290] sm:$0xff] (%p723_p0)  ;;  %v1709_v42 = vld [vmem:[#allocation16 + $0x658] sm:$0xff] (%p723_p0) }
 0x264   :  { %v1634_v23 = vld [vmem:[#allocation16 + $0x400] sm:$0xff] (%p723_p0)  ;;  %v1573_v44 = vld [vmem:[#allocation16 + $0x218] sm:$0xff] (%p723_p0)  ;;  %v1580_v45 = vld [vmem:[#allocation16 + $0x250] sm:$0xff] (%p723_p0) }
 0x265   :  { %1871 = vmatpush.msra.mxu2 (%p723_p0), %v1555_v46  ;;  %1791 = vmatpush.msra.mxu0 (%p723_p0), %v1538_v54  ;;  %v1701_v46 = vld [vmem:[#allocation16 + $0x618] sm:$0xff] (%p723_p0)  ;;  %v1572_v49 = vld [vmem:[#allocation16 + $0x210] sm:$0xff] (%p723_p0) }
 0x266   : > { %v3493_v56 = vpop.eup %3492  ;;  %v1565_v48 = vld [vmem:[#allocation16 + $0x1d8] sm:$0xff] (%p723_p0)  ;;  %v1700_v3 = vld [vmem:[#allocation16 + $0x610] sm:$0xff] (%p723_p0) }
 0x267   : > { %v1445_v57 = vmul.f32 %v3493_v56, %v1443_v55  ;;  %vm1450_vm6 = vweird.f32 %v3493_v56  ;;  %v3495_v2 = vpop.eup %3494  ;;  %1872 = vmatpush.msra.mxu2 (%p723_p0), %v1547_v50  ;;  %v1674_v55 = vld [vmem:[#allocation16 + $0x540] sm:$0xff] (%p723_p0)  ;;  %v1693_v50 = vld [vmem:[#allocation16 + $0x5d8] sm:$0xff] (%p723_p0) }
 0x268   : > { %vm1451_vm8 = vmor %vm1449_vm7, %vm1450_vm6  ;;  %1831 = vmatpush.msra.mxu1 (%p723_p0), %v1674_v55  ;;  %v1685_v54 = vld [vmem:[#allocation16 + $0x598] sm:$0xff] (%p723_p0)  ;;  %v1692_v55 = vld [vmem:[#allocation16 + $0x5d0] sm:$0xff] (%p723_p0) }
 0x269   : > { %v1446_v58 = vsub.f32 1.0, %v1445_v57  ;;  %v1659_v57 = vld [vmem:[#allocation16 + $0x4c8] sm:$0xff] (%p723_p0)  ;;  %1873 = vmatpush.msra.mxu2 (%p723_p0), %v1539_v53  ;;  %v1557_v53 = vld [vmem:[#allocation16 + $0x198] sm:$0xff] (%p723_p0) }
 0x26a   :  { %1832 = vmatpush.msra.mxu1 (%p723_p0), %v1666_v59  ;;  %v1684_v59 = vld [vmem:[#allocation16 + $0x590] sm:$0xff] (%p723_p0) }
 0x26b   : > { %v1447_v60 = vmul.f32 %v3493_v56, %v1446_v58  ;;  %v1530_v58 = vld [vmem:[#allocation16 + $0xc0] sm:$0xff] (%p723_p0) }
 0x26c   :  { %1792 = vmatpush.msra.mxu0 (%p723_p0), %v1530_v58  ;;  %v1677_v58 = vld [vmem:[#allocation16 + $0x558] sm:$0xff] (%p723_p0) }
 0x26d   : > { %v1448_v63 = vadd.f32 %v3493_v56, %v1447_v60  ;;  %v1523_v60 = vld [vmem:[#allocation16 + $0x88] sm:$0xff] (%p723_p0) }
 0x26f   : > { %v1452_v5 = vsel %vm1451_vm8, %v3493_v56, %v1448_v63  ;;  %v1531_v56 = vld [vmem:[#allocation16 + $0xc8] sm:$0xff] (%p723_p0)  ;;  %v1522_v63 = vld [vmem:[#allocation16 + $0x80] sm:$0xff] (%p723_p0) }
 0x270   : > { %v1457_v6 = vsel %vm1454_vm9, %v1456_v4, %v1452_v5  ;;  %1874 = vmatpush.msra.mxu2 (%p723_p0), %v1531_v56  ;;  %v1658_v4 = vld [vmem:[#allocation16 + $0x4c0] sm:$0xff] (%p723_p0)  ;;  %v1515_v5 = vld [vmem:[#allocation16 + $0x48] sm:$0xff] (%p723_p0)  ;;  %1793 = vmatpush.msra.mxu0 (%p723_p0), %v1522_v63  ;;  %v1549_v56 = vld [vmem:[#allocation16 + $0x158] sm:$0xff] (%p723_p0) }
 0x271   : > { %v1463_v9 = vmul.f32 %v3495_v2, %v1457_v6  ;;  %v1643_v2 = vld [vmem:[#allocation16 + $0x448] sm:$0xff] (%p723_p0)  ;;  %v1514_v6 = vld [vmem:[#allocation16 + $0x40] sm:$0xff] (%p723_p0)  ;;  %1833 = vmatpush.msra.mxu1 (%p723_p0), %v1658_v4  ;;  %v1669_v63 = vld [vmem:[#allocation16 + $0x518] sm:$0xff] (%p723_p0) }
 0x272   :  { %1875 = vmatpush.msra.mxu2 (%p723_p0), %v1523_v60  ;;  %1794 = vmatpush.msra.mxu0 (%p723_p0), %v1514_v6  ;;  %v1541_v60 = vld [vmem:[#allocation16 + $0x118] sm:$0xff] (%p723_p0) }
 0x273   : > { %v1469_v10 = vmul.f32 %v3398_v39, %v1463_v9  ;;  %725 = sbr.rel (!%p723_p0) target bundleno = 327 (0x147), region = 116  ;;  %v1699_v39 = vld [vmem:[#allocation16 + $0x608] sm:$0xff] (%p723_p0)  ;;  %1834 = vmatpush.msra.mxu1 (%p723_p0), %v1650_v7  ;;  %v1533_v6 = vld [vmem:[#allocation16 + $0xd8] sm:$0xff] (%p723_p0)  ;;  %v1540_v7 = vld [vmem:[#allocation16 + $0x110] sm:$0xff] (%p723_p0) }
 0x274   :  { %v1635_v9 = vld [vmem:[#allocation16 + $0x408] sm:$0xff] (%p723_p0)  ;;  %1876 = vmatpush.msra.mxu2 (%p723_p0), %v1515_v5  ;;  %1795 = vmatpush.msra.mxu0 (%p723_p0), %v1506_v15  ;;  %v1653_v15 = vld [vmem:[#allocation16 + $0x498] sm:$0xff] (%p723_p0) }
 0x275   : > { %1473 = vst [vmem:[%s1472_s18 + $0x8] sm:$0xff] %v1469_v10  ;;  %v1480_v11 = vadd.f32 %v1479_v8, %v1469_v10  ;;  %v1507_v8 = vld [vmem:[#allocation16 + $0x8] sm:$0xff] (%p723_p0)  ;;  %1835 = vmatpush.msra.mxu1 (%p723_p0), %v1642_v19  ;;  %v1660_v19 = vld [vmem:[#allocation16 + $0x4d0] sm:$0xff] (%p723_p0) }
 0x276   :  { %1877 = vmatpush.msra.mxu2 (%p723_p0), %v1507_v8  ;;  %1944 = vmatpush.msrb.mxu0 (%p723_p0), %v1628_v21  ;;  %v1661_v8 = vld [vmem:[#allocation16 + $0x4d8] sm:$0xff] (%p723_p0)  ;;  %v1524_v21 = vld [vmem:[#allocation16 + $0x90] sm:$0xff] (%p723_p0) }
 0x277   : > { %1481 = vst [vmem:[#allocation4 + $0x8] sm:$0xff] %v1480_v11  ;;  %1836 = vmatpush.msra.mxu1 (%p723_p0), %v1634_v23 }
 0x278   :  { %2501 = vst [vmem:[#allocation4 + $0x8] sm:$0xff] %v3824_v0  ;;  %v1707_v0 = vld [vmem:[#allocation16 + $0x648] sm:$0xff]  ;;  %2026 = vmatpush.msrb.mxu2 %v1629_v12  ;;  %1945 = vmatpush.msrb.mxu0 %v1620_v25  ;;  %v1525_v12 = vld [vmem:[#allocation16 + $0x98] sm:$0xff]  ;;  %v1652_v25 = vld [vmem:[#allocation16 + $0x490] sm:$0xff] }
 0x279   :  { %1909 = vmatpush.msra.mxu3 %v1707_v0  ;;  %1985 = vmatpush.msrb.mxu1 %v1756_v28  ;;  %v1596_v0 = vld [vmem:[#allocation16 + $0x2d0] sm:$0xff]  ;;  %v1509_v28 = vld [vmem:[#allocation16 + $0x18] sm:$0xff] }
 0x27a   :  { %2027 = vmatpush.msrb.mxu2 %v1621_v20  ;;  %1946 = vmatpush.msrb.mxu0 %v1612_v26  ;;  %v1517_v20 = vld [vmem:[#allocation16 + $0x58] sm:$0xff]  ;;  %v1631_v26 = vld [vmem:[#allocation16 + $0x3e8] sm:$0xff] }
 0x27b   :  { %1910 = vmatpush.msra.mxu3 %v1699_v39  ;;  %1986 = vmatpush.msrb.mxu1 %v1748_v30  ;;  %v1724_v39 = vld [vmem:[#allocation16 + $0x6d0] sm:$0xff]  ;;  %v1637_v30 = vld [vmem:[#allocation16 + $0x418] sm:$0xff] }
 0x27c   :  { %v4149_v10 = vld [vmem:[#allocation3] sm:$0xff]  ;;  %v4151_v11 = vld [vmem:[#allocation3 + $0x8] sm:$0xff]  ;;  %v4156_v18 = vld [vmem:[#allocation3 + $0x10] sm:$0xff]  ;;  %2028 = vmatpush.msrb.mxu2 %v1613_v24  ;;  %1947 = vmatpush.msrb.mxu0 %v1604_v34 }
 0x27d   :  { %1911 = vmatpush.msra.mxu3 %v1691_v43  ;;  %1878 = vmatmul.f32.vlgmr.msra.gmra.mxu2 %v4149_v10  ;;  %v4158_v29 = vld [vmem:[#allocation3 + $0x18] sm:$0xff]  ;;  %v4164_v37 = vld [vmem:[#allocation3 + $0x20] sm:$0xff]  ;;  %v4166_v38 = vld [vmem:[#allocation3 + $0x28] sm:$0xff] }
 0x27e   :  { %1796 = vmatmul.f32.vlgmr.msra.gmra.mxu0 %v4149_v10  ;;  %1837 = vmatmul.f32.vlgmr.msra.gmra.mxu1 %v4151_v11  ;;  %v1716_v43 = vld [vmem:[#allocation16 + $0x690] sm:$0xff]  ;;  %v4174_v52 = vld [vmem:[#allocation3 + $0x38] sm:$0xff]  ;;  %v4180_v4 = vld [vmem:[#allocation3 + $0x40] sm:$0xff] }
 0x27f   :  { %1912 = vmatpush.msra.mxu3 %v1683_v47  ;;  %2029 = vmatpush.msrb.mxu2 %v1605_v31  ;;  %v1708_v47 = vld [vmem:[#allocation16 + $0x650] sm:$0xff]  ;;  %v4182_v5 = vld [vmem:[#allocation3 + $0x48] sm:$0xff]  ;;  %v4190_v24 = vld [vmem:[#allocation3 + $0x58] sm:$0xff] }
 0x280   :  { %1987 = vmatpush.msrb.mxu1 %v1740_v33  ;;  %1948 = vmatpush.msrb.mxu0 %v1596_v0  ;;  %v4188_v23 = vld [vmem:[#allocation3 + $0x50] sm:$0xff]  ;;  %v1759_v33 = vld [vmem:[#allocation16 + $0x7e8] sm:$0xff] }
 0x281   :  { %1913 = vmatpush.msra.mxu3 %v1675_v51  ;;  %2030 = vmatpush.msrb.mxu2 %v1597_v13  ;;  %v4172_v51 = vld [vmem:[#allocation3 + $0x30] sm:$0xff]  ;;  %v1623_v34 = vld [vmem:[#allocation16 + $0x3a8] sm:$0xff] }
 0x282   :  { %1988 = vmatpush.msrb.mxu1 %v1732_v35  ;;  %1949 = vmatpush.msrb.mxu0 %v1588_v41  ;;  %v1644_v31 = vld [vmem:[#allocation16 + $0x450] sm:$0xff]  ;;  %v1751_v35 = vld [vmem:[#allocation16 + $0x7a8] sm:$0xff] }
 0x283   :  { %1914 = vmatpush.msra.mxu3 %v1667_v27  ;;  %2031 = vmatpush.msrb.mxu2 %v1589_v62  ;;  %v1564_v27 = vld [vmem:[#allocation16 + $0x1d0] sm:$0xff]  ;;  %v4196_v62 = vld [vmem:[#allocation3 + $0x60] sm:$0xff]  ;;  %v4198_v0 = vld [vmem:[#allocation3 + $0x68] sm:$0xff] }
 0x284   :  { %1989 = vmatpush.msrb.mxu1 %v1724_v39  ;;  %1950 = vmatpush.msrb.mxu0 %v1580_v45  ;;  %v1636_v13 = vld [vmem:[#allocation16 + $0x410] sm:$0xff]  ;;  %v1615_v39 = vld [vmem:[#allocation16 + $0x368] sm:$0xff] }
 0x285   :  { %1915 = vmatpush.msra.mxu3 %v1659_v57  ;;  %1881 = vmatmul.f32.gmra.mxu2 %v4156_v18  ;;  %v1556_v57 = vld [vmem:[#allocation16 + $0x190] sm:$0xff]  ;;  %v1743_v41 = vld [vmem:[#allocation16 + $0x768] sm:$0xff] }
 0x286   :  { %1799 = vmatmul.f32.gmra.mxu0 %v4156_v18  ;;  %1840 = vmatmul.f32.gmra.mxu1 %v4158_v29  ;;  %v1735_v45 = vld [vmem:[#allocation16 + $0x728] sm:$0xff] }
 0x287   :  { %1916 = vmatpush.msra.mxu3 %v1651_v61  ;;  %2032 = vmatpush.msrb.mxu2 %v1581_v40  ;;  %v1548_v61 = vld [vmem:[#allocation16 + $0x150] sm:$0xff]  ;;  %v1622_v40 = vld [vmem:[#allocation16 + $0x3a0] sm:$0xff] }
 0x288   :  { %1990 = vmatpush.msrb.mxu1 %v1716_v43  ;;  %1951 = vmatpush.msrb.mxu0 %v1572_v49  ;;  %v1607_v43 = vld [vmem:[#allocation16 + $0x328] sm:$0xff] }
 0x289   :  { %1917 = vmatpush.msra.mxu3 %v1643_v2  ;;  %2033 = vmatpush.msrb.mxu2 %v1573_v44  ;;  %v1676_v2 = vld [vmem:[#allocation16 + $0x550] sm:$0xff]  ;;  %v1614_v44 = vld [vmem:[#allocation16 + $0x360] sm:$0xff]  ;;  %v1727_v49 = vld [vmem:[#allocation16 + $0x6e8] sm:$0xff] }
 0x28a   :  { %1991 = vmatpush.msrb.mxu1 %v1708_v47  ;;  %1952 = vmatpush.msrb.mxu0 %v1564_v27  ;;  %v1599_v47 = vld [vmem:[#allocation16 + $0x2e8] sm:$0xff] }
 0x28b   :  { %1918 = vmatpush.msra.mxu3 %v1635_v9  ;;  %2034 = vmatpush.msrb.mxu2 %v1565_v48  ;;  %v1668_v9 = vld [vmem:[#allocation16 + $0x510] sm:$0xff]  ;;  %v1606_v48 = vld [vmem:[#allocation16 + $0x320] sm:$0xff]  ;;  %v1591_v27 = vld [vmem:[#allocation16 + $0x2a8] sm:$0xff] }
 0x28c   :  { %1919 = vmatmul.f32.vlgmr.msra.gmra.mxu3 %v4151_v11  ;;  %1992 = vmatpush.msrb.mxu1 %v1700_v3  ;;  %v4206_v3 = vld [vmem:[#allocation3 + $0x78] sm:$0xff] }
 0x28d   :  { %2067 = vmatpush.msrb.mxu3 %v1757_v14  ;;  %1884 = vmatmul.f32.gmra.mxu2 %v4164_v37  ;;  %v1532_v14 = vld [vmem:[#allocation16 + $0xd0] sm:$0xff] }
 0x28e   :  { %1802 = vmatmul.f32.gmra.mxu0 %v4164_v37  ;;  %1843 = vmatmul.f32.gmra.mxu1 %v4166_v38 }
 0x28f   :  { %2068 = vmatpush.msrb.mxu3 %v1749_v22  ;;  %2035 = vmatpush.msrb.mxu2 %v1557_v53  ;;  %v1645_v22 = vld [vmem:[#allocation16 + $0x458] sm:$0xff]  ;;  %v1734_v53 = vld [vmem:[#allocation16 + $0x720] sm:$0xff] }
 0x290   :  { %1993 = vmatpush.msrb.mxu1 %v1692_v55  ;;  %1953 = vmatpush.msrb.mxu0 %v1556_v57  ;;  %v1719_v55 = vld [vmem:[#allocation16 + $0x6a8] sm:$0xff] }
 0x291   :  { %2069 = vmatpush.msrb.mxu3 %v1741_v17  ;;  %2036 = vmatpush.msrb.mxu2 %v1549_v56  ;;  %v1516_v17 = vld [vmem:[#allocation16 + $0x50] sm:$0xff]  ;;  %v1726_v56 = vld [vmem:[#allocation16 + $0x6e0] sm:$0xff]  ;;  %v1583_v57 = vld [vmem:[#allocation16 + $0x268] sm:$0xff] }
 0x292   :  { %1994 = vmatpush.msrb.mxu1 %v1684_v59  ;;  %1954 = vmatpush.msrb.mxu0 %v1548_v61  ;;  %v1711_v59 = vld [vmem:[#allocation16 + $0x668] sm:$0xff] }
 0x293   :  { %2070 = vmatpush.msrb.mxu3 %v1733_v32  ;;  %2037 = vmatpush.msrb.mxu2 %v1541_v60  ;;  %v1508_v32 = vld [vmem:[#allocation16 + $0x10] sm:$0xff]  ;;  %v1718_v60 = vld [vmem:[#allocation16 + $0x6a0] sm:$0xff]  ;;  %v1575_v61 = vld [vmem:[#allocation16 + $0x228] sm:$0xff] }
 0x294   :  { %1922 = vmatmul.f32.gmra.mxu3 %v4158_v29  ;;  %1995 = vmatpush.msrb.mxu1 %v1676_v2  ;;  %v1703_v2 = vld [vmem:[#allocation16 + $0x628] sm:$0xff] }
 0x295   :  { %2071 = vmatpush.msrb.mxu3 %v1725_v16  ;;  %1887 = vmatmul.f32.gmra.mxu2 %v4172_v51  ;;  %v1630_v16 = vld [vmem:[#allocation16 + $0x3e0] sm:$0xff] }
 0x296   :  { %1805 = vmatmul.f32.gmra.mxu0 %v4172_v51  ;;  %1846 = vmatmul.f32.gmra.mxu1 %v4174_v52 }
 0x297   :  { %2072 = vmatpush.msrb.mxu3 %v1717_v36  ;;  %2038 = vmatpush.msrb.mxu2 %v1533_v6  ;;  %v1758_v36 = vld [vmem:[#allocation16 + $0x7e0] sm:$0xff] }
 0x298   :  { %1955 = vmatpush.msrb.mxu0 %v1540_v7  ;;  %1996 = vmatpush.msrb.mxu1 %v1668_v9  ;;  %v1710_v6 = vld [vmem:[#allocation16 + $0x660] sm:$0xff]  ;;  %v1567_v7 = vld [vmem:[#allocation16 + $0x1e8] sm:$0xff] }
 0x299   :  { %2073 = vmatpush.msrb.mxu3 %v1709_v42  ;;  %2039 = vmatpush.msrb.mxu2 %v1525_v12  ;;  %v1750_v42 = vld [vmem:[#allocation16 + $0x7a0] sm:$0xff]  ;;  %v1695_v9 = vld [vmem:[#allocation16 + $0x5e8] sm:$0xff] }
 0x29a   :  { %1956 = vmatpush.msrb.mxu0 %v1532_v14  ;;  %1997 = vmatpush.msrb.mxu1 %v1660_v19  ;;  %v1702_v12 = vld [vmem:[#allocation16 + $0x620] sm:$0xff]  ;;  %v1559_v14 = vld [vmem:[#allocation16 + $0x1a8] sm:$0xff] }
 0x29b   :  { %2074 = vmatpush.msrb.mxu3 %v1701_v46  ;;  %2040 = vmatpush.msrb.mxu2 %v1517_v20  ;;  %v1742_v46 = vld [vmem:[#allocation16 + $0x760] sm:$0xff]  ;;  %v1687_v19 = vld [vmem:[#allocation16 + $0x5a8] sm:$0xff] }
 0x29c   :  { %1925 = vmatmul.f32.gmra.mxu3 %v4166_v38  ;;  %1957 = vmatpush.msrb.mxu0 %v1524_v21  ;;  %v1694_v20 = vld [vmem:[#allocation16 + $0x5e0] sm:$0xff]  ;;  %v1551_v21 = vld [vmem:[#allocation16 + $0x168] sm:$0xff] }
 0x29d   :  { %2075 = vmatpush.msrb.mxu3 %v1693_v50  ;;  %1890 = vmatmul.f32.gmra.mxu2 %v4180_v4  ;;  %v4204_v50 = vld [vmem:[#allocation3 + $0x70] sm:$0xff] }
 0x29e   :  { %1808 = vmatmul.f32.gmra.mxu0 %v4180_v4  ;;  %1849 = vmatmul.f32.gmra.mxu1 %v4182_v5 }
 0x29f   :  { %2076 = vmatpush.msrb.mxu3 %v1685_v54  ;;  %1998 = vmatpush.msrb.mxu1 %v1652_v25  ;;  %v1598_v54 = vld [vmem:[#allocation16 + $0x2e0] sm:$0xff]  ;;  %v1679_v25 = vld [vmem:[#allocation16 + $0x568] sm:$0xff] }
 0x2a0   :  { %2041 = vmatpush.msrb.mxu2 %v1509_v28  ;;  %1958 = vmatpush.msrb.mxu0 %v1516_v17  ;;  %v1686_v28 = vld [vmem:[#allocation16 + $0x5a0] sm:$0xff]  ;;  %v1543_v17 = vld [vmem:[#allocation16 + $0x128] sm:$0xff] }
 0x2a1   :  { %2077 = vmatpush.msrb.mxu3 %v1677_v58  ;;  %1999 = vmatpush.msrb.mxu1 %v1644_v31  ;;  %v1590_v58 = vld [vmem:[#allocation16 + $0x2a0] sm:$0xff]  ;;  %v1671_v31 = vld [vmem:[#allocation16 + $0x528] sm:$0xff] }
 0x2a2   :  { %2190 = vmatpush.msra.mxu2 %v1631_v26  ;;  %1959 = vmatpush.msrb.mxu0 %v1508_v32  ;;  %v1678_v26 = vld [vmem:[#allocation16 + $0x560] sm:$0xff]  ;;  %v1535_v32 = vld [vmem:[#allocation16 + $0xe8] sm:$0xff] }
 0x2a3   :  { %2078 = vmatpush.msrb.mxu3 %v1669_v63  ;;  %2000 = vmatpush.msrb.mxu1 %v1636_v13  ;;  %v1582_v63 = vld [vmem:[#allocation16 + $0x260] sm:$0xff]  ;;  %v1663_v13 = vld [vmem:[#allocation16 + $0x4e8] sm:$0xff] }
 0x2a4   :  { %1928 = vmatmul.f32.gmra.mxu3 %v4174_v52  ;;  %2191 = vmatpush.msra.mxu2 %v1623_v34  ;;  %v1670_v34 = vld [vmem:[#allocation16 + $0x520] sm:$0xff] }
 0x2a5   :  { %2079 = vmatpush.msrb.mxu3 %v1661_v8  ;;  %1893 = vmatmul.f32.gmra.mxu2 %v4188_v23  ;;  %v1574_v8 = vld [vmem:[#allocation16 + $0x220] sm:$0xff] }
 0x2a6   :  { %1811 = vmatmul.f32.gmra.mxu0 %v4188_v23  ;;  %1852 = vmatmul.f32.gmra.mxu1 %v4190_v24 }
 0x2a7   :  { %2080 = vmatpush.msrb.mxu3 %v1653_v15  ;;  %2108 = vmatpush.msra.mxu0 %v1630_v16  ;;  %v1566_v15 = vld [vmem:[#allocation16 + $0x1e0] sm:$0xff]  ;;  %v1527_v16 = vld [vmem:[#allocation16 + $0xa8] sm:$0xff] }
 0x2a8   :  { %2149 = vmatpush.msra.mxu1 %v1758_v36  ;;  %2192 = vmatpush.msra.mxu2 %v1615_v39  ;;  %v1655_v36 = vld [vmem:[#allocation16 + $0x4a8] sm:$0xff]  ;;  %v1662_v39 = vld [vmem:[#allocation16 + $0x4e0] sm:$0xff] }
 0x2a9   :  { %2081 = vmatpush.msrb.mxu3 %v1645_v22  ;;  %2109 = vmatpush.msra.mxu0 %v1622_v40  ;;  %v1558_v22 = vld [vmem:[#allocation16 + $0x1a0] sm:$0xff]  ;;  %v1519_v40 = vld [vmem:[#allocation16 + $0x68] sm:$0xff] }
 0x2aa   :  { %2150 = vmatpush.msra.mxu1 %v1750_v42  ;;  %2193 = vmatpush.msra.mxu2 %v1607_v43  ;;  %v1647_v42 = vld [vmem:[#allocation16 + $0x468] sm:$0xff]  ;;  %v1654_v43 = vld [vmem:[#allocation16 + $0x4a0] sm:$0xff] }
 0x2ab   :  { %2082 = vmatpush.msrb.mxu3 %v1637_v30  ;;  %2110 = vmatpush.msra.mxu0 %v1614_v44  ;;  %v1550_v30 = vld [vmem:[#allocation16 + $0x160] sm:$0xff]  ;;  %v1511_v44 = vld [vmem:[#allocation16 + $0x28] sm:$0xff] }
 0x2ac   :  { %1931 = vmatmul.f32.gmra.mxu3 %v4182_v5  ;;  %2151 = vmatpush.msra.mxu1 %v1742_v46  ;;  %v1639_v46 = vld [vmem:[#allocation16 + $0x428] sm:$0xff] }
 0x2ad   :  { %2231 = vmatpush.msra.mxu3 %v1759_v33  ;;  %1896 = vmatmul.f32.gmra.mxu2 %v4196_v62  ;;  %v1542_v33 = vld [vmem:[#allocation16 + $0x120] sm:$0xff] }
 0x2ae   :  { %1814 = vmatmul.f32.gmra.mxu0 %v4196_v62  ;;  %1855 = vmatmul.f32.gmra.mxu1 %v4198_v0 }
 0x2af   :  { %2232 = vmatpush.msra.mxu3 %v1751_v35  ;;  %2194 = vmatpush.msra.mxu2 %v1599_v47  ;;  %v1534_v35 = vld [vmem:[#allocation16 + $0xe0] sm:$0xff] }
 0x2b0   :  { %2111 = vmatpush.msra.mxu0 %v1606_v48  ;;  %2152 = vmatpush.msra.mxu1 %v1734_v53  ;;  %v1646_v47 = vld [vmem:[#allocation16 + $0x460] sm:$0xff]  ;;  %v1633_v48 = vld [vmem:[#allocation16 + $0x3f8] sm:$0xff] }
 0x2b1   :  { %2233 = vmatpush.msra.mxu3 %v1743_v41  ;;  %2195 = vmatpush.msra.mxu2 %v1591_v27  ;;  %v1526_v41 = vld [vmem:[#allocation16 + $0xa0] sm:$0xff]  ;;  %v1761_v53 = vld [vmem:[#allocation16 + $0x7f8] sm:$0xff] }
 0x2b2   :  { %2112 = vmatpush.msra.mxu0 %v1598_v54  ;;  %2153 = vmatpush.msra.mxu1 %v1726_v56  ;;  %v1638_v27 = vld [vmem:[#allocation16 + $0x420] sm:$0xff]  ;;  %v1625_v54 = vld [vmem:[#allocation16 + $0x3b8] sm:$0xff] }
 0x2b3   :  { %2234 = vmatpush.msra.mxu3 %v1735_v45  ;;  %2196 = vmatpush.msra.mxu2 %v1583_v57  ;;  %v1518_v45 = vld [vmem:[#allocation16 + $0x60] sm:$0xff]  ;;  %v1753_v56 = vld [vmem:[#allocation16 + $0x7b8] sm:$0xff]  ;;  %v1760_v57 = vld [vmem:[#allocation16 + $0x7f0] sm:$0xff] }
 0x2b4   :  { %1934 = vmatmul.f32.gmra.mxu3 %v4190_v24  ;;  %2113 = vmatpush.msra.mxu0 %v1590_v58  ;;  %v1617_v58 = vld [vmem:[#allocation16 + $0x378] sm:$0xff] }
 0x2b5   :  { %2235 = vmatpush.msra.mxu3 %v1727_v49  ;;  %1899 = vmatmul.f32.gmra.mxu2 %v4204_v50  ;;  %v1510_v49 = vld [vmem:[#allocation16 + $0x20] sm:$0xff] }
 0x2b6   :  { %1817 = vmatmul.f32.gmra.mxu0 %v4204_v50  ;;  %2154 = vmatpush.msra.mxu1 %v1718_v60  ;;  %v1745_v60 = vld [vmem:[#allocation16 + $0x778] sm:$0xff] }
 0x2b7   :  { %2236 = vmatpush.msra.mxu3 %v1719_v55  ;;  %1858 = vmatmul.f32.gmra.mxu1 %v4206_v3  ;;  %v1632_v55 = vld [vmem:[#allocation16 + $0x3f0] sm:$0xff] }
 0x2b8   :  { %2197 = vmatpush.msra.mxu2 %v1575_v61  ;;  %2114 = vmatpush.msra.mxu0 %v1582_v63  ;;  %v1752_v61 = vld [vmem:[#allocation16 + $0x7b0] sm:$0xff]  ;;  %v1609_v63 = vld [vmem:[#allocation16 + $0x338] sm:$0xff] }
 0x2b9   :  { %2237 = vmatpush.msra.mxu3 %v1711_v59  ;;  %2155 = vmatpush.msra.mxu1 %v1710_v6  ;;  %v1624_v59 = vld [vmem:[#allocation16 + $0x3b0] sm:$0xff]  ;;  %v1737_v6 = vld [vmem:[#allocation16 + $0x738] sm:$0xff] }
 0x2ba   :  { %2198 = vmatpush.msra.mxu2 %v1567_v7  ;;  %2115 = vmatpush.msra.mxu0 %v1574_v8  ;;  %v1744_v7 = vld [vmem:[#allocation16 + $0x770] sm:$0xff]  ;;  %v1601_v8 = vld [vmem:[#allocation16 + $0x2f8] sm:$0xff] }
 0x2bb   :  { %2238 = vmatpush.msra.mxu3 %v1703_v2  ;;  %2156 = vmatpush.msra.mxu1 %v1702_v12  ;;  %v1616_v2 = vld [vmem:[#allocation16 + $0x370] sm:$0xff]  ;;  %v1729_v12 = vld [vmem:[#allocation16 + $0x6f8] sm:$0xff] }
 0x2bc   :  { %1937 = vmatmul.f32.gmra.mxu3 %v4198_v0  ;;  %2199 = vmatpush.msra.mxu2 %v1559_v14  ;;  %v1736_v14 = vld [vmem:[#allocation16 + $0x730] sm:$0xff] }
 0x2bd   :  { %2042 = vmatmul.f32.vlgmr.msrb.gmra.mxu2 %v4149_v10  ;;  %2239 = vmatpush.msra.mxu3 %v1695_v9  ;;  %v1608_v9 = vld [vmem:[#allocation16 + $0x330] sm:$0xff] }
 0x2be   :  { %1960 = vmatmul.f32.vlgmr.msrb.gmra.mxu0 %v4149_v10  ;;  %2157 = vmatpush.msra.mxu1 %v1694_v20  ;;  %v1721_v20 = vld [vmem:[#allocation16 + $0x6b8] sm:$0xff] }
 0x2bf   :  { %2116 = vmatpush.msra.mxu0 %v1566_v15  ;;  %2240 = vmatpush.msra.mxu3 %v1687_v19  ;;  %v1593_v15 = vld [vmem:[#allocation16 + $0x2b8] sm:$0xff]  ;;  %v1600_v19 = vld [vmem:[#allocation16 + $0x2f0] sm:$0xff] }
 0x2c0   :  { %2001 = vmatmul.f32.vlgmr.msrb.gmra.mxu1 %v4151_v11  ;;  %2200 = vmatpush.msra.mxu2 %v1551_v21  ;;  %v1728_v21 = vld [vmem:[#allocation16 + $0x6f0] sm:$0xff] }
 0x2c1   :  { %2117 = vmatpush.msra.mxu0 %v1558_v22  ;;  %2241 = vmatpush.msra.mxu3 %v1679_v25  ;;  %v1585_v22 = vld [vmem:[#allocation16 + $0x278] sm:$0xff]  ;;  %v1592_v25 = vld [vmem:[#allocation16 + $0x2b0] sm:$0xff] }
 0x2c2   :  { %2158 = vmatpush.msra.mxu1 %v1686_v28  ;;  %2201 = vmatpush.msra.mxu2 %v1543_v17  ;;  %v1713_v28 = vld [vmem:[#allocation16 + $0x678] sm:$0xff]  ;;  %v4243_v17 = vld [vmem:[#allocation19] sm:$0xff] }
 0x2c3   :  { %2118 = vmatpush.msra.mxu0 %v1550_v30  ;;  %2242 = vmatpush.msra.mxu3 %v1671_v31  ;;  %v1720_v30 = vld [vmem:[#allocation16 + $0x6b0] sm:$0xff]  ;;  %v1577_v31 = vld [vmem:[#allocation16 + $0x238] sm:$0xff] }
 0x2c4   :  { %1940 = vmatmul.f32.gmra.mxu3 %v4206_v3  ;;  %2159 = vmatpush.msra.mxu1 %v1678_v26  ;;  %v4247_v26 = vperm.slane %v4243_v17, 0 }
 0x2c5   :  { %2045 = vmatmul.f32.gmra.mxu2 %v4156_v18  ;;  %2119 = vmatpush.msra.mxu0 %v1542_v33  ;;  %v4253_v33 = vperm.slane %v4243_v17, 1 }
 0x2c6   :  { %1963 = vmatmul.f32.gmra.mxu0 %v4156_v18  ;;  %2202 = vmatpush.msra.mxu2 %v1535_v32 }
 0x2c7   :  { %2243 = vmatpush.msra.mxu3 %v1663_v13  ;;  %2160 = vmatpush.msra.mxu1 %v1670_v34  ;;  %v1584_v13 = vld [vmem:[#allocation16 + $0x270] sm:$0xff]  ;;  %v1705_v34 = vld [vmem:[#allocation16 + $0x638] sm:$0xff] }
 0x2c8   :  { %2004 = vmatmul.f32.gmra.mxu1 %v4158_v29  ;;  %2203 = vmatpush.msra.mxu2 %v1527_v16  ;;  %v1712_v16 = vld [vmem:[#allocation16 + $0x670] sm:$0xff] }
 0x2c9   :  { %2120 = vmatpush.msra.mxu0 %v1534_v35  ;;  %2244 = vmatpush.msra.mxu3 %v1655_v36  ;;  %v1569_v36 = vld [vmem:[#allocation16 + $0x1f8] sm:$0xff] }
 0x2ca   :  { %2161 = vmatpush.msra.mxu1 %v1662_v39  ;;  %2204 = vmatpush.msra.mxu2 %v1519_v40  ;;  %v1576_v39 = vld [vmem:[#allocation16 + $0x230] sm:$0xff]  ;;  %v1697_v40 = vld [vmem:[#allocation16 + $0x5f8] sm:$0xff] }
 0x2cb   :  { %2121 = vmatpush.msra.mxu0 %v1526_v41  ;;  %2245 = vmatpush.msra.mxu3 %v1647_v42 }
 0x2cc   :  { %2083 = vmatmul.f32.vlgmr.msrb.gmra.mxu3 %v4151_v11  ;;  %2162 = vmatpush.msra.mxu1 %v1654_v43 }
 0x2cd   :  { %2048 = vmatmul.f32.gmra.mxu2 %v4164_v37  ;;  %2122 = vmatpush.msra.mxu0 %v1518_v45 }
 0x2ce   :  { %1966 = vmatmul.f32.gmra.mxu0 %v4164_v37  ;;  %2205 = vmatpush.msra.mxu2 %v1511_v44 }
 0x2cf   :  { %2246 = vmatpush.msra.mxu3 %v1639_v46  ;;  %2163 = vmatpush.msra.mxu1 %v1646_v47  ;;  %v1704_v46 = vld [vmem:[#allocation16 + $0x630] sm:$0xff]  ;;  %v1561_v47 = vld [vmem:[#allocation16 + $0x1b8] sm:$0xff] }
 0x2d0   :  { %2007 = vmatmul.f32.gmra.mxu1 %v4166_v38  ;;  %2354 = vmatpush.msrb.mxu2 %v1633_v48 }
 0x2d1   :  { %2123 = vmatpush.msra.mxu0 %v1510_v49  ;;  %2395 = vmatpush.msrb.mxu3 %v1761_v53  ;;  %v1568_v49 = vld [vmem:[#allocation16 + $0x1f0] sm:$0xff]  ;;  %v1689_v53 = vld [vmem:[#allocation16 + $0x5b8] sm:$0xff] }
 0x2d2   :  { %2164 = vmatpush.msra.mxu1 %v1638_v27  ;;  %2355 = vmatpush.msrb.mxu2 %v1625_v54  ;;  %v1696_v27 = vld [vmem:[#allocation16 + $0x5f0] sm:$0xff] }
 0x2d3   :  { %2272 = vmatpush.msrb.mxu0 %v1632_v55  ;;  %2396 = vmatpush.msrb.mxu3 %v1753_v56  ;;  %v1553_v55 = vld [vmem:[#allocation16 + $0x178] sm:$0xff]  ;;  %v1560_v56 = vld [vmem:[#allocation16 + $0x1b0] sm:$0xff] }
 0x2d4   :  { %2086 = vmatmul.f32.gmra.mxu3 %v4158_v29  ;;  %2313 = vmatpush.msrb.mxu1 %v1760_v57  ;;  %v1681_v57 = vld [vmem:[#allocation16 + $0x578] sm:$0xff] }
 0x2d5   :  { %2051 = vmatmul.f32.gmra.mxu2 %v4172_v51  ;;  %2397 = vmatpush.msrb.mxu3 %v1745_v60 }
 0x2d6   :  { %1969 = vmatmul.f32.gmra.mxu0 %v4172_v51  ;;  %2356 = vmatpush.msrb.mxu2 %v1617_v58 }
 0x2d7   :  { %2273 = vmatpush.msrb.mxu0 %v1624_v59  ;;  %2314 = vmatpush.msrb.mxu1 %v1752_v61 }
 0x2d8   :  { %2010 = vmatmul.f32.gmra.mxu1 %v4174_v52  ;;  %2357 = vmatpush.msrb.mxu2 %v1609_v63  ;;  %v1688_v63 = vld [vmem:[#allocation16 + $0x5b0] sm:$0xff] }
 0x2d9   :  { %2274 = vmatpush.msrb.mxu0 %v1616_v2  ;;  %2398 = vmatpush.msrb.mxu3 %v1737_v6  ;;  %v1545_v2 = vld [vmem:[#allocation16 + $0x138] sm:$0xff] }
 0x2da   :  { %2315 = vmatpush.msrb.mxu1 %v1744_v7  ;;  %2358 = vmatpush.msrb.mxu2 %v1601_v8  ;;  %v1552_v7 = vld [vmem:[#allocation16 + $0x170] sm:$0xff]  ;;  %v1673_v8 = vld [vmem:[#allocation16 + $0x538] sm:$0xff] }
 0x2db   :  { %2399 = vmatpush.msrb.mxu3 %v1729_v12  ;;  %2275 = vmatpush.msrb.mxu0 %v1608_v9  ;;  %v1680_v9 = vld [vmem:[#allocation16 + $0x570] sm:$0xff] }
 0x2dc   :  { %2089 = vmatmul.f32.gmra.mxu3 %v4166_v38  ;;  %2316 = vmatpush.msrb.mxu1 %v1736_v14  ;;  %v1537_v14 = vld [vmem:[#allocation16 + $0xf8] sm:$0xff] }
 0x2dd   :  { %2054 = vmatmul.f32.gmra.mxu2 %v4180_v4  ;;  %2276 = vmatpush.msrb.mxu0 %v1600_v19  ;;  %v1665_v19 = vld [vmem:[#allocation16 + $0x4f8] sm:$0xff] }
 0x2de   :  { %1972 = vmatmul.f32.gmra.mxu0 %v4180_v4  ;;  %2359 = vmatpush.msrb.mxu2 %v1593_v15  ;;  %v1544_v15 = vld [vmem:[#allocation16 + $0x130] sm:$0xff] }
 0x2df   :  { %2400 = vmatpush.msrb.mxu3 %v1721_v20  ;;  %2317 = vmatpush.msrb.mxu1 %v1728_v21 }
 0x2e0   :  { %2013 = vmatmul.f32.gmra.mxu1 %v4182_v5  ;;  %2360 = vmatpush.msrb.mxu2 %v1585_v22 }
 0x2e1   :  { %2401 = vmatpush.msrb.mxu3 %v1713_v28  ;;  %2277 = vmatpush.msrb.mxu0 %v1592_v25  ;;  %v1672_v28 = vld [vmem:[#allocation16 + $0x530] sm:$0xff] }
 0x2e2   :  { %2318 = vmatpush.msrb.mxu1 %v1720_v30  ;;  %2361 = vmatpush.msrb.mxu2 %v1577_v31  ;;  %v1529_v30 = vld [vmem:[#allocation16 + $0xb8] sm:$0xff] }
 0x2e3   :  { %2278 = vmatpush.msrb.mxu0 %v1584_v13  ;;  %2402 = vmatpush.msrb.mxu3 %v1705_v34  ;;  %v1657_v13 = vld [vmem:[#allocation16 + $0x4b8] sm:$0xff]  ;;  %v1664_v34 = vld [vmem:[#allocation16 + $0x4f0] sm:$0xff] }
 0x2e4   :  { %2092 = vmatmul.f32.gmra.mxu3 %v4174_v52  ;;  %2319 = vmatpush.msrb.mxu1 %v1712_v16 }
 0x2e5   :  { %2057 = vmatmul.f32.gmra.mxu2 %v4188_v23  ;;  %2403 = vmatpush.msrb.mxu3 %v1697_v40 }
 0x2e6   :  { %1975 = vmatmul.f32.gmra.mxu0 %v4188_v23  ;;  %2362 = vmatpush.msrb.mxu2 %v1569_v36  ;;  %v1528_v36 = vld [vmem:[#allocation16 + $0xb0] sm:$0xff] }
 0x2e7   :  { %2279 = vmatpush.msrb.mxu0 %v1576_v39  ;;  %2320 = vmatpush.msrb.mxu1 %v1704_v46  ;;  %v1649_v39 = vld [vmem:[#allocation16 + $0x478] sm:$0xff] }
 0x2e8   :  { %2016 = vmatmul.f32.gmra.mxu1 %v4190_v24  ;;  %2363 = vmatpush.msrb.mxu2 %v1561_v47  ;;  %v1520_v47 = vld [vmem:[#allocation16 + $0x70] sm:$0xff] }
 0x2e9   :  { %2280 = vmatpush.msrb.mxu0 %v1568_v49  ;;  %2404 = vmatpush.msrb.mxu3 %v1689_v53  ;;  %v1512_v53 = vld [vmem:[#allocation16 + $0x30] sm:$0xff] }
 0x2ea   :  { %2321 = vmatpush.msrb.mxu1 %v1696_v27  ;;  %2364 = vmatpush.msrb.mxu2 %v1553_v55 }
 0x2eb   :  { %2405 = vmatpush.msrb.mxu3 %v1681_v57  ;;  %2281 = vmatpush.msrb.mxu0 %v1560_v56  ;;  %v1640_v57 = vld [vmem:[#allocation16 + $0x430] sm:$0xff] }
 0x2ec   :  { %2095 = vmatmul.f32.gmra.mxu3 %v4182_v5  ;;  %2322 = vmatpush.msrb.mxu1 %v1688_v63 }
 0x2ed   :  { %2060 = vmatmul.f32.gmra.mxu2 %v4196_v62  ;;  %2282 = vmatpush.msrb.mxu0 %v1552_v7 }
 0x2ee   :  { %1978 = vmatmul.f32.gmra.mxu0 %v4196_v62  ;;  %2365 = vmatpush.msrb.mxu2 %v1545_v2 }
 0x2ef   :  { %2406 = vmatpush.msrb.mxu3 %v1673_v8  ;;  %2323 = vmatpush.msrb.mxu1 %v1680_v9 }
 0x2f0   :  { %2019 = vmatmul.f32.gmra.mxu1 %v4198_v0  ;;  %2366 = vmatpush.msrb.mxu2 %v1537_v14 }
 0x2f1   :  { %2407 = vmatpush.msrb.mxu3 %v1665_v19  ;;  %2283 = vmatpush.msrb.mxu0 %v1544_v15 }
 0x2f2   :  { %2324 = vmatpush.msrb.mxu1 %v1672_v28  ;;  %2367 = vmatpush.msrb.mxu2 %v1529_v30  ;;  %v3497_v30 = vld [vmem:[#allocation3] sm:$0xff] }
 0x2f3   :  { %2408 = vmatpush.msrb.mxu3 %v1657_v13 }
 0x2f4   :  { %2098 = vmatmul.f32.gmra.mxu3 %v4190_v24  ;;  %2325 = vmatpush.msrb.mxu1 %v1664_v34 }
 0x2f5   :  { %2063 = vmatmul.f32.gmra.mxu2 %v4204_v50  ;;  %2409 = vmatpush.msrb.mxu3 %v1649_v39  ;;  %v3499_v39 = vld [vmem:[#allocation3 + $0x10] sm:$0xff] }
 0x2f6   :  { %1981 = vmatmul.f32.gmra.mxu0 %v4204_v50 }
 0x2f8   :  { %2022 = vmatmul.f32.gmra.mxu1 %v4206_v3 }
 0x2fb   :  { %v1797_v32 = vpop.f32.mrf.mxu0  ;;  %v1838_v42 = vpop.f32.mrf.mxu1 }
 0x2fc   :  { %2101 = vmatmul.f32.gmra.mxu3 %v4198_v0  ;;  %v1798_v35 = vadd.f32 %v1797_v32, %v4247_v26  ;;  %v1536_v32 = vld [vmem:[#allocation16 + $0xf0] sm:$0xff] }
 0x2fd   :  { %2206 = vmatmul.f32.vlgmr.msra.gmra.mxu2 %v4149_v10  ;;  %2284 = vmatpush.msrb.mxu0 %v1536_v32 }
 0x2fe   :  { %2124 = vmatmul.f32.vlgmr.msra.gmra.mxu0 %v4149_v10  ;;  %v1839_v44 = vadd.f32 %v1838_v42, %v1798_v35  ;;  %v1521_v35 = vld [vmem:[#allocation16 + $0x78] sm:$0xff] }
 0x2ff   :  { %2368 = vmatpush.msrb.mxu2 %v1521_v35  ;;  %2285 = vmatpush.msrb.mxu0 %v1528_v36 }
 0x300   :  { %v1879_v41 = vpop.f32.mrf.mxu2  ;;  %2436 = vst [vmem:[#allocation2] sm:$0xff] %v1839_v44  ;;  %2165 = vmatmul.f32.vlgmr.msra.gmra.mxu1 %v4151_v11  ;;  %v1656_v44 = vld [vmem:[#allocation16 + $0x4b0] sm:$0xff] }
 0x301   :  { %v1880_v43 = vadd.f32 %v1879_v41, %v4253_v33  ;;  %2326 = vmatpush.msrb.mxu1 %v1656_v44  ;;  %2286 = vmatpush.msrb.mxu0 %v1520_v47  ;;  %v3501_v47 = vld [vmem:[#allocation3 + $0x20] sm:$0xff] }
 0x303   :  { %v1800_v10 = vpop.f32.mrf.mxu0  ;;  %2287 = vmatpush.msrb.mxu0 %v1512_v53 }
 0x304   :  { %2104 = vmatmul.f32.gmra.mxu3 %v4206_v3  ;;  %v1801_v54 = vadd.f32 %v1800_v10, %v4247_v26  ;;  %v1648_v10 = vld [vmem:[#allocation16 + $0x470] sm:$0xff] }
 0x305   :  { %2209 = vmatmul.f32.gmra.mxu2 %v4156_v18  ;;  %2327 = vmatpush.msrb.mxu1 %v1648_v10 }
 0x306   :  { %2127 = vmatmul.f32.gmra.mxu0 %v4156_v18 }
 0x307   :  { %2328 = vmatpush.msrb.mxu1 %v1640_v57  ;;  %v3503_v57 = vld [vmem:[#allocation3 + $0x30] sm:$0xff] }
 0x308   :  { %v1882_v58 = vpop.f32.mrf.mxu2  ;;  %2168 = vmatmul.f32.gmra.mxu1 %v4158_v29 }
 0x309   :  { %v1883_v59 = vadd.f32 %v1882_v58, %v4253_v33 }
 0x30b   :  { %v1803_v18 = vpop.f32.mrf.mxu0 }
 0x30c   :  { %2247 = vmatmul.f32.vlgmr.msra.gmra.mxu3 %v4151_v11  ;;  %v1841_v11 = vpop.f32.mrf.mxu1  ;;  %v1804_v12 = vadd.f32 %v1803_v18, %v4247_v26 }
 0x30d   :  { %v1842_v60 = vadd.f32 %v1841_v11, %v1801_v54  ;;  %2212 = vmatmul.f32.gmra.mxu2 %v4164_v37 }
 0x30e   :  { %2130 = vmatmul.f32.gmra.mxu0 %v4164_v37 }
 0x30f   :  { %v1920_v45 = vpop.f32.mrf.mxu3  ;;  %2444 = vst [vmem:[#allocation2 + $0x40] sm:$0xff] %v1842_v60 }
 0x310   :  { %v1921_v48 = vadd.f32 %v1920_v45, %v1880_v43  ;;  %v1885_v20 = vpop.f32.mrf.mxu2  ;;  %2171 = vmatmul.f32.gmra.mxu1 %v4166_v38  ;;  %v1513_v45 = vld [vmem:[#allocation16 + $0x38] sm:$0xff] }
 0x311   :  { %v1886_v21 = vadd.f32 %v1885_v20, %v4253_v33  ;;  %2369 = vmatpush.msrb.mxu2 %v1513_v45 }
 0x312   :  { %2437 = vst [vmem:[#allocation2 + $0x8] sm:$0xff] %v1921_v48  ;;  %v1641_v48 = vld [vmem:[#allocation16 + $0x438] sm:$0xff] }
 0x313   :  { %v1806_v37 = vpop.f32.mrf.mxu0  ;;  %2410 = vmatpush.msrb.mxu3 %v1641_v48  ;;  %v3502_v48 = vld [vmem:[#allocation3 + $0x28] sm:$0xff] }
 0x314   :  { %2250 = vmatmul.f32.gmra.mxu3 %v4158_v29  ;;  %v1844_v29 = vpop.f32.mrf.mxu1  ;;  %v1807_v16 = vadd.f32 %v1806_v37, %v4247_v26  ;;  %v4305_v37 = vperm.slane %v4243_v17, 3 }
 0x315   :  { %v1845_v22 = vadd.f32 %v1844_v29, %v1804_v12  ;;  %2215 = vmatmul.f32.gmra.mxu2 %v4172_v51 }
 0x316   :  { %2133 = vmatmul.f32.gmra.mxu0 %v4172_v51 }
 0x317   :  { %v1923_v61 = vpop.f32.mrf.mxu3  ;;  %2452 = vst [vmem:[#allocation2 + $0x80] sm:$0xff] %v1845_v22 }
 0x318   :  { %v1924_v6 = vadd.f32 %v1923_v61, %v1883_v59  ;;  %v1888_v40 = vpop.f32.mrf.mxu2  ;;  %2174 = vmatmul.f32.gmra.mxu1 %v4174_v52 }
 0x319   :  { %v1889_v41 = vadd.f32 %v1888_v40, %v4253_v33  ;;  %v3500_v40 = vld [vmem:[#allocation3 + $0x18] sm:$0xff] }
 0x31a   :  { %2445 = vst [vmem:[#allocation2 + $0x48] sm:$0xff] %v1924_v6 }
 0x31b   :  { %v1809_v51 = vpop.f32.mrf.mxu0 }
 0x31c   :  { %2253 = vmatmul.f32.gmra.mxu3 %v4166_v38  ;;  %v1847_v38 = vpop.f32.mrf.mxu1  ;;  %v1810_v49 = vadd.f32 %v1809_v51, %v4247_v26 }
 0x31d   :  { %v1848_v42 = vadd.f32 %v1847_v38, %v1807_v16  ;;  %2218 = vmatmul.f32.gmra.mxu2 %v4180_v4 }
 0x31e   :  { %2136 = vmatmul.f32.gmra.mxu0 %v4180_v4 }
 0x31f   :  { %v1926_v25 = vpop.f32.mrf.mxu3  ;;  %2460 = vst [vmem:[#allocation2 + $0xc0] sm:$0xff] %v1848_v42 }
 0x320   :  { %v1927_v31 = vadd.f32 %v1926_v25, %v1886_v21  ;;  %v1891_v27 = vpop.f32.mrf.mxu2  ;;  %2177 = vmatmul.f32.gmra.mxu1 %v4182_v5  ;;  %v4301_v25 = vperm.slane %v4243_v17, 2 }
 0x322   :  { %2453 = vst [vmem:[#allocation2 + $0x88] sm:$0xff] %v1927_v31  ;;  %v3498_v31 = vld [vmem:[#allocation3 + $0x8] sm:$0xff] }
 0x323   :  { %v1812_v11 = vpop.f32.mrf.mxu0 }
 0x324   :  { %2256 = vmatmul.f32.gmra.mxu3 %v4174_v52  ;;  %v1850_v54 = vpop.f32.mrf.mxu1  ;;  %v1892_v52 = vadd.f32 %v1891_v27, %v4253_v33  ;;  %v1813_v59 = vadd.f32 %v1812_v11, %v4247_v26 }
 0x325   :  { %v1851_v55 = vadd.f32 %v1850_v54, %v1810_v49  ;;  %2221 = vmatmul.f32.gmra.mxu2 %v4188_v23 }
 0x326   :  { %2139 = vmatmul.f32.gmra.mxu0 %v4188_v23 }
 0x327   :  { %v1929_v43 = vpop.f32.mrf.mxu3  ;;  %2468 = vst [vmem:[#allocation2 + $0x100] sm:$0xff] %v1851_v55 }
 0x328   :  { %v1930_v46 = vadd.f32 %v1929_v43, %v1889_v41  ;;  %v1894_v4 = vpop.f32.mrf.mxu2  ;;  %2180 = vmatmul.f32.gmra.mxu1 %v4190_v24 }
 0x329   :  { %v1895_v61 = vadd.f32 %v1894_v4, %v4253_v33 }
 0x32a   :  { %2461 = vst [vmem:[#allocation2 + $0xc8] sm:$0xff] %v1930_v46 }
 0x32c   :  { %2259 = vmatmul.f32.gmra.mxu3 %v4182_v5  ;;  %v1853_v60 = vpop.f32.mrf.mxu1  ;;  %v1815_v5 = vpop.f32.mrf.mxu0 }
 0x32d   :  { %v1854_v63 = vadd.f32 %v1853_v60, %v1813_v59  ;;  %2224 = vmatmul.f32.gmra.mxu2 %v4196_v62  ;;  %v1816_v18 = vadd.f32 %v1815_v5, %v4247_v26  ;;  %v3505_v5 = vld [vmem:[#allocation3 + $0x40] sm:$0xff] }
 0x32e   :  { %2142 = vmatmul.f32.gmra.mxu0 %v4196_v62 }
 0x32f   :  { %v1932_v56 = vpop.f32.mrf.mxu3  ;;  %2476 = vst [vmem:[#allocation2 + $0x140] sm:$0xff] %v1854_v63 }
 0x330   :  { %v1933_v58 = vadd.f32 %v1932_v56, %v1892_v52  ;;  %v1897_v7 = vpop.f32.mrf.mxu2  ;;  %2183 = vmatmul.f32.gmra.mxu1 %v4198_v0 }
 0x331   :  { %v1898_v23 = vadd.f32 %v1897_v7, %v4253_v33 }
 0x332   :  { %2469 = vst [vmem:[#allocation2 + $0x108] sm:$0xff] %v1933_v58  ;;  %v3504_v58 = vld [vmem:[#allocation3 + $0x38] sm:$0xff] }
 0x334   :  { %2262 = vmatmul.f32.gmra.mxu3 %v4190_v24  ;;  %v1856_v8 = vpop.f32.mrf.mxu1  ;;  %v1818_v24 = vpop.f32.mrf.mxu0 }
 0x335   :  { %v1857_v9 = vadd.f32 %v1856_v8, %v1816_v18  ;;  %2227 = vmatmul.f32.gmra.mxu2 %v4204_v50  ;;  %v1819_v15 = vadd.f32 %v1818_v24, %v4247_v26  ;;  %v3506_v18 = vld [vmem:[#allocation3 + $0x48] sm:$0xff] }
 0x336   :  { %2145 = vmatmul.f32.gmra.mxu0 %v4204_v50 }
 0x337   :  { %v1935_v2 = vpop.f32.mrf.mxu3  ;;  %2484 = vst [vmem:[#allocation2 + $0x180] sm:$0xff] %v1857_v9 }
 0x338   :  { %v1936_v6 = vadd.f32 %v1935_v2, %v1895_v61  ;;  %v1900_v19 = vpop.f32.mrf.mxu2  ;;  %2186 = vmatmul.f32.gmra.mxu1 %v4206_v3 }
 0x339   :  { %v1901_v29 = vadd.f32 %v1900_v19, %v4253_v33  ;;  %v3507_v19 = vld [vmem:[#allocation3 + $0x50] sm:$0xff] }
 0x33a   :  { %2477 = vst [vmem:[#allocation2 + $0x148] sm:$0xff] %v1936_v6 }
 0x33c   :  { %2265 = vmatmul.f32.gmra.mxu3 %v4198_v0  ;;  %v1859_v20 = vpop.f32.mrf.mxu1  ;;  %v1961_v26 = vpop.f32.mrf.mxu0 }
 0x33d   :  { %v1860_v21 = vadd.f32 %v1859_v20, %v1819_v15  ;;  %2370 = vmatmul.f32.vlgmr.msrb.gmra.mxu2 %v3497_v30  ;;  %v1962_v33 = vadd.f32 %v1961_v26, %v4301_v25  ;;  %v3508_v20 = vld [vmem:[#allocation3 + $0x58] sm:$0xff] }
 0x33e   :  { %2288 = vmatmul.f32.vlgmr.msrb.gmra.mxu0 %v3497_v30 }
 0x33f   :  { %v1938_v12 = vpop.f32.mrf.mxu3  ;;  %2492 = vst [vmem:[#allocation2 + $0x1c0] sm:$0xff] %v1860_v21 }
 0x340   :  { %v1939_v14 = vadd.f32 %v1938_v12, %v1898_v23  ;;  %v2043_v32 = vpop.f32.mrf.mxu2  ;;  %2329 = vmatmul.f32.vlgmr.msrb.gmra.mxu1 %v3498_v31 }
 0x341   :  { %v2044_v34 = vadd.f32 %v2043_v32, %v4305_v37 }
 0x342   :  { %2485 = vst [vmem:[#allocation2 + $0x188] sm:$0xff] %v1939_v14 }
 0x344   :  { %2268 = vmatmul.f32.gmra.mxu3 %v4206_v3  ;;  %v2002_v13 = vpop.f32.mrf.mxu1  ;;  %v1964_v38 = vpop.f32.mrf.mxu0 }
 0x345   :  { %v2003_v16 = vadd.f32 %v2002_v13, %v1962_v33  ;;  %2373 = vmatmul.f32.gmra.mxu2 %v3499_v39  ;;  %v1965_v41 = vadd.f32 %v1964_v38, %v4301_v25 }
 0x346   :  { %2291 = vmatmul.f32.gmra.mxu0 %v3499_v39 }
 0x347   :  { %v1941_v22 = vpop.f32.mrf.mxu3  ;;  %2438 = vst [vmem:[#allocation2 + $0x10] sm:$0xff] %v2003_v16 }
 0x348   :  { %v1942_v28 = vadd.f32 %v1941_v22, %v1901_v29  ;;  %v2046_v42 = vpop.f32.mrf.mxu2  ;;  %2332 = vmatmul.f32.gmra.mxu1 %v3500_v40 }
 0x349   :  { %v2047_v44 = vadd.f32 %v2046_v42, %v4305_v37 }
 0x34a   :  { %2493 = vst [vmem:[#allocation2 + $0x1c8] sm:$0xff] %v1942_v28 }
 0x34c   :  { %2411 = vmatmul.f32.vlgmr.msrb.gmra.mxu3 %v3498_v31  ;;  %v2005_v43 = vpop.f32.mrf.mxu1  ;;  %v1967_v10 = vpop.f32.mrf.mxu0 }
 0x34d   :  { %v2006_v45 = vadd.f32 %v2005_v43, %v1965_v41  ;;  %2376 = vmatmul.f32.gmra.mxu2 %v3501_v47  ;;  %v1968_v49 = vadd.f32 %v1967_v10, %v4301_v25 }
 0x34e   :  { %2294 = vmatmul.f32.gmra.mxu0 %v3501_v47  ;;  %v4335_v47 = vperm.slane %v4243_v17, 5 }
 0x34f   :  { %v2084_v35 = vpop.f32.mrf.mxu3  ;;  %2446 = vst [vmem:[#allocation2 + $0x50] sm:$0xff] %v2006_v45 }
 0x350   :  { %v2085_v36 = vadd.f32 %v2084_v35, %v2044_v34  ;;  %v2049_v53 = vpop.f32.mrf.mxu2  ;;  %2335 = vmatmul.f32.gmra.mxu1 %v3502_v48 }
 0x351   :  { %v2050_v54 = vadd.f32 %v2049_v53, %v4305_v37 }
 0x352   :  { %2439 = vst [vmem:[#allocation2 + $0x18] sm:$0xff] %v2085_v36 }
 0x354   :  { %2414 = vmatmul.f32.gmra.mxu3 %v3500_v40  ;;  %v2008_v27 = vpop.f32.mrf.mxu1  ;;  %v1970_v11 = vpop.f32.mrf.mxu0 }
 0x355   :  { %v2009_v52 = vadd.f32 %v2008_v27, %v1968_v49  ;;  %2379 = vmatmul.f32.gmra.mxu2 %v3503_v57  ;;  %v1971_v59 = vadd.f32 %v1970_v11, %v4301_v25 }
 0x356   :  { %2297 = vmatmul.f32.gmra.mxu0 %v3503_v57 }
 0x357   :  { %v2087_v46 = vpop.f32.mrf.mxu3  ;;  %2454 = vst [vmem:[#allocation2 + $0x90] sm:$0xff] %v2009_v52 }
 0x358   :  { %v2088_v51 = vadd.f32 %v2087_v46, %v2047_v44  ;;  %v2052_v4 = vpop.f32.mrf.mxu2  ;;  %2338 = vmatmul.f32.gmra.mxu1 %v3504_v58  ;;  %v4331_v46 = vperm.slane %v4243_v17, 4 }
 0x359   :  { %v2053_v61 = vadd.f32 %v2052_v4, %v4305_v37 }
 0x35a   :  { %2447 = vst [vmem:[#allocation2 + $0x58] sm:$0xff] %v2088_v51 }
 0x35c   :  { %2417 = vmatmul.f32.gmra.mxu3 %v3502_v48  ;;  %v2011_v60 = vpop.f32.mrf.mxu1  ;;  %v1973_v7 = vpop.f32.mrf.mxu0 }
 0x35d   :  { %v2012_v63 = vadd.f32 %v2011_v60, %v1971_v59  ;;  %2382 = vmatmul.f32.gmra.mxu2 %v3505_v5  ;;  %v1974_v8 = vadd.f32 %v1973_v7, %v4301_v25 }
 0x35e   :  { %2300 = vmatmul.f32.gmra.mxu0 %v3505_v5 }
 0x35f   :  { %v2090_v55 = vpop.f32.mrf.mxu3  ;;  %2462 = vst [vmem:[#allocation2 + $0xd0] sm:$0xff] %v2012_v63 }
 0x360   :  { %v2091_v56 = vadd.f32 %v2090_v55, %v2050_v54  ;;  %v2055_v23 = vpop.f32.mrf.mxu2  ;;  %2341 = vmatmul.f32.gmra.mxu1 %v3506_v18 }
 0x361   :  { %v2056_v12 = vadd.f32 %v2055_v23, %v4305_v37 }
 0x362   :  { %2455 = vst [vmem:[#allocation2 + $0x98] sm:$0xff] %v2091_v56 }
 0x364   :  { %2420 = vmatmul.f32.gmra.mxu3 %v3504_v58  ;;  %v2014_v9 = vpop.f32.mrf.mxu1  ;;  %v1976_v29 = vpop.f32.mrf.mxu0 }
 0x365   :  { %v2015_v14 = vadd.f32 %v2014_v9, %v1974_v8  ;;  %2385 = vmatmul.f32.gmra.mxu2 %v3507_v19  ;;  %v1977_v21 = vadd.f32 %v1976_v29, %v4301_v25 }
 0x366   :  { %2303 = vmatmul.f32.gmra.mxu0 %v3507_v19 }
 0x367   :  { %v2093_v2 = vpop.f32.mrf.mxu3  ;;  %2470 = vst [vmem:[#allocation2 + $0x110] sm:$0xff] %v2015_v14 }
 0x368   :  { %v2094_v6 = vadd.f32 %v2093_v2, %v2053_v61  ;;  %v2058_v22 = vpop.f32.mrf.mxu2  ;;  %2344 = vmatmul.f32.gmra.mxu1 %v3508_v20 }
 0x369   :  { %v2059_v30 = vadd.f32 %v2058_v22, %v4305_v37 }
 0x36a   :  { %2463 = vst [vmem:[#allocation2 + $0xd8] sm:$0xff] %v2094_v6 }
 0x36c   :  { %2423 = vmatmul.f32.gmra.mxu3 %v3506_v18  ;;  %v2017_v28 = vpop.f32.mrf.mxu1  ;;  %v1979_v32 = vpop.f32.mrf.mxu0 }
 0x36d   :  { %v2018_v31 = vadd.f32 %v2017_v28, %v1977_v21  ;;  %2388 = vmatmul.f32.gmra.mxu2 %v4196_v62  ;;  %v1980_v13 = vadd.f32 %v1979_v32, %v4301_v25 }
 0x36e   :  { %2306 = vmatmul.f32.gmra.mxu0 %v4196_v62 }
 0x36f   :  { %v2096_v24 = vpop.f32.mrf.mxu3  ;;  %2478 = vst [vmem:[#allocation2 + $0x150] sm:$0xff] %v2018_v31 }
 0x370   :  { %v2097_v15 = vadd.f32 %v2096_v24, %v2056_v12  ;;  %v2061_v34 = vpop.f32.mrf.mxu2  ;;  %2347 = vmatmul.f32.gmra.mxu1 %v4198_v0 }
 0x371   :  { %v2062_v35 = vadd.f32 %v2061_v34, %v4305_v37 }
 0x372   :  { %2471 = vst [vmem:[#allocation2 + $0x118] sm:$0xff] %v2097_v15 }
 0x374   :  { %2426 = vmatmul.f32.gmra.mxu3 %v3508_v20  ;;  %v2020_v16 = vpop.f32.mrf.mxu1  ;;  %v1982_v38 = vpop.f32.mrf.mxu0 }
 0x375   :  { %v2021_v36 = vadd.f32 %v2020_v16, %v1980_v13  ;;  %2391 = vmatmul.f32.gmra.mxu2 %v4204_v50  ;;  %v1983_v41 = vadd.f32 %v1982_v38, %v4301_v25 }
 0x376   :  { %2309 = vmatmul.f32.gmra.mxu0 %v4204_v50 }
 0x377   :  { %v2099_v26 = vpop.f32.mrf.mxu3  ;;  %2486 = vst [vmem:[#allocation2 + $0x190] sm:$0xff] %v2021_v36 }
 0x378   :  { %v2100_v33 = vadd.f32 %v2099_v26, %v2059_v30  ;;  %v2064_v42 = vpop.f32.mrf.mxu2  ;;  %2350 = vmatmul.f32.gmra.mxu1 %v4206_v3 }
 0x379   :  { %v2065_v62 = vadd.f32 %v2064_v42, %v4305_v37 }
 0x37a   :  { %2479 = vst [vmem:[#allocation2 + $0x158] sm:$0xff] %v2100_v33 }
 0x37c   :  { %2429 = vmatmul.f32.gmra.mxu3 %v4198_v0  ;;  %v2023_v43 = vpop.f32.mrf.mxu1  ;;  %v2125_v51 = vpop.f32.mrf.mxu0 }
 0x37d   :  { %v2024_v44 = vadd.f32 %v2023_v43, %v1983_v41  ;;  %v2126_v25 = vadd.f32 %v2125_v51, %v4331_v46 }
 0x37f   :  { %v2102_v39 = vpop.f32.mrf.mxu3  ;;  %2494 = vst [vmem:[#allocation2 + $0x1d0] sm:$0xff] %v2024_v44 }
 0x380   :  { %v2103_v40 = vadd.f32 %v2102_v39, %v2062_v35  ;;  %v2207_v48 = vpop.f32.mrf.mxu2 }
 0x381   :  { %v2208_v37 = vadd.f32 %v2207_v48, %v4335_v47 }
 0x382   :  { %2487 = vst [vmem:[#allocation2 + $0x198] sm:$0xff] %v2103_v40 }
 0x384   :  { %2432 = vmatmul.f32.gmra.mxu3 %v4206_v3  ;;  %v2166_v50 = vpop.f32.mrf.mxu1  ;;  %v2128_v27 = vpop.f32.mrf.mxu0 }
 0x385   :  { %v2167_v10 = vadd.f32 %v2166_v50, %v2126_v25  ;;  %v2129_v54 = vadd.f32 %v2128_v27, %v4331_v46  ;;  %v4354_v50 = vperm.slane %v4243_v17, 6 }
 0x387   :  { %v2105_v45 = vpop.f32.mrf.mxu3  ;;  %2440 = vst [vmem:[#allocation2 + $0x20] sm:$0xff] %v2167_v10 }
 0x388   :  { %v2106_v0 = vadd.f32 %v2105_v45, %v2065_v62  ;;  %v2210_v3 = vpop.f32.mrf.mxu2 }
 0x389   :  { %v2211_v55 = vadd.f32 %v2210_v3, %v4335_v47 }
 0x38a   :  { %2495 = vst [vmem:[#allocation2 + $0x1d8] sm:$0xff] %v2106_v0 }
 0x38c   :  { %v2169_v52 = vpop.f32.mrf.mxu1  ;;  %v2131_v11 = vpop.f32.mrf.mxu0 }
 0x38d   :  { %v2170_v56 = vadd.f32 %v2169_v52, %v2129_v54  ;;  %v2132_v59 = vadd.f32 %v2131_v11, %v4331_v46 }
 0x38f   :  { %v2248_v49 = vpop.f32.mrf.mxu3  ;;  %2448 = vst [vmem:[#allocation2 + $0x60] sm:$0xff] %v2170_v56 }
 0x390   :  { %v2249_v53 = vadd.f32 %v2248_v49, %v2208_v37  ;;  %v2213_v4 = vpop.f32.mrf.mxu2  ;;  %v4357_v49 = vperm.slane %v4243_v17, 7 }
 0x391   :  { %v2214_v61 = vadd.f32 %v2213_v4, %v4335_v47 }
 0x392   :  { %2441 = vst [vmem:[#allocation2 + $0x28] sm:$0xff] %v2249_v53 }
 0x394   :  { %v2172_v60 = vpop.f32.mrf.mxu1  ;;  %v2134_v5 = vpop.f32.mrf.mxu0 }
 0x395   :  { %v2173_v63 = vadd.f32 %v2172_v60, %v2132_v59  ;;  %v2135_v18 = vadd.f32 %v2134_v5, %v4331_v46 }
 0x397   :  { %v2251_v57 = vpop.f32.mrf.mxu3  ;;  %2456 = vst [vmem:[#allocation2 + $0xa0] sm:$0xff] %v2173_v63 }
 0x398   :  { %v2252_v58 = vadd.f32 %v2251_v57, %v2211_v55  ;;  %v2216_v7 = vpop.f32.mrf.mxu2 }
 0x399   :  { %v2217_v23 = vadd.f32 %v2216_v7, %v4335_v47 }
 0x39a   :  { %2449 = vst [vmem:[#allocation2 + $0x68] sm:$0xff] %v2252_v58 }
 0x39c   :  { %v2175_v8 = vpop.f32.mrf.mxu1  ;;  %v2137_v24 = vpop.f32.mrf.mxu0 }
 0x39d   :  { %v2176_v9 = vadd.f32 %v2175_v8, %v2135_v18  ;;  %v2138_v15 = vadd.f32 %v2137_v24, %v4331_v46 }
 0x39f   :  { %v2254_v2 = vpop.f32.mrf.mxu3  ;;  %2464 = vst [vmem:[#allocation2 + $0xe0] sm:$0xff] %v2176_v9 }
 0x3a0   :  { %v2255_v6 = vadd.f32 %v2254_v2, %v2214_v61  ;;  %v2219_v19 = vpop.f32.mrf.mxu2 }
 0x3a1   :  { %v2220_v29 = vadd.f32 %v2219_v19, %v4335_v47 }
 0x3a2   :  { %2457 = vst [vmem:[#allocation2 + $0xa8] sm:$0xff] %v2255_v6 }
 0x3a4   :  { %v2178_v20 = vpop.f32.mrf.mxu1  ;;  %v2140_v30 = vpop.f32.mrf.mxu0 }
 0x3a5   :  { %v2179_v21 = vadd.f32 %v2178_v20, %v2138_v15  ;;  %v2141_v31 = vadd.f32 %v2140_v30, %v4331_v46 }
 0x3a7   :  { %v2257_v12 = vpop.f32.mrf.mxu3  ;;  %2472 = vst [vmem:[#allocation2 + $0x120] sm:$0xff] %v2179_v21 }
 0x3a8   :  { %v2258_v14 = vadd.f32 %v2257_v12, %v2217_v23  ;;  %v2222_v26 = vpop.f32.mrf.mxu2 }
 0x3a9   :  { %v2223_v32 = vadd.f32 %v2222_v26, %v4335_v47 }
 0x3aa   :  { %2465 = vst [vmem:[#allocation2 + $0xe8] sm:$0xff] %v2258_v14 }
 0x3ac   :  { %v2181_v33 = vpop.f32.mrf.mxu1  ;;  %v2143_v35 = vpop.f32.mrf.mxu0 }
 0x3ad   :  { %v2182_v13 = vadd.f32 %v2181_v33, %v2141_v31  ;;  %v2144_v36 = vadd.f32 %v2143_v35, %v4331_v46 }
 0x3af   :  { %v2260_v22 = vpop.f32.mrf.mxu3  ;;  %2480 = vst [vmem:[#allocation2 + $0x160] sm:$0xff] %v2182_v13 }
 0x3b0   :  { %v2261_v28 = vadd.f32 %v2260_v22, %v2220_v29  ;;  %v2225_v39 = vpop.f32.mrf.mxu2 }
 0x3b1   :  { %v2226_v38 = vadd.f32 %v2225_v39, %v4335_v47 }
 0x3b2   :  { %2473 = vst [vmem:[#allocation2 + $0x128] sm:$0xff] %v2261_v28 }
 0x3b4   :  { %v2184_v40 = vpop.f32.mrf.mxu1  ;;  %v2146_v62 = vpop.f32.mrf.mxu0 }
 0x3b5   :  { %v2185_v41 = vadd.f32 %v2184_v40, %v2144_v36  ;;  %v2147_v44 = vadd.f32 %v2146_v62, %v4331_v46 }
 0x3b7   :  { %v2263_v34 = vpop.f32.mrf.mxu3  ;;  %2488 = vst [vmem:[#allocation2 + $0x1a0] sm:$0xff] %v2185_v41 }
 0x3b8   :  { %v2264_v16 = vadd.f32 %v2263_v34, %v2223_v32  ;;  %v2228_v45 = vpop.f32.mrf.mxu2 }
 0x3b9   :  { %v2229_v51 = vadd.f32 %v2228_v45, %v4335_v47 }
 0x3ba   :  { %2481 = vst [vmem:[#allocation2 + $0x168] sm:$0xff] %v2264_v16 }
 0x3bc   :  { %v2187_v0 = vpop.f32.mrf.mxu1  ;;  %v2289_v10 = vpop.f32.mrf.mxu0 }
 0x3bd   :  { %v2188_v25 = vadd.f32 %v2187_v0, %v2147_v44  ;;  %v2290_v53 = vadd.f32 %v2289_v10, %v4354_v50 }
 0x3bf   :  { %v2266_v42 = vpop.f32.mrf.mxu3  ;;  %2496 = vst [vmem:[#allocation2 + $0x1e0] sm:$0xff] %v2188_v25 }
 0x3c0   :  { %v2267_v43 = vadd.f32 %v2266_v42, %v2226_v38  ;;  %v2371_v27 = vpop.f32.mrf.mxu2 }
 0x3c1   :  { %v2372_v54 = vadd.f32 %v2371_v27, %v4357_v49 }
 0x3c2   :  { %2489 = vst [vmem:[#allocation2 + $0x1a8] sm:$0xff] %v2267_v43 }
 0x3c4   :  { %v2330_v46 = vpop.f32.mrf.mxu1  ;;  %v2292_v55 = vpop.f32.mrf.mxu0 }
 0x3c5   :  { %v2331_v3 = vadd.f32 %v2330_v46, %v2290_v53  ;;  %v2293_v56 = vadd.f32 %v2292_v55, %v4354_v50 }
 0x3c7   :  { %v2269_v48 = vpop.f32.mrf.mxu3  ;;  %2442 = vst [vmem:[#allocation2 + $0x30] sm:$0xff] %v2331_v3 }
 0x3c8   :  { %v2270_v37 = vadd.f32 %v2269_v48, %v2229_v51  ;;  %v2374_v57 = vpop.f32.mrf.mxu2 }
 0x3c9   :  { %v2375_v11 = vadd.f32 %v2374_v57, %v4357_v49 }
 0x3ca   :  { %2497 = vst [vmem:[#allocation2 + $0x1e8] sm:$0xff] %v2270_v37 }
 0x3cc   :  { %v2333_v58 = vpop.f32.mrf.mxu1  ;;  %v2295_v60 = vpop.f32.mrf.mxu0 }
 0x3cd   :  { %v2334_v17 = vadd.f32 %v2333_v58, %v2293_v56  ;;  %v2296_v61 = vadd.f32 %v2295_v60, %v4354_v50 }
 0x3cf   :  { %v2412_v47 = vpop.f32.mrf.mxu3  ;;  %2450 = vst [vmem:[#allocation2 + $0x70] sm:$0xff] %v2334_v17 }
 0x3d0   :  { %v2413_v52 = vadd.f32 %v2412_v47, %v2372_v54  ;;  %v2377_v63 = vpop.f32.mrf.mxu2 }
 0x3d1   :  { %v2378_v6 = vadd.f32 %v2377_v63, %v4357_v49 }
 0x3d2   :  { %2443 = vst [vmem:[#allocation2 + $0x38] sm:$0xff] %v2413_v52 }
 0x3d4   :  { %v2336_v2 = vpop.f32.mrf.mxu1  ;;  %v2298_v8 = vpop.f32.mrf.mxu0 }
 0x3d5   :  { %v2337_v5 = vadd.f32 %v2336_v2, %v2296_v61  ;;  %v2299_v23 = vadd.f32 %v2298_v8, %v4354_v50 }
 0x3d7   :  { %v2415_v59 = vpop.f32.mrf.mxu3  ;;  %2458 = vst [vmem:[#allocation2 + $0xb0] sm:$0xff] %v2337_v5 }
 0x3d8   :  { %v2416_v4 = vadd.f32 %v2415_v59, %v2375_v11  ;;  %v2380_v9 = vpop.f32.mrf.mxu2 }
 0x3d9   :  { %v2381_v14 = vadd.f32 %v2380_v9, %v4357_v49 }
 0x3da   :  { %2451 = vst [vmem:[#allocation2 + $0x78] sm:$0xff] %v2416_v4 }
 0x3dc   :  { %v2339_v12 = vpop.f32.mrf.mxu1  ;;  %v2301_v20 = vpop.f32.mrf.mxu0 }
 0x3dd   :  { %v2340_v24 = vadd.f32 %v2339_v12, %v2299_v23  ;;  %v2302_v29 = vadd.f32 %v2301_v20, %v4354_v50 }
 0x3df   :  { %v2418_v18 = vpop.f32.mrf.mxu3  ;;  %2466 = vst [vmem:[#allocation2 + $0xf0] sm:$0xff] %v2340_v24 }
 0x3e0   :  { %v2419_v7 = vadd.f32 %v2418_v18, %v2378_v6  ;;  %v2383_v21 = vpop.f32.mrf.mxu2 }
 0x3e1   :  { %v2384_v28 = vadd.f32 %v2383_v21, %v4357_v49 }
 0x3e2   :  { %2459 = vst [vmem:[#allocation2 + $0xb8] sm:$0xff] %v2419_v7 }
 0x3e4   :  { %v2342_v22 = vpop.f32.mrf.mxu1  ;;  %v2304_v33 = vpop.f32.mrf.mxu0 }
 0x3e5   :  { %v2343_v30 = vadd.f32 %v2342_v22, %v2302_v29  ;;  %v2305_v32 = vadd.f32 %v2304_v33, %v4354_v50 }
 0x3e7   :  { %v2421_v15 = vpop.f32.mrf.mxu3  ;;  %2474 = vst [vmem:[#allocation2 + $0x130] sm:$0xff] %v2343_v30 }
 0x3e8   :  { %v2422_v19 = vadd.f32 %v2421_v15, %v2381_v14  ;;  %v2386_v13 = vpop.f32.mrf.mxu2 }
 0x3e9   :  { %v2387_v16 = vadd.f32 %v2386_v13, %v4357_v49 }
 0x3ea   :  { %2467 = vst [vmem:[#allocation2 + $0xf8] sm:$0xff] %v2422_v19 }
 0x3ec   :  { %v2345_v34 = vpop.f32.mrf.mxu1  ;;  %v2307_v40 = vpop.f32.mrf.mxu0 }
 0x3ed   :  { %v2346_v35 = vadd.f32 %v2345_v34, %v2305_v32  ;;  %v2308_v38 = vadd.f32 %v2307_v40, %v4354_v50 }
 0x3ef   :  { %v2424_v31 = vpop.f32.mrf.mxu3  ;;  %2482 = vst [vmem:[#allocation2 + $0x170] sm:$0xff] %v2346_v35 }
 0x3f0   :  { %v2425_v26 = vadd.f32 %v2424_v31, %v2384_v28  ;;  %v2389_v41 = vpop.f32.mrf.mxu2 }
 0x3f1   :  { %v2390_v43 = vadd.f32 %v2389_v41, %v4357_v49 }
 0x3f2   :  { %2475 = vst [vmem:[#allocation2 + $0x138] sm:$0xff] %v2425_v26 }
 0x3f4   :  { %v2348_v42 = vpop.f32.mrf.mxu1  ;;  %v2310_v0 = vpop.f32.mrf.mxu0 }
 0x3f5   :  { %v2349_v62 = vadd.f32 %v2348_v42, %v2308_v38  ;;  %v2311_v51 = vadd.f32 %v2310_v0, %v4354_v50 }
 0x3f7   :  { %v2427_v36 = vpop.f32.mrf.mxu3  ;;  %2490 = vst [vmem:[#allocation2 + $0x1b0] sm:$0xff] %v2349_v62 }
 0x3f8   :  { %v2428_v39 = vadd.f32 %v2427_v36, %v2387_v16  ;;  %v2392_v25 = vpop.f32.mrf.mxu2 }
 0x3f9   :  { %v2393_v37 = vadd.f32 %v2392_v25, %v4357_v49 }
 0x3fa   :  { %2483 = vst [vmem:[#allocation2 + $0x178] sm:$0xff] %v2428_v39 }
 0x3fc   :  { %v2351_v48 = vpop.f32.mrf.mxu1 }
 0x3fd   :  { %v2352_v10 = vadd.f32 %v2351_v48, %v2311_v51 }
 0x3ff   :  { %v2430_v44 = vpop.f32.mrf.mxu3  ;;  %2498 = vst [vmem:[#allocation2 + $0x1f0] sm:$0xff] %v2352_v10 }
 0x400   :  { %v2431_v45 = vadd.f32 %v2430_v44, %v2390_v43 }
 0x402   :  { %2491 = vst [vmem:[#allocation2 + $0x1b8] sm:$0xff] %v2431_v45 }
 0x407   :  { %v2433_v53 = vpop.f32.mrf.mxu3 }
 0x408   :  { %v2434_v27 = vadd.f32 %v2433_v53, %v2393_v37 }
 0x40a   :  { %2499 = vst [vmem:[#allocation2 + $0x1f8] sm:$0xff] %v2434_v27 }
 0x40b LB: > { %v2646_v46 = vld [vmem:[#allocation18 + $0x3c8] sm:$0xff]  ;;  %v2645_v47 = vld [vmem:[#allocation18 + $0x3c0] sm:$0xff]  ;;  %v2648_v27 = vld [vmem:[#allocation18 + $0x3d8] sm:$0xff]  ;;  %s3429_s20 = sshll.u32 %s3809_s19, 6  ;;  %s2512_s22 = ssub.s32 7, %s3809_s19  ;;  %s3809_s19 = sphi %s4375_s19, %s2511_s19  }
 0x40c   : > { %v2774_v54 = vld [vmem:[#allocation18 + $0x7c8] sm:$0xff]  ;;  %2821 = vmatpush.msra.mxu2 %v2646_v46  ;;  %v2773_v49 = vld [vmem:[#allocation18 + $0x7c0] sm:$0xff]  ;;  %2781 = vmatpush.msra.mxu0 %v2645_v47  ;;  %v2776_v46 = vld [vmem:[#allocation18 + $0x7d8] sm:$0xff]  ;;  %s4401_s21 = scalar_lea.vmem [#allocation2], %s3429_s20  ;;  %s3430_s23 = sshll.u32 %s2512_s22, 6 }
 0x40d   : > { %v2638_v3 = vld [vmem:[#allocation18 + $0x388] sm:$0xff]  ;;  %2841 = vmatpush.msra.mxu3 %v2774_v54  ;;  %2801 = vmatpush.msra.mxu1 %v2773_v49  ;;  %v2637_v56 = vld [vmem:[#allocation18 + $0x380] sm:$0xff]  ;;  %v2768_v47 = vld [vmem:[#allocation18 + $0x798] sm:$0xff]  ;;  %s4427_s24 = scalar_lea.vmem [#allocation2], %s3430_s23 }
 0x40e   : > { %v2766_v50 = vld [vmem:[#allocation18 + $0x788] sm:$0xff]  ;;  %2822 = vmatpush.msra.mxu2 %v2638_v3  ;;  %v2765_v57 = vld [vmem:[#allocation18 + $0x780] sm:$0xff]  ;;  %2782 = vmatpush.msra.mxu0 %v2637_v56  ;;  %v2647_v49 = vld [vmem:[#allocation18 + $0x3d0] sm:$0xff] }
 0x40f   : > { %v2630_v52 = vld [vmem:[#allocation18 + $0x348] sm:$0xff]  ;;  %2842 = vmatpush.msra.mxu3 %v2766_v50  ;;  %2802 = vmatpush.msra.mxu1 %v2765_v57  ;;  %v2629_v17 = vld [vmem:[#allocation18 + $0x340] sm:$0xff]  ;;  %v2640_v50 = vld [vmem:[#allocation18 + $0x398] sm:$0xff] }
 0x410   : > { %v2758_v55 = vld [vmem:[#allocation18 + $0x748] sm:$0xff]  ;;  %v2757_v59 = vld [vmem:[#allocation18 + $0x740] sm:$0xff]  ;;  %2823 = vmatpush.msra.mxu2 %v2630_v52  ;;  %2783 = vmatpush.msra.mxu0 %v2629_v17  ;;  %v2775_v52 = vld [vmem:[#allocation18 + $0x7d0] sm:$0xff] }
 0x411   : > { %v2622_v58 = vld [vmem:[#allocation18 + $0x308] sm:$0xff]  ;;  %2843 = vmatpush.msra.mxu3 %v2758_v55  ;;  %v2621_v4 = vld [vmem:[#allocation18 + $0x300] sm:$0xff]  ;;  %2803 = vmatpush.msra.mxu1 %v2757_v59  ;;  %v2632_v55 = vld [vmem:[#allocation18 + $0x358] sm:$0xff] }
 0x412   : > { %v2750_v11 = vld [vmem:[#allocation18 + $0x708] sm:$0xff]  ;;  %v2749_v60 = vld [vmem:[#allocation18 + $0x700] sm:$0xff]  ;;  %2824 = vmatpush.msra.mxu2 %v2622_v58  ;;  %2784 = vmatpush.msra.mxu0 %v2621_v4  ;;  %v2760_v56 = vld [vmem:[#allocation18 + $0x758] sm:$0xff] }
 0x413   : > { %v2614_v61 = vld [vmem:[#allocation18 + $0x2c8] sm:$0xff]  ;;  %2844 = vmatpush.msra.mxu3 %v2750_v11  ;;  %v2613_v2 = vld [vmem:[#allocation18 + $0x2c0] sm:$0xff]  ;;  %2804 = vmatpush.msra.mxu1 %v2749_v60  ;;  %v2639_v57 = vld [vmem:[#allocation18 + $0x390] sm:$0xff] }
 0x414   : > { %v2742_v63 = vld [vmem:[#allocation18 + $0x6c8] sm:$0xff]  ;;  %v2741_v6 = vld [vmem:[#allocation18 + $0x6c0] sm:$0xff]  ;;  %2825 = vmatpush.msra.mxu2 %v2614_v61  ;;  %2785 = vmatpush.msra.mxu0 %v2613_v2  ;;  %v2767_v58 = vld [vmem:[#allocation18 + $0x790] sm:$0xff] }
 0x415   : > { %v2606_v5 = vld [vmem:[#allocation18 + $0x288] sm:$0xff]  ;;  %2845 = vmatpush.msra.mxu3 %v2742_v63  ;;  %v2605_v7 = vld [vmem:[#allocation18 + $0x280] sm:$0xff]  ;;  %2805 = vmatpush.msra.mxu1 %v2741_v6  ;;  %v2624_v11 = vld [vmem:[#allocation18 + $0x318] sm:$0xff] }
 0x416   : > { %v2734_v18 = vld [vmem:[#allocation18 + $0x688] sm:$0xff]  ;;  %v2733_v8 = vld [vmem:[#allocation18 + $0x680] sm:$0xff]  ;;  %2826 = vmatpush.msra.mxu2 %v2606_v5  ;;  %2786 = vmatpush.msra.mxu0 %v2605_v7  ;;  %v2752_v17 = vld [vmem:[#allocation18 + $0x718] sm:$0xff] }
 0x417   : > { %v2598_v23 = vld [vmem:[#allocation18 + $0x248] sm:$0xff]  ;;  %2846 = vmatpush.msra.mxu3 %v2734_v18  ;;  %v2597_v12 = vld [vmem:[#allocation18 + $0x240] sm:$0xff]  ;;  %2806 = vmatpush.msra.mxu1 %v2733_v8  ;;  %v2631_v59 = vld [vmem:[#allocation18 + $0x350] sm:$0xff] }
 0x418   : > { %v2726_v9 = vld [vmem:[#allocation18 + $0x648] sm:$0xff]  ;;  %v2725_v14 = vld [vmem:[#allocation18 + $0x640] sm:$0xff]  ;;  %2827 = vmatpush.msra.mxu2 %v2598_v23  ;;  %2787 = vmatpush.msra.mxu0 %v2597_v12  ;;  %v2759_v4 = vld [vmem:[#allocation18 + $0x750] sm:$0xff] }
 0x419   : > { %v2590_v24 = vld [vmem:[#allocation18 + $0x208] sm:$0xff]  ;;  %2847 = vmatpush.msra.mxu3 %v2726_v9  ;;  %v2589_v19 = vld [vmem:[#allocation18 + $0x200] sm:$0xff]  ;;  %2807 = vmatpush.msra.mxu1 %v2725_v14  ;;  %v2616_v60 = vld [vmem:[#allocation18 + $0x2d8] sm:$0xff] }
 0x41a   : > { %v2718_v15 = vld [vmem:[#allocation18 + $0x608] sm:$0xff]  ;;  %v2717_v20 = vld [vmem:[#allocation18 + $0x600] sm:$0xff]  ;;  %2828 = vmatpush.msra.mxu2 %v2590_v24  ;;  %2788 = vmatpush.msra.mxu0 %v2589_v19  ;;  %v2744_v61 = vld [vmem:[#allocation18 + $0x6d8] sm:$0xff] }
 0x41b   : > { %v2582_v29 = vld [vmem:[#allocation18 + $0x1c8] sm:$0xff]  ;;  %2848 = vmatpush.msra.mxu3 %v2718_v15  ;;  %v2581_v22 = vld [vmem:[#allocation18 + $0x1c0] sm:$0xff]  ;;  %2808 = vmatpush.msra.mxu1 %v2717_v20  ;;  %v2623_v63 = vld [vmem:[#allocation18 + $0x310] sm:$0xff] }
 0x41c   : > { %v2710_v21 = vld [vmem:[#allocation18 + $0x5c8] sm:$0xff]  ;;  %v2709_v28 = vld [vmem:[#allocation18 + $0x5c0] sm:$0xff]  ;;  %2829 = vmatpush.msra.mxu2 %v2582_v29  ;;  %2789 = vmatpush.msra.mxu0 %v2581_v22  ;;  %v2751_v2 = vld [vmem:[#allocation18 + $0x710] sm:$0xff] }
 0x41d   : > { %v2574_v30 = vld [vmem:[#allocation18 + $0x188] sm:$0xff]  ;;  %2849 = vmatpush.msra.mxu3 %v2710_v21  ;;  %v2573_v26 = vld [vmem:[#allocation18 + $0x180] sm:$0xff]  ;;  %2809 = vmatpush.msra.mxu1 %v2709_v28  ;;  %v2608_v6 = vld [vmem:[#allocation18 + $0x298] sm:$0xff] }
 0x41e   : > { %v2702_v31 = vld [vmem:[#allocation18 + $0x588] sm:$0xff]  ;;  %v2701_v33 = vld [vmem:[#allocation18 + $0x580] sm:$0xff]  ;;  %2830 = vmatpush.msra.mxu2 %v2574_v30  ;;  %2790 = vmatpush.msra.mxu0 %v2573_v26  ;;  %v2736_v5 = vld [vmem:[#allocation18 + $0x698] sm:$0xff] }
 0x41f   : > { %v2566_v32 = vld [vmem:[#allocation18 + $0x148] sm:$0xff]  ;;  %2850 = vmatpush.msra.mxu3 %v2702_v31  ;;  %v2565_v34 = vld [vmem:[#allocation18 + $0x140] sm:$0xff]  ;;  %2810 = vmatpush.msra.mxu1 %v2701_v33  ;;  %v2615_v18 = vld [vmem:[#allocation18 + $0x2d0] sm:$0xff] }
 0x420   : > { %v2694_v13 = vld [vmem:[#allocation18 + $0x548] sm:$0xff]  ;;  %v2693_v16 = vld [vmem:[#allocation18 + $0x540] sm:$0xff]  ;;  %2831 = vmatpush.msra.mxu2 %v2566_v32  ;;  %2791 = vmatpush.msra.mxu0 %v2565_v34  ;;  %v2743_v7 = vld [vmem:[#allocation18 + $0x6d0] sm:$0xff] }
 0x421   : > { %v2558_v35 = vld [vmem:[#allocation18 + $0x108] sm:$0xff]  ;;  %2851 = vmatpush.msra.mxu3 %v2694_v13  ;;  %v2557_v39 = vld [vmem:[#allocation18 + $0x100] sm:$0xff]  ;;  %2811 = vmatpush.msra.mxu1 %v2693_v16  ;;  %v2600_v8 = vld [vmem:[#allocation18 + $0x258] sm:$0xff] }
 0x422   : > { %v2686_v36 = vld [vmem:[#allocation18 + $0x508] sm:$0xff]  ;;  %v2685_v40 = vld [vmem:[#allocation18 + $0x500] sm:$0xff]  ;;  %2832 = vmatpush.msra.mxu2 %v2558_v35  ;;  %2792 = vmatpush.msra.mxu0 %v2557_v39  ;;  %v2728_v23 = vld [vmem:[#allocation18 + $0x658] sm:$0xff] }
 0x423   : > { %v2550_v38 = vld [vmem:[#allocation18 + $0xc8] sm:$0xff]  ;;  %2852 = vmatpush.msra.mxu3 %v2686_v36  ;;  %v2549_v42 = vld [vmem:[#allocation18 + $0xc0] sm:$0xff]  ;;  %2812 = vmatpush.msra.mxu1 %v2685_v40  ;;  %v2607_v9 = vld [vmem:[#allocation18 + $0x290] sm:$0xff] }
 0x424   : > { %v2678_v41 = vld [vmem:[#allocation18 + $0x4c8] sm:$0xff]  ;;  %v2677_v43 = vld [vmem:[#allocation18 + $0x4c0] sm:$0xff]  ;;  %2833 = vmatpush.msra.mxu2 %v2550_v38  ;;  %2793 = vmatpush.msra.mxu0 %v2549_v42  ;;  %v2735_v12 = vld [vmem:[#allocation18 + $0x690] sm:$0xff] }
 0x425   : > { %v2542_v62 = vld [vmem:[#allocation18 + $0x88] sm:$0xff]  ;;  %2853 = vmatpush.msra.mxu3 %v2678_v41  ;;  %v2541_v45 = vld [vmem:[#allocation18 + $0x80] sm:$0xff]  ;;  %2813 = vmatpush.msra.mxu1 %v2677_v43  ;;  %v2592_v14 = vld [vmem:[#allocation18 + $0x218] sm:$0xff] }
 0x426   : > { %v2670_v44 = vld [vmem:[#allocation18 + $0x488] sm:$0xff]  ;;  %v2669_v0 = vld [vmem:[#allocation18 + $0x480] sm:$0xff]  ;;  %2834 = vmatpush.msra.mxu2 %v2542_v62  ;;  %2794 = vmatpush.msra.mxu0 %v2541_v45  ;;  %v2720_v24 = vld [vmem:[#allocation18 + $0x618] sm:$0xff] }
 0x427   : > { %v2534_v51 = vld [vmem:[#allocation18 + $0x48] sm:$0xff]  ;;  %2854 = vmatpush.msra.mxu3 %v2670_v44  ;;  %v2533_v48 = vld [vmem:[#allocation18 + $0x40] sm:$0xff]  ;;  %2814 = vmatpush.msra.mxu1 %v2669_v0  ;;  %v2599_v15 = vld [vmem:[#allocation18 + $0x250] sm:$0xff] }
 0x428   : > { %v2662_v25 = vld [vmem:[#allocation18 + $0x448] sm:$0xff]  ;;  %v2661_v37 = vld [vmem:[#allocation18 + $0x440] sm:$0xff]  ;;  %2835 = vmatpush.msra.mxu2 %v2534_v51  ;;  %2795 = vmatpush.msra.mxu0 %v2533_v48  ;;  %v2727_v19 = vld [vmem:[#allocation18 + $0x650] sm:$0xff] }
 0x429   : > { %v2526_v10 = vld [vmem:[#allocation18 + $0x8] sm:$0xff]  ;;  %2855 = vmatpush.msra.mxu3 %v2662_v25  ;;  %2815 = vmatpush.msra.mxu1 %v2661_v37  ;;  %v2525_v54 = vld [vmem:[#allocation18] sm:$0xff]  ;;  %v2584_v20 = vld [vmem:[#allocation18 + $0x1d8] sm:$0xff] }
 0x42a   : > { %v2654_v53 = vld [vmem:[#allocation18 + $0x408] sm:$0xff]  ;;  %v2653_v3 = vld [vmem:[#allocation18 + $0x400] sm:$0xff]  ;;  %2836 = vmatpush.msra.mxu2 %v2526_v10  ;;  %2796 = vmatpush.msra.mxu0 %v2525_v54  ;;  %v2712_v29 = vld [vmem:[#allocation18 + $0x5d8] sm:$0xff] }
 0x42b   : > { %2856 = vmatpush.msra.mxu3 %v2654_v53  ;;  %2816 = vmatpush.msra.mxu1 %v2653_v3  ;;  %v2591_v21 = vld [vmem:[#allocation18 + $0x210] sm:$0xff]  ;;  %v4380_v28 = vld [vmem:[#allocation4] sm:$0xff]  ;;  %v4382_v30 = vld [vmem:[#allocation4 + $0x8] sm:$0xff] }
 0x42c   : > { %2901 = vmatpush.msrb.mxu2 %v2648_v27  ;;  %2861 = vmatpush.msrb.mxu0 %v2647_v49  ;;  %v2719_v22 = vld [vmem:[#allocation18 + $0x610] sm:$0xff]  ;;  %v2576_v31 = vld [vmem:[#allocation18 + $0x198] sm:$0xff]  ;;  %v2650_v3 = vld [vmem:[#allocation18 + $0x3e8] sm:$0xff] }
 0x42d   : > { %2921 = vmatpush.msrb.mxu3 %v2776_v46  ;;  %2881 = vmatpush.msrb.mxu1 %v2775_v52  ;;  %v2704_v26 = vld [vmem:[#allocation18 + $0x598] sm:$0xff]  ;;  %v2583_v33 = vld [vmem:[#allocation18 + $0x1d0] sm:$0xff]  ;;  %v2642_v52 = vld [vmem:[#allocation18 + $0x3a8] sm:$0xff] }
 0x42e   : > { %2902 = vmatpush.msrb.mxu2 %v2640_v50  ;;  %2862 = vmatpush.msrb.mxu0 %v2639_v57  ;;  %v2711_v32 = vld [vmem:[#allocation18 + $0x5d0] sm:$0xff]  ;;  %v2568_v13 = vld [vmem:[#allocation18 + $0x158] sm:$0xff]  ;;  %v2778_v50 = vld [vmem:[#allocation18 + $0x7e8] sm:$0xff] }
 0x42f   : > { %2922 = vmatpush.msrb.mxu3 %v2768_v47  ;;  %2882 = vmatpush.msrb.mxu1 %v2767_v58  ;;  %v2696_v34 = vld [vmem:[#allocation18 + $0x558] sm:$0xff]  ;;  %v2575_v16 = vld [vmem:[#allocation18 + $0x190] sm:$0xff]  ;;  %v2777_v57 = vld [vmem:[#allocation18 + $0x7e0] sm:$0xff] }
 0x430   : > { %2903 = vmatpush.msrb.mxu2 %v2632_v55  ;;  %2863 = vmatpush.msrb.mxu0 %v2631_v59  ;;  %v2703_v35 = vld [vmem:[#allocation18 + $0x590] sm:$0xff]  ;;  %v2560_v36 = vld [vmem:[#allocation18 + $0x118] sm:$0xff]  ;;  %v2770_v55 = vld [vmem:[#allocation18 + $0x7a8] sm:$0xff] }
 0x431   : > { %2923 = vmatpush.msrb.mxu3 %v2760_v56  ;;  %2883 = vmatpush.msrb.mxu1 %v2759_v4  ;;  %v2688_v39 = vld [vmem:[#allocation18 + $0x518] sm:$0xff]  ;;  %v2567_v40 = vld [vmem:[#allocation18 + $0x150] sm:$0xff]  ;;  %v2649_v56 = vld [vmem:[#allocation18 + $0x3e0] sm:$0xff] }
 0x432   : > { %2904 = vmatpush.msrb.mxu2 %v2624_v11  ;;  %2864 = vmatpush.msrb.mxu0 %v2623_v63  ;;  %v2695_v38 = vld [vmem:[#allocation18 + $0x550] sm:$0xff]  ;;  %v2552_v41 = vld [vmem:[#allocation18 + $0xd8] sm:$0xff]  ;;  %v2634_v58 = vld [vmem:[#allocation18 + $0x368] sm:$0xff] }
 0x433   : > { %2924 = vmatpush.msrb.mxu3 %v2752_v17  ;;  %2884 = vmatpush.msrb.mxu1 %v2751_v2  ;;  %v2680_v42 = vld [vmem:[#allocation18 + $0x4d8] sm:$0xff]  ;;  %v2559_v43 = vld [vmem:[#allocation18 + $0x110] sm:$0xff]  ;;  %v2762_v11 = vld [vmem:[#allocation18 + $0x768] sm:$0xff] }
 0x434   : > { %2905 = vmatpush.msrb.mxu2 %v2616_v60  ;;  %2865 = vmatpush.msrb.mxu0 %v2615_v18  ;;  %v2687_v62 = vld [vmem:[#allocation18 + $0x510] sm:$0xff]  ;;  %v2544_v44 = vld [vmem:[#allocation18 + $0x98] sm:$0xff]  ;;  %v2641_v17 = vld [vmem:[#allocation18 + $0x3a0] sm:$0xff] }
 0x435   : > { %2925 = vmatpush.msrb.mxu3 %v2744_v61  ;;  %2885 = vmatpush.msrb.mxu1 %v2743_v7  ;;  %v2672_v45 = vld [vmem:[#allocation18 + $0x498] sm:$0xff]  ;;  %v2551_v0 = vld [vmem:[#allocation18 + $0xd0] sm:$0xff]  ;;  %v2769_v59 = vld [vmem:[#allocation18 + $0x7a0] sm:$0xff] }
 0x436   : > { %2906 = vmatpush.msrb.mxu2 %v2608_v6  ;;  %2866 = vmatpush.msrb.mxu0 %v2607_v9  ;;  %v2679_v51 = vld [vmem:[#allocation18 + $0x4d0] sm:$0xff]  ;;  %v2536_v25 = vld [vmem:[#allocation18 + $0x58] sm:$0xff]  ;;  %v2626_v4 = vld [vmem:[#allocation18 + $0x328] sm:$0xff] }
 0x437   : > { %2926 = vmatpush.msrb.mxu3 %v2736_v5  ;;  %2886 = vmatpush.msrb.mxu1 %v2735_v12  ;;  %v2664_v48 = vld [vmem:[#allocation18 + $0x458] sm:$0xff]  ;;  %v2543_v37 = vld [vmem:[#allocation18 + $0x90] sm:$0xff]  ;;  %v2754_v60 = vld [vmem:[#allocation18 + $0x728] sm:$0xff] }
 0x438   : > { %2907 = vmatpush.msrb.mxu2 %v2600_v8  ;;  %2867 = vmatpush.msrb.mxu0 %v2599_v15  ;;  %v2671_v10 = vld [vmem:[#allocation18 + $0x490] sm:$0xff]  ;;  %v2528_v53 = vld [vmem:[#allocation18 + $0x18] sm:$0xff]  ;;  %v2633_v61 = vld [vmem:[#allocation18 + $0x360] sm:$0xff] }
 0x439   : > { %2927 = vmatpush.msrb.mxu3 %v2728_v23  ;;  %2887 = vmatpush.msrb.mxu1 %v2727_v19  ;;  %v2656_v27 = vld [vmem:[#allocation18 + $0x418] sm:$0xff]  ;;  %v2535_v46 = vld [vmem:[#allocation18 + $0x50] sm:$0xff]  ;;  %v2761_v63 = vld [vmem:[#allocation18 + $0x760] sm:$0xff] }
 0x43a   : > { %2908 = vmatpush.msrb.mxu2 %v2592_v14  ;;  %2868 = vmatpush.msrb.mxu0 %v2591_v21  ;;  %v2663_v54 = vld [vmem:[#allocation18 + $0x450] sm:$0xff]  ;;  %v2618_v2 = vld [vmem:[#allocation18 + $0x2e8] sm:$0xff]  ;;  %v2625_v5 = vld [vmem:[#allocation18 + $0x320] sm:$0xff] }
 0x43b   : > { %2928 = vmatpush.msrb.mxu3 %v2720_v24  ;;  %2888 = vmatpush.msrb.mxu1 %v2719_v22  ;;  %v2527_v47 = vld [vmem:[#allocation18 + $0x10] sm:$0xff]  ;;  %v2746_v6 = vld [vmem:[#allocation18 + $0x6e8] sm:$0xff]  ;;  %v2753_v18 = vld [vmem:[#allocation18 + $0x720] sm:$0xff] }
 0x43c   : > { %2909 = vmatpush.msrb.mxu2 %v2584_v20  ;;  %2857 = vmatmul.f32.vlgmr.msra.gmra.mxu3 %v4382_v30  ;;  %v2655_v49 = vld [vmem:[#allocation18 + $0x410] sm:$0xff]  ;;  %v2610_v7 = vld [vmem:[#allocation18 + $0x2a8] sm:$0xff]  ;;  %v2617_v23 = vld [vmem:[#allocation18 + $0x2e0] sm:$0xff] }
 0x43d   : > { %2929 = vmatpush.msrb.mxu3 %v2712_v29  ;;  %2837 = vmatmul.f32.vlgmr.msra.gmra.mxu2 %v4380_v28  ;;  %v2738_v8 = vld [vmem:[#allocation18 + $0x6a8] sm:$0xff]  ;;  %v2745_v9 = vld [vmem:[#allocation18 + $0x6e0] sm:$0xff] }
 0x43e   : > { %2910 = vmatpush.msrb.mxu2 %v2576_v31  ;;  %2869 = vmatpush.msrb.mxu0 %v2583_v33  ;;  %v2602_v12 = vld [vmem:[#allocation18 + $0x268] sm:$0xff]  ;;  %v2609_v24 = vld [vmem:[#allocation18 + $0x2a0] sm:$0xff] }
 0x43f   : > { %2930 = vmatpush.msrb.mxu3 %v2704_v26  ;;  %2889 = vmatpush.msrb.mxu1 %v2711_v32  ;;  %v2730_v14 = vld [vmem:[#allocation18 + $0x668] sm:$0xff]  ;;  %v2737_v15 = vld [vmem:[#allocation18 + $0x6a0] sm:$0xff] }
 0x440   : > { %2911 = vmatpush.msrb.mxu2 %v2568_v13  ;;  %2870 = vmatpush.msrb.mxu0 %v2575_v16  ;;  %v2594_v19 = vld [vmem:[#allocation18 + $0x228] sm:$0xff]  ;;  %v2601_v29 = vld [vmem:[#allocation18 + $0x260] sm:$0xff] }
 0x441   : > { %2931 = vmatpush.msrb.mxu3 %v2696_v34  ;;  %2890 = vmatpush.msrb.mxu1 %v2703_v35  ;;  %v2722_v20 = vld [vmem:[#allocation18 + $0x628] sm:$0xff]  ;;  %v2729_v21 = vld [vmem:[#allocation18 + $0x660] sm:$0xff] }
 0x442   : > { %2912 = vmatpush.msrb.mxu2 %v2560_v36  ;;  %2871 = vmatpush.msrb.mxu0 %v2567_v40  ;;  %v2586_v22 = vld [vmem:[#allocation18 + $0x1e8] sm:$0xff]  ;;  %v2593_v26 = vld [vmem:[#allocation18 + $0x220] sm:$0xff] }
 0x443   : > { %2932 = vmatpush.msrb.mxu3 %v2688_v39  ;;  %2891 = vmatpush.msrb.mxu1 %v2695_v38  ;;  %v2714_v31 = vld [vmem:[#allocation18 + $0x5e8] sm:$0xff]  ;;  %v2721_v33 = vld [vmem:[#allocation18 + $0x620] sm:$0xff] }
 0x444   : > { %2797 = vmatmul.f32.vlgmr.msra.gmra.mxu0 %v4380_v28  ;;  %2817 = vmatmul.f32.vlgmr.msra.gmra.mxu1 %v4382_v30  ;;  %v2578_v32 = vld [vmem:[#allocation18 + $0x1a8] sm:$0xff]  ;;  %v2585_v34 = vld [vmem:[#allocation18 + $0x1e0] sm:$0xff] }
 0x445   : > { %2913 = vmatpush.msrb.mxu2 %v2552_v41  ;;  %2933 = vmatpush.msrb.mxu3 %v2680_v42  ;;  %v2706_v13 = vld [vmem:[#allocation18 + $0x5a8] sm:$0xff]  ;;  %v2713_v16 = vld [vmem:[#allocation18 + $0x5e0] sm:$0xff] }
 0x446   : > { %2872 = vmatpush.msrb.mxu0 %v2559_v43  ;;  %2892 = vmatpush.msrb.mxu1 %v2687_v62  ;;  %v2570_v35 = vld [vmem:[#allocation18 + $0x168] sm:$0xff]  ;;  %v2577_v39 = vld [vmem:[#allocation18 + $0x1a0] sm:$0xff] }
 0x447   : > { %2914 = vmatpush.msrb.mxu2 %v2544_v44  ;;  %2934 = vmatpush.msrb.mxu3 %v2672_v45  ;;  %v2698_v36 = vld [vmem:[#allocation18 + $0x568] sm:$0xff]  ;;  %v2705_v40 = vld [vmem:[#allocation18 + $0x5a0] sm:$0xff] }
 0x448   : > { %2873 = vmatpush.msrb.mxu0 %v2551_v0  ;;  %2893 = vmatpush.msrb.mxu1 %v2679_v51  ;;  %v2562_v38 = vld [vmem:[#allocation18 + $0x128] sm:$0xff]  ;;  %v2569_v42 = vld [vmem:[#allocation18 + $0x160] sm:$0xff] }
 0x449   : > { %2915 = vmatpush.msrb.mxu2 %v2536_v25  ;;  %2935 = vmatpush.msrb.mxu3 %v2664_v48  ;;  %v2690_v41 = vld [vmem:[#allocation18 + $0x528] sm:$0xff]  ;;  %v2697_v43 = vld [vmem:[#allocation18 + $0x560] sm:$0xff] }
 0x44a   : > { %2874 = vmatpush.msrb.mxu0 %v2543_v37  ;;  %2894 = vmatpush.msrb.mxu1 %v2671_v10  ;;  %v2554_v62 = vld [vmem:[#allocation18 + $0xe8] sm:$0xff]  ;;  %v2561_v45 = vld [vmem:[#allocation18 + $0x120] sm:$0xff] }
 0x44b   : > { %2916 = vmatpush.msrb.mxu2 %v2528_v53  ;;  %2936 = vmatpush.msrb.mxu3 %v2656_v27  ;;  %v2682_v44 = vld [vmem:[#allocation18 + $0x4e8] sm:$0xff]  ;;  %v2689_v0 = vld [vmem:[#allocation18 + $0x520] sm:$0xff] }
 0x44c   : > { %2875 = vmatpush.msrb.mxu0 %v2535_v46  ;;  %2895 = vmatpush.msrb.mxu1 %v2663_v54  ;;  %v2546_v51 = vld [vmem:[#allocation18 + $0xa8] sm:$0xff]  ;;  %v2553_v48 = vld [vmem:[#allocation18 + $0xe0] sm:$0xff] }
 0x44d   : > { %2917 = vmatmul.f32.vlgmr.msrb.gmra.mxu2 %v4380_v28  ;;  %2937 = vmatmul.f32.vlgmr.msrb.gmra.mxu3 %v4382_v30  ;;  %v2674_v25 = vld [vmem:[#allocation18 + $0x4a8] sm:$0xff]  ;;  %v2681_v37 = vld [vmem:[#allocation18 + $0x4e0] sm:$0xff] }
 0x44e   : > { %2981 = vmatpush.msra.mxu2 %v2650_v3  ;;  %3001 = vmatpush.msra.mxu3 %v2778_v50  ;;  %v2538_v10 = vld [vmem:[#allocation18 + $0x68] sm:$0xff]  ;;  %v2545_v27 = vld [vmem:[#allocation18 + $0xa0] sm:$0xff] }
 0x44f   : > { %2876 = vmatpush.msrb.mxu0 %v2527_v47  ;;  %2896 = vmatpush.msrb.mxu1 %v2655_v49  ;;  %v2666_v53 = vld [vmem:[#allocation18 + $0x468] sm:$0xff]  ;;  %v2673_v46 = vld [vmem:[#allocation18 + $0x4a0] sm:$0xff]  ;;  %v2652_v49 = vld [vmem:[#allocation18 + $0x3f8] sm:$0xff] }
 0x450   : > { %2982 = vmatpush.msra.mxu2 %v2642_v52  ;;  %3002 = vmatpush.msra.mxu3 %v2770_v55  ;;  %v2530_v54 = vld [vmem:[#allocation18 + $0x28] sm:$0xff]  ;;  %v2537_v50 = vld [vmem:[#allocation18 + $0x60] sm:$0xff]  ;;  %v2780_v52 = vld [vmem:[#allocation18 + $0x7f8] sm:$0xff] }
 0x451   : > { %2941 = vmatpush.msra.mxu0 %v2649_v56  ;;  %2961 = vmatpush.msra.mxu1 %v2777_v57  ;;  %v2658_v3 = vld [vmem:[#allocation18 + $0x428] sm:$0xff]  ;;  %v2665_v47 = vld [vmem:[#allocation18 + $0x460] sm:$0xff]  ;;  %v2644_v57 = vld [vmem:[#allocation18 + $0x3b8] sm:$0xff] }
 0x452   : > { %2983 = vmatpush.msra.mxu2 %v2634_v58  ;;  %3003 = vmatpush.msra.mxu3 %v2762_v11  ;;  %v2529_v55 = vld [vmem:[#allocation18 + $0x20] sm:$0xff]  ;;  %v2772_v58 = vld [vmem:[#allocation18 + $0x7b8] sm:$0xff]  ;;  %v2651_v11 = vld [vmem:[#allocation18 + $0x3f0] sm:$0xff] }
 0x453   : > { %2942 = vmatpush.msra.mxu0 %v2641_v17  ;;  %2962 = vmatpush.msra.mxu1 %v2769_v59  ;;  %v2657_v56 = vld [vmem:[#allocation18 + $0x420] sm:$0xff]  ;;  %v2779_v17 = vld [vmem:[#allocation18 + $0x7f0] sm:$0xff]  ;;  %v2636_v59 = vld [vmem:[#allocation18 + $0x378] sm:$0xff] }
 0x454   : > { %2984 = vmatpush.msra.mxu2 %v2626_v4  ;;  %3004 = vmatpush.msra.mxu3 %v2754_v60  ;;  %v2764_v4 = vld [vmem:[#allocation18 + $0x778] sm:$0xff]  ;;  %v2643_v60 = vld [vmem:[#allocation18 + $0x3b0] sm:$0xff] }
 0x455   : > { %2943 = vmatpush.msra.mxu0 %v2633_v61  ;;  %2963 = vmatpush.msra.mxu1 %v2761_v63  ;;  %v2771_v61 = vld [vmem:[#allocation18 + $0x7b0] sm:$0xff]  ;;  %v2628_v63 = vld [vmem:[#allocation18 + $0x338] sm:$0xff] }
 0x456   : > { %2985 = vmatpush.msra.mxu2 %v2618_v2  ;;  %3005 = vmatpush.msra.mxu3 %v2746_v6  ;;  %v2756_v2 = vld [vmem:[#allocation18 + $0x738] sm:$0xff]  ;;  %v2635_v6 = vld [vmem:[#allocation18 + $0x370] sm:$0xff] }
 0x457   : > { %2944 = vmatpush.msra.mxu0 %v2625_v5  ;;  %2964 = vmatpush.msra.mxu1 %v2753_v18  ;;  %v2763_v5 = vld [vmem:[#allocation18 + $0x770] sm:$0xff]  ;;  %v2620_v18 = vld [vmem:[#allocation18 + $0x2f8] sm:$0xff] }
 0x458   : > { %2986 = vmatpush.msra.mxu2 %v2610_v7  ;;  %3006 = vmatpush.msra.mxu3 %v2738_v8  ;;  %v2748_v7 = vld [vmem:[#allocation18 + $0x6f8] sm:$0xff]  ;;  %v2627_v8 = vld [vmem:[#allocation18 + $0x330] sm:$0xff] }
 0x459   : > { %2945 = vmatpush.msra.mxu0 %v2617_v23  ;;  %2965 = vmatpush.msra.mxu1 %v2745_v9  ;;  %v2755_v23 = vld [vmem:[#allocation18 + $0x730] sm:$0xff]  ;;  %v2612_v9 = vld [vmem:[#allocation18 + $0x2b8] sm:$0xff] }
 0x45a   : > { %2987 = vmatpush.msra.mxu2 %v2602_v12  ;;  %3007 = vmatpush.msra.mxu3 %v2730_v14  ;;  %v2740_v12 = vld [vmem:[#allocation18 + $0x6b8] sm:$0xff]  ;;  %v2619_v14 = vld [vmem:[#allocation18 + $0x2f0] sm:$0xff] }
 0x45b   : > { %2946 = vmatpush.msra.mxu0 %v2609_v24  ;;  %2966 = vmatpush.msra.mxu1 %v2737_v15  ;;  %v2747_v24 = vld [vmem:[#allocation18 + $0x6f0] sm:$0xff]  ;;  %v2604_v15 = vld [vmem:[#allocation18 + $0x278] sm:$0xff] }
 0x45c   : > { %2877 = vmatmul.f32.vlgmr.msrb.gmra.mxu0 %v4380_v28  ;;  %2897 = vmatmul.f32.vlgmr.msrb.gmra.mxu1 %v4382_v30 }
 0x45d   : > { %2988 = vmatpush.msra.mxu2 %v2594_v19  ;;  %3008 = vmatpush.msra.mxu3 %v2722_v20  ;;  %v2732_v19 = vld [vmem:[#allocation18 + $0x678] sm:$0xff]  ;;  %v2611_v20 = vld [vmem:[#allocation18 + $0x2b0] sm:$0xff] }
 0x45e   : > { %2947 = vmatpush.msra.mxu0 %v2601_v29  ;;  %2967 = vmatpush.msra.mxu1 %v2729_v21  ;;  %v2739_v29 = vld [vmem:[#allocation18 + $0x6b0] sm:$0xff]  ;;  %v2596_v21 = vld [vmem:[#allocation18 + $0x238] sm:$0xff] }
 0x45f   : > { %2989 = vmatpush.msra.mxu2 %v2586_v22  ;;  %3009 = vmatpush.msra.mxu3 %v2714_v31  ;;  %v2724_v22 = vld [vmem:[#allocation18 + $0x638] sm:$0xff]  ;;  %v2603_v31 = vld [vmem:[#allocation18 + $0x270] sm:$0xff] }
 0x460   : > { %2948 = vmatpush.msra.mxu0 %v2593_v26  ;;  %2968 = vmatpush.msra.mxu1 %v2721_v33  ;;  %v2731_v26 = vld [vmem:[#allocation18 + $0x670] sm:$0xff]  ;;  %v2588_v33 = vld [vmem:[#allocation18 + $0x1f8] sm:$0xff] }
 0x461   : > { %2990 = vmatpush.msra.mxu2 %v2578_v32  ;;  %3010 = vmatpush.msra.mxu3 %v2706_v13  ;;  %v2716_v32 = vld [vmem:[#allocation18 + $0x5f8] sm:$0xff]  ;;  %v2595_v13 = vld [vmem:[#allocation18 + $0x230] sm:$0xff] }
 0x462   : > { %2949 = vmatpush.msra.mxu0 %v2585_v34  ;;  %2969 = vmatpush.msra.mxu1 %v2713_v16  ;;  %v2723_v34 = vld [vmem:[#allocation18 + $0x630] sm:$0xff]  ;;  %v2580_v16 = vld [vmem:[#allocation18 + $0x1b8] sm:$0xff] }
 0x463   : > { %2991 = vmatpush.msra.mxu2 %v2570_v35  ;;  %3011 = vmatpush.msra.mxu3 %v2698_v36  ;;  %v2708_v35 = vld [vmem:[#allocation18 + $0x5b8] sm:$0xff]  ;;  %v2587_v36 = vld [vmem:[#allocation18 + $0x1f0] sm:$0xff] }
 0x464   : > { %2950 = vmatpush.msra.mxu0 %v2577_v39  ;;  %2970 = vmatpush.msra.mxu1 %v2705_v40  ;;  %v2715_v39 = vld [vmem:[#allocation18 + $0x5f0] sm:$0xff]  ;;  %v2572_v40 = vld [vmem:[#allocation18 + $0x178] sm:$0xff] }
 0x465   : > { %2992 = vmatpush.msra.mxu2 %v2562_v38  ;;  %3012 = vmatpush.msra.mxu3 %v2690_v41  ;;  %v2700_v38 = vld [vmem:[#allocation18 + $0x578] sm:$0xff]  ;;  %v2579_v41 = vld [vmem:[#allocation18 + $0x1b0] sm:$0xff] }
 0x466   : > { %2951 = vmatpush.msra.mxu0 %v2569_v42  ;;  %2971 = vmatpush.msra.mxu1 %v2697_v43  ;;  %v2707_v42 = vld [vmem:[#allocation18 + $0x5b0] sm:$0xff]  ;;  %v2564_v43 = vld [vmem:[#allocation18 + $0x138] sm:$0xff] }
 0x467   : > { %2993 = vmatpush.msra.mxu2 %v2554_v62  ;;  %3013 = vmatpush.msra.mxu3 %v2682_v44  ;;  %v2692_v62 = vld [vmem:[#allocation18 + $0x538] sm:$0xff]  ;;  %v2571_v44 = vld [vmem:[#allocation18 + $0x170] sm:$0xff] }
 0x468   : > { %2952 = vmatpush.msra.mxu0 %v2561_v45  ;;  %2972 = vmatpush.msra.mxu1 %v2689_v0  ;;  %v2699_v45 = vld [vmem:[#allocation18 + $0x570] sm:$0xff]  ;;  %v2556_v0 = vld [vmem:[#allocation18 + $0xf8] sm:$0xff] }
 0x469   : > { %2994 = vmatpush.msra.mxu2 %v2546_v51  ;;  %3014 = vmatpush.msra.mxu3 %v2674_v25  ;;  %v2684_v51 = vld [vmem:[#allocation18 + $0x4f8] sm:$0xff]  ;;  %v2563_v25 = vld [vmem:[#allocation18 + $0x130] sm:$0xff] }
 0x46a   : > { %2953 = vmatpush.msra.mxu0 %v2553_v48  ;;  %2973 = vmatpush.msra.mxu1 %v2681_v37  ;;  %v2691_v48 = vld [vmem:[#allocation18 + $0x530] sm:$0xff]  ;;  %v2548_v37 = vld [vmem:[#allocation18 + $0xb8] sm:$0xff] }
 0x46b   : > { %2995 = vmatpush.msra.mxu2 %v2538_v10  ;;  %3015 = vmatpush.msra.mxu3 %v2666_v53  ;;  %v2676_v10 = vld [vmem:[#allocation18 + $0x4b8] sm:$0xff]  ;;  %v2555_v53 = vld [vmem:[#allocation18 + $0xf0] sm:$0xff] }
 0x46c   : > { %2954 = vmatpush.msra.mxu0 %v2545_v27  ;;  %2974 = vmatpush.msra.mxu1 %v2673_v46  ;;  %v2683_v27 = vld [vmem:[#allocation18 + $0x4f0] sm:$0xff]  ;;  %v2540_v46 = vld [vmem:[#allocation18 + $0x78] sm:$0xff] }
 0x46d   : > { %2996 = vmatpush.msra.mxu2 %v2530_v54  ;;  %3016 = vmatpush.msra.mxu3 %v2658_v3  ;;  %v2668_v54 = vld [vmem:[#allocation18 + $0x478] sm:$0xff]  ;;  %v2547_v3 = vld [vmem:[#allocation18 + $0xb0] sm:$0xff] }
 0x46e   : > { %2955 = vmatpush.msra.mxu0 %v2537_v50  ;;  %2975 = vmatpush.msra.mxu1 %v2665_v47  ;;  %v2675_v50 = vld [vmem:[#allocation18 + $0x4b0] sm:$0xff]  ;;  %v2532_v47 = vld [vmem:[#allocation18 + $0x38] sm:$0xff] }
 0x46f   : > { %3061 = vmatpush.msrb.mxu2 %v2652_v49  ;;  %3081 = vmatpush.msrb.mxu3 %v2780_v52  ;;  %v2660_v49 = vld [vmem:[#allocation18 + $0x438] sm:$0xff]  ;;  %v2539_v52 = vld [vmem:[#allocation18 + $0x70] sm:$0xff] }
 0x470   : > { %2956 = vmatpush.msra.mxu0 %v2529_v55  ;;  %2976 = vmatpush.msra.mxu1 %v2657_v56  ;;  %v2667_v55 = vld [vmem:[#allocation18 + $0x470] sm:$0xff] }
 0x471   : > { %3062 = vmatpush.msrb.mxu2 %v2644_v57  ;;  %3082 = vmatpush.msrb.mxu3 %v2772_v58  ;;  %v2531_v56 = vld [vmem:[#allocation18 + $0x30] sm:$0xff] }
 0x472   : > { %3021 = vmatpush.msrb.mxu0 %v2651_v11  ;;  %3041 = vmatpush.msrb.mxu1 %v2779_v17  ;;  %v2659_v57 = vld [vmem:[#allocation18 + $0x430] sm:$0xff]  ;;  %v3105_v17 = vld [vmem:[%s4401_s21 + $0x8] sm:$0xff] }
 0x473   : > { %3063 = vmatpush.msrb.mxu2 %v2636_v59  ;;  %3083 = vmatpush.msrb.mxu3 %v2764_v4 }
 0x474   : > { %3022 = vmatpush.msrb.mxu0 %v2643_v60  ;;  %3042 = vmatpush.msrb.mxu1 %v2771_v61  ;;  %v3104_v60 = vld [vmem:[%s4401_s21] sm:$0xff] }
 0x475   : > { %3064 = vmatpush.msrb.mxu2 %v2628_v63  ;;  %3084 = vmatpush.msrb.mxu3 %v2756_v2 }
 0x476   : > { %2997 = vmatmul.f32.vlgmr.msra.gmra.mxu2 %v4380_v28  ;;  %3017 = vmatmul.f32.vlgmr.msra.gmra.mxu3 %v4382_v30 }
 0x477   : > { %3023 = vmatpush.msrb.mxu0 %v2635_v6  ;;  %3043 = vmatpush.msrb.mxu1 %v2763_v5 }
 0x478   : > { %3065 = vmatpush.msrb.mxu2 %v2620_v18  ;;  %3085 = vmatpush.msrb.mxu3 %v2748_v7 }
 0x479   : > { %3024 = vmatpush.msrb.mxu0 %v2627_v8  ;;  %3044 = vmatpush.msrb.mxu1 %v2755_v23 }
 0x47a   : > { %3066 = vmatpush.msrb.mxu2 %v2612_v9  ;;  %3086 = vmatpush.msrb.mxu3 %v2740_v12 }
 0x47b   : > { %3025 = vmatpush.msrb.mxu0 %v2619_v14  ;;  %3045 = vmatpush.msrb.mxu1 %v2747_v24  ;;  %v3107_v14 = vld [vmem:[%s4401_s21 + $0x18] sm:$0xff] }
 0x47c   : > { %3067 = vmatpush.msrb.mxu2 %v2604_v15  ;;  %3087 = vmatpush.msrb.mxu3 %v2732_v19 }
 0x47d   : > { %2957 = vmatmul.f32.vlgmr.msra.gmra.mxu0 %v4380_v28  ;;  %2977 = vmatmul.f32.vlgmr.msra.gmra.mxu1 %v4382_v30 }
 0x47e   : > { %3026 = vmatpush.msrb.mxu0 %v2611_v20  ;;  %3046 = vmatpush.msrb.mxu1 %v2739_v29 }
 0x47f   : > { %3068 = vmatpush.msrb.mxu2 %v2596_v21  ;;  %3088 = vmatpush.msrb.mxu3 %v2724_v22  ;;  %v2513_v22 = vstv %s3809_s19  ;;  %s2511_s19 = sadd.s32 1, %s3809_s19  }
 0x480   : > { %3027 = vmatpush.msrb.mxu0 %v2603_v31  ;;  %3047 = vmatpush.msrb.mxu1 %v2731_v26  ;;  %vm4409_vm14 = vcmp.lt.s32.totalorder %v2513_v22, %v3926_v1  ;;  %p2508_p1 = scmp.ge.s32.totalorder %s2511_s19, 8  }
 0x481   : > { %3069 = vmatpush.msrb.mxu2 %v2588_v33  ;;  %3089 = vmatpush.msrb.mxu3 %v2716_v32  ;;  %s3827_s27 = smov (%p2508_p1), [#allocation22]   ;;  %s3361_s3 = sshll.u32 (%p2508_p1), %s4464_s10, 4  ;;  %s3362_s3 = int_to_ptr.hbm [resolvable:$true] %s3361_s3 }
 0x482   : > { %3028 = vmatpush.msrb.mxu0 %v2595_v13  ;;  %3048 = vmatpush.msrb.mxu1 %v2723_v34  ;;  %v3106_v34 = vld [vmem:[%s4401_s21 + $0x10] sm:$0xff]  ;;  %s3359_s2 = sshll.u32 (%p2508_p1), %s3827_s27, 4  ;;  %s3360_s2 = int_to_ptr.vmem [resolvable:$true] %s3359_s2 }
 0x483   : > { %3070 = vmatpush.msrb.mxu2 %v2580_v16  ;;  %3090 = vmatpush.msrb.mxu3 %v2708_v35 }
 0x484   : > { %3029 = vmatpush.msrb.mxu0 %v2587_v36  ;;  %3049 = vmatpush.msrb.mxu1 %v2715_v39 }
 0x485   : > { %3071 = vmatpush.msrb.mxu2 %v2572_v40  ;;  %3091 = vmatpush.msrb.mxu3 %v2700_v38 }
 0x486   : > { %3030 = vmatpush.msrb.mxu0 %v2579_v41  ;;  %3050 = vmatpush.msrb.mxu1 %v2707_v42  ;;  %v3117_v42 = vld [vmem:[%s4427_s24 + $0x30] sm:$0xff] }
 0x487   : > { %3072 = vmatpush.msrb.mxu2 %v2564_v43  ;;  %3092 = vmatpush.msrb.mxu3 %v2692_v62 }
 0x488   : > { %3031 = vmatpush.msrb.mxu0 %v2571_v44  ;;  %3051 = vmatpush.msrb.mxu1 %v2699_v45 }
 0x489   : > { %3073 = vmatpush.msrb.mxu2 %v2556_v0  ;;  %3093 = vmatpush.msrb.mxu3 %v2684_v51 }
 0x48a   : > { %3032 = vmatpush.msrb.mxu0 %v2563_v25  ;;  %3052 = vmatpush.msrb.mxu1 %v2691_v48 }
 0x48b   : > { %3074 = vmatpush.msrb.mxu2 %v2548_v37  ;;  %3094 = vmatpush.msrb.mxu3 %v2676_v10  ;;  %v2523_v10 = vld [vmem:[#allocation5 + $0x8] sm:$0xff] }
 0x48c   : > { %3033 = vmatpush.msrb.mxu0 %v2555_v53  ;;  %3053 = vmatpush.msrb.mxu1 %v2683_v27  ;;  %v3826_v53 = vmov 0.0  }
 0x48d   : > { %3075 = vmatpush.msrb.mxu2 %v2540_v46  ;;  %3095 = vmatpush.msrb.mxu3 %v2668_v54  ;;  %v3413_v27 = vsel %vm4409_vm14, 1.0, %v3826_v53 }
 0x48e   : > { %3034 = vmatpush.msrb.mxu0 %v2547_v3  ;;  %3054 = vmatpush.msrb.mxu1 %v2675_v50 }
 0x48f   : > { %3076 = vmatpush.msrb.mxu2 %v2532_v47  ;;  %3096 = vmatpush.msrb.mxu3 %v2660_v49  ;;  %v3257_v47 = vsub.f32 1.0, %v3413_v27 }
 0x490   : > { %3035 = vmatpush.msrb.mxu0 %v2539_v52  ;;  %3055 = vmatpush.msrb.mxu1 %v2667_v55 }
 0x491   : > { %3077 = vmatmul.f32.vlgmr.msrb.gmra.mxu2 %v4380_v28  ;;  %3097 = vmatmul.f32.vlgmr.msrb.gmra.mxu3 %v4382_v30 }
 0x492   : > { %3036 = vmatpush.msrb.mxu0 %v2531_v56  ;;  %3056 = vmatpush.msrb.mxu1 %v2659_v57 }
 0x493   : > { %3037 = vmatmul.f32.vlgmr.msrb.gmra.mxu0 %v4380_v28  ;;  %3057 = vmatmul.f32.vlgmr.msrb.gmra.mxu1 %v4382_v30 }
 0x4bf   : > { %v2858_v11 = vpop.f32.mrf.mxu3 }
 0x4c0   : > { %v2838_v58 = vpop.f32.mrf.mxu2 }
 0x4c1   : > { %v2798_v59 = vpop.f32.mrf.mxu0  ;;  %v2818_v4 = vpop.f32.mrf.mxu1  ;;  %v2859_v61 = vadd.f32 %v2858_v11, %v2838_v58  ;;  %v3266_v58 = vmul.f32 %v3257_v47, %v2523_v10 }
 0x4c2   : > { %v2819_v63 = vadd.f32 %v2818_v4, %v2798_v59 }
 0x4c3   : > { %v3109_v2 = vadd.f32 %v3105_v17, %v2859_v61 }
 0x4c4   : > { %v3108_v6 = vadd.f32 %v3104_v60, %v2819_v63 }
 0x4c5   : > { %v3420_v5 = vmul.f32 -1.442695, %v3109_v2 }
 0x4c6   : > { %v3419_v18 = vmul.f32 -1.442695, %v3108_v6 }
 0x4c7   : > { %3509 = vpow2.f32 %v3420_v5 }
 0x4c8   : > { %3511 = vpow2.f32 %v3419_v18 }
 0x4cd   : > { %v3510_v30 = vpop.eup %3509 }
 0x4ce   : > { %v3512_v7 = vpop.eup %3511  ;;  %v3145_v8 = vadd.f32 1.0, %v3510_v30 }
 0x4cf   : > { %v3126_v23 = vadd.f32 1.0, %v3512_v7  ;;  %v3258_v7 = vmul.f32 %v3257_v47, %v4380_v28 }
 0x4d0   : > { %3513 = vrcp.f32 %v3145_v8  ;;  %v2918_v9 = vpop.f32.mrf.mxu2  ;;  %v2938_v12 = vpop.f32.mrf.mxu3  ;;  %vm3151_vm10 = vweird.f32 %v3145_v8  ;;  %v3157_v33 = vand.u32 2147483648, %v3145_v8  ;;  %v3155_v16 = vand.u32 2147483647, %v3145_v8 }
 0x4d1   : > { %3515 = vrcp.f32 %v3126_v23  ;;  %v2939_v24 = vadd.f32 %v2938_v12, %v2918_v9  ;;  %v3138_v39 = vand.u32 2147483648, %v3126_v23  ;;  %vm3132_vm12 = vweird.f32 %v3126_v23 }
 0x4d2   : > { %v3136_v38 = vand.u32 2147483647, %v3126_v23  ;;  %v3158_v45 = vor.u32 1.1754944e-38, %v3157_v33  ;;  %vm3156_vm0 = vcmp.eq.f32.partialorder %v3155_v16, 8.507059e+37 }
 0x4d3   : > { %v3111_v15 = vadd.f32 %v3107_v14, %v2939_v24  ;;  %v3139_v48 = vor.u32 1.1754944e-38, %v3138_v39  ;;  %v2517_v39 = vstv %s2512_s22 }
 0x4d4   : > { %vm3137_vm2 = vcmp.eq.f32.partialorder %v3136_v38, 8.507059e+37 }
 0x4d5   : > { %v3421_v19 = vmul.f32 -1.442695, %v3111_v15  ;;  %v3116_v15 = vld [vmem:[%s4427_s24 + $0x28] sm:$0xff] }
 0x4d6   : > { %v3514_v20 = vpop.eup %3513 }
 0x4d7   : > { %v3516_v29 = vpop.eup %3515  ;;  %v3147_v21 = vmul.f32 %v3514_v20, %v3145_v8  ;;  %3517 = vpow2.f32 %v3421_v19  ;;  %vm3152_vm11 = vweird.f32 %v3514_v20  ;;  %v3249_v8 = vld [vmem:[#allocation6 + $0x8] sm:$0xff] }
 0x4d8   : > { %v3128_v31 = vmul.f32 %v3516_v29, %v3126_v23  ;;  %vm3133_vm13 = vweird.f32 %v3516_v29  ;;  %vm4414_vm15 = vmor %vm3151_vm10, %vm3152_vm11  ;;  %vm2518_vm11 = vcmp.lt.s32.totalorder %v2517_v39, %v3926_v1  ;;  %v3308_v39 = vld [vmem:[#allocation21 + $0xf8] sm:$0xff] (%p2508_p1)  ;;  %v3286_v1 = vld [vmem:[#allocation21 + $0x48] sm:$0xff] (%p2508_p1) }
 0x4d9   : > { %v3148_v26 = vsub.f32 1.0, %v3147_v21  ;;  %v2878_v32 = vpop.f32.mrf.mxu0  ;;  %v2898_v13 = vpop.f32.mrf.mxu1  ;;  %vm3134_vm1 = vmor %vm3132_vm12, %vm3133_vm13  ;;  %3333 = vmatpush.msra.mxu1 (%p2508_p1), %v3308_v39 }
 0x4da   : > { %v3129_v35 = vsub.f32 1.0, %v3128_v31  ;;  %v2899_v36 = vadd.f32 %v2898_v13, %v2878_v32 }
 0x4db   : > { %v3149_v40 = vmul.f32 %v3514_v20, %v3148_v26 }
 0x4dc   : > { %v3110_v43 = vadd.f32 %v3106_v34, %v2899_v36  ;;  %v3130_v62 = vmul.f32 %v3516_v29, %v3129_v35 }
 0x4dd   : > { %v3518_v44 = vpop.eup %3517  ;;  %v3150_v0 = vadd.f32 %v3514_v20, %v3149_v40 }
 0x4de   : > { %v3165_v51 = vadd.f32 1.0, %v3518_v44  ;;  %v3131_v25 = vadd.f32 %v3516_v29, %v3130_v62  ;;  %3519 = vtanh.f32 %v3110_v43 }
 0x4df   : > { %v3154_v37 = vsel %vm4414_vm15, %v3514_v20, %v3150_v0 }
 0x4e0   : > { %3521 = vrcp.f32 %v3165_v51  ;;  %v3135_v46 = vsel %vm3134_vm1, %v3516_v29, %v3131_v25  ;;  %v3159_v54 = vsel %vm3156_vm0, %v3158_v45, %v3154_v37  ;;  %vm3171_vm3 = vweird.f32 %v3165_v51  ;;  %v3115_v29 = vld [vmem:[%s4427_s24 + $0x20] sm:$0xff] }
 0x4e1   : > { %v3140_v3 = vsel %vm3137_vm2, %v3139_v48, %v3135_v46  ;;  %v3181_v50 = vmul.f32 %v3159_v54, %v2523_v10  ;;  %v3177_v11 = vand.u32 2147483648, %v3165_v51  ;;  %v3175_v59 = vand.u32 2147483647, %v3165_v51  ;;  %v3118_v54 = vld [vmem:[%s4427_s24 + $0x38] sm:$0xff] }
 0x4e3   : > { %v3178_v63 = vor.u32 1.1754944e-38, %v3177_v11  ;;  %vm3176_vm6 = vcmp.eq.f32.partialorder %v3175_v59, 8.507059e+37 }
 0x4e4   : > { %v3520_v49 = vpop.eup %3519 }
 0x4e5   : > { %v3182_v52 = vmul.f32 %v3520_v49, %v3140_v3  ;;  %v3298_v3 = vld [vmem:[#allocation21 + $0xa8] sm:$0xff] (%p2508_p1) }
 0x4e6   : > { %v3522_v55 = vpop.eup %3521 }
 0x4e7   : > { %v3167_v56 = vmul.f32 %v3522_v55, %v3165_v51  ;;  %v3183_v57 = vadd.f32 %v3182_v52, %v3181_v50  ;;  %vm3172_vm4 = vweird.f32 %v3522_v55 }
 0x4e8   : > { %vm3173_vm5 = vmor %vm3171_vm3, %vm3172_vm4 }
 0x4e9   : > { %v3168_v17 = vsub.f32 1.0, %v3167_v56  ;;  %v3265_v4 = vmul.f32 %v3413_v27, %v3183_v57  ;;  %3523 = vtanh.f32 %v3183_v57  ;;  %v3414_v56 = vsel %vm2518_vm11, 1.0, %v3826_v53  ;;  %v2524_v57 = vld [vmem:[#allocation5] sm:$0xff] }
 0x4eb   : > { %v3169_v60 = vmul.f32 %v3522_v55, %v3168_v17  ;;  %v3267_v61 = vadd.f32 %v3266_v58, %v3265_v4 }
 0x4ed   : > { %v3170_v2 = vadd.f32 %v3522_v55, %v3169_v60  ;;  %3268 = vst [vmem:[#allocation5 + $0x8] sm:$0xff] %v3267_v61  ;;  %v3261_v61 = vsub.f32 1.0, %v3414_v56 }
 0x4ef   : > { %v3174_v6 = vsel %vm3173_vm5, %v3522_v55, %v3170_v2  ;;  %v3524_v5 = vpop.eup %3523 }
 0x4f0   : > { %v3179_v18 = vsel %vm3176_vm6, %v3178_v63, %v3174_v6 }
 0x4f1   : > { %v3185_v30 = vmul.f32 %v3524_v5, %v3179_v18  ;;  %v3270_v18 = vmul.f32 %v3261_v61, %v2524_v57 }
 0x4f3   : > { %v3250_v23 = vmul.f32 %v3413_v27, %v3185_v30 }
 0x4f5   : > { %v3251_v9 = vadd.f32 %v3250_v23, %v3249_v8  ;;  %v3259_v12 = vadd.f32 %v3258_v7, %v3250_v23 }
 0x4f7   : > { %3252 = vst [vmem:[#allocation6 + $0x8] sm:$0xff] %v3251_v9 }
 0x4f8   : > { %3260 = vst [vmem:[#allocation4] sm:$0xff] %v3259_v12 }
 0x4f9   : > { %v2998_v14 = vpop.f32.mrf.mxu2  ;;  %v3018_v24 = vpop.f32.mrf.mxu3 }
 0x4fa   : > { %v2958_v19 = vpop.f32.mrf.mxu0  ;;  %v2978_v20 = vpop.f32.mrf.mxu1  ;;  %v3019_v21 = vadd.f32 %v3018_v24, %v2998_v14 }
 0x4fb   : > { %v2979_v28 = vadd.f32 %v2978_v20, %v2958_v19 }
 0x4fc   : > { %v3120_v22 = vadd.f32 %v3116_v15, %v3019_v21 }
 0x4fd   : > { %v3119_v31 = vadd.f32 %v3115_v29, %v2979_v28 }
 0x4fe   : > { %v3423_v26 = vmul.f32 -1.442695, %v3120_v22 }
 0x4ff   : > { %v3422_v33 = vmul.f32 -1.442695, %v3119_v31  ;;  %v3541_v31 = vld [vmem:[#allocation4 + $0x8] sm:$0xff] }
 0x500   : > { %3525 = vpow2.f32 %v3423_v26  ;;  %v3262_v26 = vmul.f32 %v3541_v31, %v3261_v61 }
 0x501   : > { %3527 = vpow2.f32 %v3422_v33 }
 0x506   : > { %v3526_v32 = vpop.eup %3525 }
 0x507   : > { %v3528_v13 = vpop.eup %3527  ;;  %v3208_v34 = vadd.f32 1.0, %v3526_v32  ;;  %v3253_v32 = vld [vmem:[#allocation6] sm:$0xff] }
 0x508   : > { %v3189_v16 = vadd.f32 1.0, %v3528_v13 }
 0x509   : > { %3529 = vrcp.f32 %v3208_v34  ;;  %vm3214_vm7 = vweird.f32 %v3208_v34  ;;  %v3220_v62 = vand.u32 2147483648, %v3208_v34  ;;  %v3218_v45 = vand.u32 2147483647, %v3208_v34 }
 0x50a   : > { %3531 = vrcp.f32 %v3189_v16  ;;  %vm3195_vm9 = vweird.f32 %v3189_v16  ;;  %v3201_v51 = vand.u32 2147483648, %v3189_v16  ;;  %v3199_v37 = vand.u32 2147483647, %v3189_v16 }
 0x50b   : > { %v3221_v50 = vor.u32 1.1754944e-38, %v3220_v62  ;;  %vm3219_vm14 = vcmp.eq.f32.partialorder %v3218_v45, 8.507059e+37  ;;  %v3288_v62 = vld [vmem:[#allocation21 + $0x58] sm:$0xff] (%p2508_p1)  ;;  %v3287_v45 = vld [vmem:[#allocation21 + $0x50] sm:$0xff] (%p2508_p1) }
 0x50c   : > { %v3202_v52 = vor.u32 1.1754944e-38, %v3201_v51  ;;  %vm3200_vm15 = vcmp.eq.f32.partialorder %v3199_v37, 8.507059e+37  ;;  %v3302_v51 = vld [vmem:[#allocation21 + $0xc8] sm:$0xff] (%p2508_p1)  ;;  %v3284_v37 = vld [vmem:[#allocation21 + $0x38] sm:$0xff] (%p2508_p1) }
 0x50f   : > { %v3530_v35 = vpop.eup %3529 }
 0x510   : > { %v3532_v36 = vpop.eup %3531  ;;  %v3210_v40 = vmul.f32 %v3530_v35, %v3208_v34  ;;  %v3038_v38 = vpop.f32.mrf.mxu0  ;;  %vm3215_vm8 = vweird.f32 %v3530_v35 }
 0x511   : > { %v3058_v41 = vpop.f32.mrf.mxu1  ;;  %v3191_v43 = vmul.f32 %v3532_v36, %v3189_v16  ;;  %vm3196_vm10 = vweird.f32 %v3532_v36  ;;  %vm4437_vm12 = vmor %vm3214_vm7, %vm3215_vm8 }
 0x512   : > { %v3059_v44 = vadd.f32 %v3058_v41, %v3038_v38  ;;  %v3211_v0 = vsub.f32 1.0, %v3210_v40  ;;  %vm3197_vm13 = vmor %vm3195_vm9, %vm3196_vm10  ;;  %v3307_v40 = vld [vmem:[#allocation21 + $0xf0] sm:$0xff] (%p2508_p1)  ;;  %v3290_v38 = vld [vmem:[#allocation21 + $0x68] sm:$0xff] (%p2508_p1) }
 0x513   : > { %v3192_v25 = vsub.f32 1.0, %v3191_v43  ;;  %v3306_v41 = vld [vmem:[#allocation21 + $0xe8] sm:$0xff] (%p2508_p1)  ;;  %3334 = vmatpush.msra.mxu1 (%p2508_p1), %v3307_v40  ;;  %v3305_v43 = vld [vmem:[#allocation21 + $0xe0] sm:$0xff] (%p2508_p1) }
 0x514   : > { %v3121_v48 = vadd.f32 %v3117_v42, %v3059_v44  ;;  %v3212_v10 = vmul.f32 %v3530_v35, %v3211_v0  ;;  %v3078_v27 = vpop.f32.mrf.mxu2  ;;  %v3098_v46 = vpop.f32.mrf.mxu3  ;;  %v3289_v42 = vld [vmem:[#allocation21 + $0x60] sm:$0xff] (%p2508_p1)  ;;  %v3304_v44 = vld [vmem:[#allocation21 + $0xd8] sm:$0xff] (%p2508_p1)  ;;  %v3303_v0 = vld [vmem:[#allocation21 + $0xd0] sm:$0xff] (%p2508_p1) }
 0x515   : > { %v3193_v47 = vmul.f32 %v3532_v36, %v3192_v25  ;;  %v3099_v49 = vadd.f32 %v3098_v46, %v3078_v27  ;;  %3335 = vmatpush.msra.mxu1 (%p2508_p1), %v3306_v41  ;;  %v3285_v25 = vld [vmem:[#allocation21 + $0x40] sm:$0xff] (%p2508_p1)  ;;  %v3283_v27 = vld [vmem:[#allocation21 + $0x30] sm:$0xff] (%p2508_p1) }
 0x516   : > { %3533 = vtanh.f32 %v3121_v48  ;;  %v3213_v55 = vadd.f32 %v3530_v35, %v3212_v10  ;;  %v3301_v48 = vld [vmem:[#allocation21 + $0xc0] sm:$0xff] (%p2508_p1)  ;;  %v3300_v10 = vld [vmem:[#allocation21 + $0xb8] sm:$0xff] (%p2508_p1)  ;;  %v3299_v46 = vld [vmem:[#allocation21 + $0xb0] sm:$0xff] (%p2508_p1) }
 0x517   : > { %v3194_v58 = vadd.f32 %v3532_v36, %v3193_v47  ;;  %v3122_v11 = vadd.f32 %v3118_v54, %v3099_v49  ;;  %3336 = vmatpush.msra.mxu1 (%p2508_p1), %v3305_v43  ;;  %v3282_v54 = vld [vmem:[#allocation21 + $0x28] sm:$0xff] (%p2508_p1)  ;;  %v3297_v47 = vld [vmem:[#allocation21 + $0xa0] sm:$0xff] (%p2508_p1)  ;;  %v3280_v49 = vld [vmem:[#allocation21 + $0x18] sm:$0xff] (%p2508_p1) }
 0x518   : > { %v3217_v17 = vsel %vm4437_vm12, %v3530_v35, %v3213_v55  ;;  %v3292_v35 = vld [vmem:[#allocation21 + $0x78] sm:$0xff] (%p2508_p1)  ;;  %v3279_v55 = vld [vmem:[#allocation21 + $0x10] sm:$0xff] (%p2508_p1) }
 0x519   : > { %v3198_v59 = vsel %vm3197_vm13, %v3532_v36, %v3194_v58  ;;  %v3222_v4 = vsel %vm3219_vm14, %v3221_v50, %v3217_v17  ;;  %v3424_v60 = vmul.f32 -1.442695, %v3122_v11  ;;  %v3291_v36 = vld [vmem:[#allocation21 + $0x70] sm:$0xff] (%p2508_p1)  ;;  %3313 = vmatpush.msra.mxu0 (%p2508_p1), %v3292_v35  ;;  %3337 = vmatpush.msra.mxu1 (%p2508_p1), %v3304_v44  ;;  %v3281_v50 = vld [vmem:[#allocation21 + $0x20] sm:$0xff] (%p2508_p1)  ;;  %v3278_v11 = vld [vmem:[#allocation21 + $0x8] sm:$0xff] (%p2508_p1) }
 0x51a   : > { %v3203_v63 = vsel %vm3200_vm15, %v3202_v52, %v3198_v59  ;;  %v3244_v2 = vmul.f32 %v3222_v4, %v2524_v57  ;;  %v3296_v52 = vld [vmem:[#allocation21 + $0x98] sm:$0xff] (%p2508_p1)  ;;  %v3273_v57 = vld [vmem:[#allocation6 + $0x8] sm:$0xff] (%p2508_p1)  ;;  %v3294_v17 = vld [vmem:[#allocation21 + $0x88] sm:$0xff] (%p2508_p1) }
 0x51b   : > { %3535 = vpow2.f32 %v3424_v60  ;;  %3314 = vmatpush.msra.mxu0 (%p2508_p1), %v3291_v36  ;;  %3338 = vmatpush.msra.mxu1 (%p2508_p1), %v3303_v0  ;;  %v3277_v59 = vld [vmem:[#allocation21] sm:$0xff] (%p2508_p1)  ;;  %v3275_v4 = vmul.f32 (%p2508_p1), 0.125, %v3273_v57 }
 0x51c   : > { %v3534_v6 = vpop.eup %3533  ;;  %v3293_v60 = vld [vmem:[#allocation21 + $0x80] sm:$0xff] (%p2508_p1) }
 0x51d   : > { %v3245_v5 = vmul.f32 %v3534_v6, %v3203_v63  ;;  %3315 = vmatpush.msra.mxu0 (%p2508_p1), %v3290_v38  ;;  %3339 = vmatpush.msra.mxu1 (%p2508_p1), %v3302_v51  ;;  %v3542_v63 = vld [vmem:[%s4463_s9] ss:$0 sm:$0xff] (%p2508_p1) }
 0x51f   : > { %v3246_v30 = vadd.f32 %v3245_v5, %v3244_v2  ;;  %3316 = vmatpush.msra.mxu0 (%p2508_p1), %v3289_v42  ;;  %3340 = vmatpush.msra.mxu1 (%p2508_p1), %v3301_v48 }
 0x521   : > { %v3269_v7 = vmul.f32 %v3414_v56, %v3246_v30  ;;  %v3536_v53 = vpop.eup %3535  ;;  %3317 = vmatpush.msra.mxu0 (%p2508_p1), %v3288_v62  ;;  %3341 = vmatpush.msra.mxu1 (%p2508_p1), %v3300_v10 }
 0x522   : > { %v3228_v23 = vadd.f32 1.0, %v3536_v53 }
 0x523   : > { %v3271_v8 = vadd.f32 %v3270_v18, %v3269_v7  ;;  %3318 = vmatpush.msra.mxu0 (%p2508_p1), %v3287_v45  ;;  %3342 = vmatpush.msra.mxu1 (%p2508_p1), %v3299_v46 }
 0x524   : > { %3537 = vrcp.f32 %v3228_v23  ;;  %v3240_v24 = vand.u32 2147483648, %v3228_v23  ;;  %v3238_v19 = vand.u32 2147483647, %v3228_v23  ;;  %vm3234_vm1 = vweird.f32 %v3228_v23 }
 0x525   : > { %3272 = vst [vmem:[#allocation5] sm:$0xff] %v3271_v8  ;;  %3539 = vtanh.f32 %v3246_v30  ;;  %3319 = vmatpush.msra.mxu0 (%p2508_p1), %v3286_v1  ;;  %3343 = vmatpush.msra.mxu1 (%p2508_p1), %v3298_v3 }
 0x526   : > { %v3241_v29 = vor.u32 1.1754944e-38, %v3240_v24  ;;  %vm3239_vm3 = vcmp.eq.f32.partialorder %v3238_v19, 8.507059e+37 }
 0x527   :  { %3320 = vmatpush.msra.mxu0 (%p2508_p1), %v3285_v25  ;;  %3344 = vmatpush.msra.mxu1 (%p2508_p1), %v3297_v47 }
 0x529   :  { %3321 = vmatpush.msra.mxu0 (%p2508_p1), %v3284_v37  ;;  %3345 = vmatpush.msra.mxu1 (%p2508_p1), %v3296_v52 }
 0x52a   : > { %v3538_v9 = vpop.eup %3537 }
 0x52b   : > { %v3230_v12 = vmul.f32 %v3538_v9, %v3228_v23  ;;  %vm3235_vm0 = vweird.f32 %v3538_v9  ;;  %v3540_v28 = vpop.eup %3539  ;;  %3322 = vmatpush.msra.mxu0 (%p2508_p1), %v3283_v27 }
 0x52c   : > { %vm3236_vm2 = vmor %vm3234_vm1, %vm3235_vm0 }
 0x52d   : > { %v3231_v14 = vsub.f32 1.0, %v3230_v12  ;;  %3323 = vmatpush.msra.mxu0 (%p2508_p1), %v3282_v54 }
 0x52f   : > { %v3232_v15 = vmul.f32 %v3538_v9, %v3231_v14  ;;  %3324 = vmatpush.msra.mxu0 (%p2508_p1), %v3281_v50 }
 0x531   : > { %v3233_v20 = vadd.f32 %v3538_v9, %v3232_v15  ;;  %3325 = vmatpush.msra.mxu0 (%p2508_p1), %v3280_v49 }
 0x533   : > { %v3237_v21 = vsel %vm3236_vm2, %v3538_v9, %v3233_v20  ;;  %3326 = vmatpush.msra.mxu0 (%p2508_p1), %v3279_v55 }
 0x534   : > { %v3242_v22 = vsel %vm3239_vm3, %v3241_v29, %v3237_v21 }
 0x535   : > { %v3248_v33 = vmul.f32 %v3540_v28, %v3242_v22  ;;  %3327 = vmatpush.msra.mxu0 (%p2508_p1), %v3278_v11 }
 0x537   : > { %v3254_v13 = vmul.f32 %v3414_v56, %v3248_v33  ;;  %v3295_v56 = vld [vmem:[#allocation21 + $0x90] sm:$0xff] (%p2508_p1)  ;;  %3328 = vmatpush.msra.mxu0 (%p2508_p1), %v3277_v59 }
 0x538   :  { %2510 = sbr.rel (!%p2508_p1) target bundleno = 1035 (0x40b), region = 127  ;;  %3346 = vmatpush.msra.mxu1 (%p2508_p1), %v3295_v56  ;;  %3329 = vmatmul.f32.vlgmr.msra.gmra.mxu0 (%p2508_p1), %v3275_v4 }
 0x539   : > { %v3255_v34 = vadd.f32 %v3254_v13, %v3253_v32  ;;  %v3263_v16 = vadd.f32 %v3262_v26, %v3254_v13 }
 0x53a   :  { %3347 = vmatpush.msra.mxu1 (%p2508_p1), %v3294_v17 }
 0x53b   : > { %3256 = vst [vmem:[#allocation6] sm:$0xff] %v3255_v34 }
 0x53c   : > { %3264 = vst [vmem:[#allocation4 + $0x8] sm:$0xff] %v3263_v16  ;;  %3348 = vmatpush.msra.mxu1 (%p2508_p1), %v3293_v60 }
 0x542   :  { %v3274_v58 = vld [vmem:[#allocation6] sm:$0xff] }
 0x543   :  { %v3276_v61 = vmul.f32 0.125, %v3274_v58 }
 0x545   :  { %3349 = vmatmul.f32.vlgmr.msra.gmra.mxu1 %v3276_v61 }
 0x5b5   :  { %v3330_v2 = vpop.f32.mrf.mxu0 }
 0x5b6   :  { %v3331_v5 = vadd.f32 %v3542_v63, %v3330_v2 }
 0x5c2   :  { %v3350_v6 = vpop.f32.mrf.mxu1 }
 0x5c3   :  { %v3351_v18 = vadd.f32 %v3350_v6, %v3331_v5 }
 0x5c5   :  { %3353 = vst [vmem:[#allocation22] sm:$0xff] %v3351_v18 }
 0x5c6   :  { %3364 = dma.vmem_to_hbm [thread:$0]  %s3360_s2, 128, %s3362_s3, [#allocation9]  }
 0x5c7   :  { %3801 = dma.done.wait [#allocation9], 128  }
 0x5c8   :  { %3802 = vsyncadd [#allocation9], 4294967168 }
 0x5c9   :  { %3369 = vsyncpa [#allocation8], 1 }
 0x5ca   :  { %3370 = vsyncpa [#allocation11], 1 }
 0x5cb   :  { %3371 = vsyncpa [#allocation14], 1 }
 0x5cc   :  { %3372 = vsyncpa [#allocation17], 1 }
 0x5cd   :  { %3373 = vsyncpa [#allocation20], 1 }
 0x5ce   :  { %3374 = vsyncpa [#allocation9], 1 }

</bundles_post_ra>
